<compile_context>
chip_gen: v7x
topology: tpu7x:2x2x1
jax: 0.10.0
libtpu: 0.0.40
codegen_flags: <defaults>
</compile_context>

<pallas_src>
import numpy as np
import jax
import jax.numpy as jnp
from jax import lax
from jax.experimental import pallas as pl
from jax.experimental.pallas import tpu as pltpu

HIDDEN = 50
INPUT = 1
NUM_LAYERS = 2     # hard-wired: two explicit LSTM cells inside the kernel
OUTPUT = 1
HP = 128           # lane-aligned padded hidden size (gate boundaries at k*128)


def lstm_kernel(xproj_ref,   # (T, B, 4*Hp)  precomputed x @ W_ih0^T + b0 (gate lane-padded)
                whh0_ref,    # (Hp, 4*Hp)    layer-0 recurrent weights (padded)
                w1s_ref,     # (2*Hp, 4*Hp)  layer-1 stacked [W_ih^T ; W_hh^T] (padded)
                b1_ref,      # (1, 4*Hp)     layer-1 combined bias (padded)
                fcw_ref,     # (1, Hp)       fc weight row (padded)
                fcb_ref,     # (1,) SMEM     fc bias
                out_ref):    # (B, OUTPUT)
    T, B, G = xproj_ref.shape
    Hp = G // 4

    whh0 = whh0_ref[...]
    w1s = w1s_ref[...]
    # Hoist the bias broadcast out of the loop (JAX does not CSE broadcast_in_dim).
    b1 = jnp.broadcast_to(b1_ref[...], (B, G))
    zeros = jnp.zeros((B, Hp), jnp.float32)

    def act(gates, c_prev):
        # PyTorch gate order [i, f, g, o]; each gate is exactly 128 lanes wide,
        # so all slices below are lane-aligned (pure VPU/EUP work, no XLU shuffles).
        i = jax.nn.sigmoid(gates[:, 0 * Hp:1 * Hp])
        f = jax.nn.sigmoid(gates[:, 1 * Hp:2 * Hp])
        g = jnp.tanh(gates[:, 2 * Hp:3 * Hp])
        o = jax.nn.sigmoid(gates[:, 3 * Hp:4 * Hp])
        c_new = f * c_prev + i * g
        h_new = o * jnp.tanh(c_new)
        return h_new, c_new

    def step(t, carry):
        h0, c0, h1, c1 = carry
        # Layer 0: input projection precomputed; only the recurrent dot remains.
        g0 = xproj_ref[t] + jnp.dot(h0, whh0, preferred_element_type=jnp.float32)
        h0, c0 = act(g0, c0)
        # Layer 1: single fused matmul over the stacked [h0_new, h1] input.
        hcat = jnp.concatenate([h0, h1], axis=1)                 # (B, 2*Hp)
        g1 = jnp.dot(hcat, w1s, preferred_element_type=jnp.float32) + b1
        h1, c1 = act(g1, c1)
        return (h0, c0, h1, c1)

    _, _, h1, _ = lax.fori_loop(0, T, step, (zeros, zeros, zeros, zeros),
                                unroll=True)

    # fc on the last top-layer hidden state: VPU multiply + lane reduce
    # (avoids an N=1 MXU matmul); padded lanes contribute zero.
    out_ref[...] = (jnp.sum(h1 * fcw_ref[...], axis=-1, keepdims=True)
                    + fcb_ref[0])


def _pad_gates(w, H, Hp):
    """(K, 4*H) -> (K, 4*Hp): place each gate's H columns at a 128-lane boundary."""
    K = w.shape[0]
    w4 = w.reshape(K, 4, H)
    return jnp.zeros((K, 4, Hp), w.dtype).at[:, :, :H].set(w4).reshape(K, 4 * Hp)


def lstm_forward(x, params):
    """x: (B, T, I) float32, batch_first like the PyTorch module. Returns (B, OUTPUT)."""
    wih0T, whh0T, b0, wih1T, whh1T, b1, fcwT, fcb = params
    B, T, I = x.shape
    H, Hp = HIDDEN, HP

    # ---- one-time layout / padding work, outside the serial recurrence --------
    # Layer-0 input projection for all timesteps, time-major, gate lane-padded.
    wih0p = _pad_gates(wih0T, H, Hp)                                  # (I, 4*Hp)
    b0p = _pad_gates(b0, H, Hp)                                       # (1, 4*Hp)
    xproj = (jnp.einsum('bti,ig->tbg', x, wih0p) + b0p[None]).astype(jnp.float32)

    # Layer-0 recurrent weights: rows beyond H stay zero (padded h lanes are zero).
    whh0p = jnp.zeros((Hp, 4 * Hp), jnp.float32).at[:H].set(_pad_gates(whh0T, H, Hp))

    # Layer-1 stacked [W_ih^T ; W_hh^T]: rows 0:H act on h0 lanes, rows Hp:Hp+H on h1.
    w1s = (jnp.zeros((2 * Hp, 4 * Hp), jnp.float32)
           .at[:H].set(_pad_gates(wih1T, H, Hp))
           .at[Hp:Hp + H].set(_pad_gates(whh1T, H, Hp)))
    b1p = _pad_gates(b1, H, Hp)                                       # (1, 4*Hp)

    # fc weight as a lane row; fc bias as an SMEM scalar.
    fcwp = jnp.zeros((1, Hp), jnp.float32).at[0, :H].set(fcwT[:, 0])
    fcb1 = fcb.reshape(-1)[:1]                                        # (1,)

    vmem = pl.BlockSpec(memory_space=pltpu.MemorySpace.VMEM)
    smem = pl.BlockSpec(memory_space=pltpu.MemorySpace.SMEM)

    return pl.pallas_call(
        lstm_kernel,
        out_shape=jax.ShapeDtypeStruct((B, OUTPUT), jnp.float32),
        in_specs=[vmem, vmem, vmem, vmem, vmem, smem],
        out_specs=vmem,
    )(xproj, whh0p, w1s, b1p, fcwp, fcb1)


def lstm_ref(x, params):
    """Pure-JAX reference (same math as torch nn.LSTM + Linear on last step)."""
    wih0T, whh0T, b0, wih1T, whh1T, b1, fcwT, fcb = params
    B, T, I = x.shape
    H = HIDDEN
    h0 = c0 = h1 = c1 = jnp.zeros((B, H), jnp.float32)

    def cell(xin, h, c, wihT, whhT, bb):
        gates = xin @ wihT + h @ whhT + bb
        i = jax.nn.sigmoid(gates[:, 0:H])
        f = jax.nn.sigmoid(gates[:, H:2 * H])
        g = jnp.tanh(gates[:, 2 * H:3 * H])
        o = jax.nn.sigmoid(gates[:, 3 * H:4 * H])
        c = f * c + i * g
        h = o * jnp.tanh(c)
        return h, c

    for t in range(T):
        h0, c0 = cell(x[:, t, :], h0, c0, wih0T, whh0T, b0)
        h1, c1 = cell(h0, h1, c1, wih1T, whh1T, b1)
    return h1 @ fcwT + fcb


def init_params(key):
    """Deterministic synthetic params, PyTorch-style uniform(-1/sqrt(H), 1/sqrt(H))."""
    H = HIDDEN
    k = 1.0 / np.sqrt(H)
    ks = jax.random.split(key, 8)
    u = lambda kk, shape: jax.random.uniform(kk, shape, jnp.float32, -k, k)
    wih0T = u(ks[0], (INPUT, 4 * H))     # layer-0 W_ih^T
    whh0T = u(ks[1], (H, 4 * H))         # layer-0 W_hh^T
    b0 = u(ks[2], (1, 4 * H))            # layer-0 (b_ih + b_hh) combined
    wih1T = u(ks[3], (H, 4 * H))         # layer-1 W_ih^T
    whh1T = u(ks[4], (H, 4 * H))         # layer-1 W_hh^T
    b1 = u(ks[5], (1, 4 * H))            # layer-1 combined bias
    fcwT = u(ks[6], (H, OUTPUT))         # fc weight^T
    fcb = u(ks[7], (1, OUTPUT))          # fc bias
    return (wih0T, whh0T, b0, wih1T, whh1T, b1, fcwT, fcb)


if __name__ == "__main__":
    key = jax.random.PRNGKey(0)
    k_x, k_p = jax.random.split(key)

    B, T = 2, 8
    x = jax.random.normal(k_x, (B, T, INPUT), jnp.float32)  # (batch, seq, input_size)
    params = init_params(k_p)

    out = lstm_forward(x, params)
    out = jax.block_until_ready(out)

    ref = lstm_ref(x, params)
    np.testing.assert_allclose(np.asarray(out), np.asarray(ref), rtol=1e-5, atol=1e-5)

    assert out.shape == (B, OUTPUT)
    print("KERNEL_OK")
</pallas_src>

<mosaic_0001>
module attributes {stable_mosaic.version = 11 : i64} {
  func.func @lstm_kernel(%arg0: memref<8x2x512xf32, #tpu.memory_space<vmem>>, %arg1: memref<128x512xf32, #tpu.memory_space<vmem>>, %arg2: memref<256x512xf32, #tpu.memory_space<vmem>>, %arg3: memref<1x512xf32, #tpu.memory_space<vmem>>, %arg4: memref<1x128xf32, #tpu.memory_space<vmem>>, %arg5: memref<1xf32, #tpu.memory_space<smem>>, %arg6: memref<2x1xf32, #tpu.memory_space<vmem>>) attributes {dimension_semantics = [], scalar_prefetch = 0 : i64, scratch_operands = 0 : i64, tpu.core_type = #tpu.core_type<tc>} {
    %c0 = arith.constant 0 : index
    %c0_0 = arith.constant 0 : index
    %0 = vector.load %arg1[%c0, %c0_0] : memref<128x512xf32, #tpu.memory_space<vmem>>, vector<128x512xf32>
    %c0_1 = arith.constant 0 : index
    %c0_2 = arith.constant 0 : index
    %1 = vector.load %arg2[%c0_1, %c0_2] : memref<256x512xf32, #tpu.memory_space<vmem>>, vector<256x512xf32>
    %c0_3 = arith.constant 0 : index
    %c0_4 = arith.constant 0 : index
    %2 = vector.load %arg3[%c0_3, %c0_4] : memref<1x512xf32, #tpu.memory_space<vmem>>, vector<1x512xf32>
    %3 = vector.shape_cast %2 : vector<1x512xf32> to vector<1x512xf32>
    %4 = vector.broadcast %3 : vector<1x512xf32> to vector<2x512xf32>
    %cst = arith.constant 0.000000e+00 : f32
    %5 = vector.broadcast %cst : f32 to vector<2x128xf32>
    %c0_i32 = arith.constant 0 : i32
    %6 = arith.index_cast %c0_i32 : i32 to index
    %c0_5 = arith.constant 0 : index
    %c0_6 = arith.constant 0 : index
    %7 = vector.load %arg0[%6, %c0_5, %c0_6] : memref<8x2x512xf32, #tpu.memory_space<vmem>>, vector<1x2x512xf32>
    %8 = vector.shape_cast %7 : vector<1x2x512xf32> to vector<2x512xf32>
    %cst_7 = arith.constant dense<0.000000e+00> : vector<2x512xf32>
    %9 = tpu.matmul %5, %0, %cst_7 {dimension_numbers = #tpu.dot_dimension_numbers<[1], [0], [0], [1], [0, 0, 1, 1], [], []>} : vector<2x128xf32>, vector<128x512xf32>, vector<2x512xf32> -> vector<2x512xf32>
    %10 = arith.addf %8, %9 : vector<2x512xf32>
    %11 = vector.extract_strided_slice %10 {offsets = [0, 0], sizes = [2, 128], strides = [1, 1]} : vector<2x512xf32> to vector<2x128xf32>
    %12 = arith.negf %11 : vector<2x128xf32>
    %13 = math.exp %12 : vector<2x128xf32>
    %cst_8 = arith.constant 1.000000e+00 : f32
    %14 = vector.broadcast %cst_8 : f32 to vector<2x128xf32>
    %15 = arith.addf %14, %13 : vector<2x128xf32>
    %16 = arith.divf %14, %15 : vector<2x128xf32>
    %17 = vector.extract_strided_slice %10 {offsets = [0, 128], sizes = [2, 128], strides = [1, 1]} : vector<2x512xf32> to vector<2x128xf32>
    %18 = arith.negf %17 : vector<2x128xf32>
    %19 = math.exp %18 : vector<2x128xf32>
    %cst_9 = arith.constant 1.000000e+00 : f32
    %20 = vector.broadcast %cst_9 : f32 to vector<2x128xf32>
    %21 = arith.addf %20, %19 : vector<2x128xf32>
    %22 = arith.divf %20, %21 : vector<2x128xf32>
    %23 = vector.extract_strided_slice %10 {offsets = [0, 256], sizes = [2, 128], strides = [1, 1]} : vector<2x512xf32> to vector<2x128xf32>
    %24 = math.tanh %23 : vector<2x128xf32>
    %25 = vector.extract_strided_slice %10 {offsets = [0, 384], sizes = [2, 128], strides = [1, 1]} : vector<2x512xf32> to vector<2x128xf32>
    %26 = arith.negf %25 : vector<2x128xf32>
    %27 = math.exp %26 : vector<2x128xf32>
    %cst_10 = arith.constant 1.000000e+00 : f32
    %28 = vector.broadcast %cst_10 : f32 to vector<2x128xf32>
    %29 = arith.addf %28, %27 : vector<2x128xf32>
    %30 = arith.divf %28, %29 : vector<2x128xf32>
    %31 = arith.mulf %22, %5 : vector<2x128xf32>
    %32 = arith.mulf %16, %24 : vector<2x128xf32>
    %33 = arith.addf %31, %32 : vector<2x128xf32>
    %34 = math.tanh %33 : vector<2x128xf32>
    %35 = arith.mulf %30, %34 : vector<2x128xf32>
    %36 = tpu.concatenate %35, %5 in 1 : vector<2x128xf32>, vector<2x128xf32> -> vector<2x256xf32>
    %cst_11 = arith.constant dense<0.000000e+00> : vector<2x512xf32>
    %37 = tpu.matmul %36, %1, %cst_11 {dimension_numbers = #tpu.dot_dimension_numbers<[1], [0], [0], [1], [0, 0, 1, 1], [], []>} : vector<2x256xf32>, vector<256x512xf32>, vector<2x512xf32> -> vector<2x512xf32>
    %38 = arith.addf %37, %4 : vector<2x512xf32>
    %39 = vector.extract_strided_slice %38 {offsets = [0, 0], sizes = [2, 128], strides = [1, 1]} : vector<2x512xf32> to vector<2x128xf32>
    %40 = arith.negf %39 : vector<2x128xf32>
    %41 = math.exp %40 : vector<2x128xf32>
    %cst_12 = arith.constant 1.000000e+00 : f32
    %42 = vector.broadcast %cst_12 : f32 to vector<2x128xf32>
    %43 = arith.addf %42, %41 : vector<2x128xf32>
    %44 = arith.divf %42, %43 : vector<2x128xf32>
    %45 = vector.extract_strided_slice %38 {offsets = [0, 128], sizes = [2, 128], strides = [1, 1]} : vector<2x512xf32> to vector<2x128xf32>
    %46 = arith.negf %45 : vector<2x128xf32>
    %47 = math.exp %46 : vector<2x128xf32>
    %cst_13 = arith.constant 1.000000e+00 : f32
    %48 = vector.broadcast %cst_13 : f32 to vector<2x128xf32>
    %49 = arith.addf %48, %47 : vector<2x128xf32>
    %50 = arith.divf %48, %49 : vector<2x128xf32>
    %51 = vector.extract_strided_slice %38 {offsets = [0, 256], sizes = [2, 128], strides = [1, 1]} : vector<2x512xf32> to vector<2x128xf32>
    %52 = math.tanh %51 : vector<2x128xf32>
    %53 = vector.extract_strided_slice %38 {offsets = [0, 384], sizes = [2, 128], strides = [1, 1]} : vector<2x512xf32> to vector<2x128xf32>
    %54 = arith.negf %53 : vector<2x128xf32>
    %55 = math.exp %54 : vector<2x128xf32>
    %cst_14 = arith.constant 1.000000e+00 : f32
    %56 = vector.broadcast %cst_14 : f32 to vector<2x128xf32>
    %57 = arith.addf %56, %55 : vector<2x128xf32>
    %58 = arith.divf %56, %57 : vector<2x128xf32>
    %59 = arith.mulf %50, %5 : vector<2x128xf32>
    %60 = arith.mulf %44, %52 : vector<2x128xf32>
    %61 = arith.addf %59, %60 : vector<2x128xf32>
    %62 = math.tanh %61 : vector<2x128xf32>
    %63 = arith.mulf %58, %62 : vector<2x128xf32>
    %c1_i32 = arith.constant 1 : i32
    %64 = arith.index_cast %c1_i32 : i32 to index
    %c0_15 = arith.constant 0 : index
    %c0_16 = arith.constant 0 : index
    %65 = vector.load %arg0[%64, %c0_15, %c0_16] : memref<8x2x512xf32, #tpu.memory_space<vmem>>, vector<1x2x512xf32>
    %66 = vector.shape_cast %65 : vector<1x2x512xf32> to vector<2x512xf32>
    %cst_17 = arith.constant dense<0.000000e+00> : vector<2x512xf32>
    %67 = tpu.matmul %35, %0, %cst_17 {dimension_numbers = #tpu.dot_dimension_numbers<[1], [0], [0], [1], [0, 0, 1, 1], [], []>} : vector<2x128xf32>, vector<128x512xf32>, vector<2x512xf32> -> vector<2x512xf32>
    %68 = arith.addf %66, %67 : vector<2x512xf32>
    %69 = vector.extract_strided_slice %68 {offsets = [0, 0], sizes = [2, 128], strides = [1, 1]} : vector<2x512xf32> to vector<2x128xf32>
    %70 = arith.negf %69 : vector<2x128xf32>
    %71 = math.exp %70 : vector<2x128xf32>
    %cst_18 = arith.constant 1.000000e+00 : f32
    %72 = vector.broadcast %cst_18 : f32 to vector<2x128xf32>
    %73 = arith.addf %72, %71 : vector<2x128xf32>
    %74 = arith.divf %72, %73 : vector<2x128xf32>
    %75 = vector.extract_strided_slice %68 {offsets = [0, 128], sizes = [2, 128], strides = [1, 1]} : vector<2x512xf32> to vector<2x128xf32>
    %76 = arith.negf %75 : vector<2x128xf32>
    %77 = math.exp %76 : vector<2x128xf32>
    %cst_19 = arith.constant 1.000000e+00 : f32
    %78 = vector.broadcast %cst_19 : f32 to vector<2x128xf32>
    %79 = arith.addf %78, %77 : vector<2x128xf32>
    %80 = arith.divf %78, %79 : vector<2x128xf32>
    %81 = vector.extract_strided_slice %68 {offsets = [0, 256], sizes = [2, 128], strides = [1, 1]} : vector<2x512xf32> to vector<2x128xf32>
    %82 = math.tanh %81 : vector<2x128xf32>
    %83 = vector.extract_strided_slice %68 {offsets = [0, 384], sizes = [2, 128], strides = [1, 1]} : vector<2x512xf32> to vector<2x128xf32>
    %84 = arith.negf %83 : vector<2x128xf32>
    %85 = math.exp %84 : vector<2x128xf32>
    %cst_20 = arith.constant 1.000000e+00 : f32
    %86 = vector.broadcast %cst_20 : f32 to vector<2x128xf32>
    %87 = arith.addf %86, %85 : vector<2x128xf32>
    %88 = arith.divf %86, %87 : vector<2x128xf32>
    %89 = arith.mulf %80, %33 : vector<2x128xf32>
    %90 = arith.mulf %74, %82 : vector<2x128xf32>
    %91 = arith.addf %89, %90 : vector<2x128xf32>
    %92 = math.tanh %91 : vector<2x128xf32>
    %93 = arith.mulf %88, %92 : vector<2x128xf32>
    %94 = tpu.concatenate %93, %63 in 1 : vector<2x128xf32>, vector<2x128xf32> -> vector<2x256xf32>
    %cst_21 = arith.constant dense<0.000000e+00> : vector<2x512xf32>
    %95 = tpu.matmul %94, %1, %cst_21 {dimension_numbers = #tpu.dot_dimension_numbers<[1], [0], [0], [1], [0, 0, 1, 1], [], []>} : vector<2x256xf32>, vector<256x512xf32>, vector<2x512xf32> -> vector<2x512xf32>
    %96 = arith.addf %95, %4 : vector<2x512xf32>
    %97 = vector.extract_strided_slice %96 {offsets = [0, 0], sizes = [2, 128], strides = [1, 1]} : vector<2x512xf32> to vector<2x128xf32>
    %98 = arith.negf %97 : vector<2x128xf32>
    %99 = math.exp %98 : vector<2x128xf32>
    %cst_22 = arith.constant 1.000000e+00 : f32
    %100 = vector.broadcast %cst_22 : f32 to vector<2x128xf32>
    %101 = arith.addf %100, %99 : vector<2x128xf32>
    %102 = arith.divf %100, %101 : vector<2x128xf32>
    %103 = vector.extract_strided_slice %96 {offsets = [0, 128], sizes = [2, 128], strides = [1, 1]} : vector<2x512xf32> to vector<2x128xf32>
    %104 = arith.negf %103 : vector<2x128xf32>
    %105 = math.exp %104 : vector<2x128xf32>
    %cst_23 = arith.constant 1.000000e+00 : f32
    %106 = vector.broadcast %cst_23 : f32 to vector<2x128xf32>
    %107 = arith.addf %106, %105 : vector<2x128xf32>
    %108 = arith.divf %106, %107 : vector<2x128xf32>
    %109 = vector.extract_strided_slice %96 {offsets = [0, 256], sizes = [2, 128], strides = [1, 1]} : vector<2x512xf32> to vector<2x128xf32>
    %110 = math.tanh %109 : vector<2x128xf32>
    %111 = vector.extract_strided_slice %96 {offsets = [0, 384], sizes = [2, 128], strides = [1, 1]} : vector<2x512xf32> to vector<2x128xf32>
    %112 = arith.negf %111 : vector<2x128xf32>
    %113 = math.exp %112 : vector<2x128xf32>
    %cst_24 = arith.constant 1.000000e+00 : f32
    %114 = vector.broadcast %cst_24 : f32 to vector<2x128xf32>
    %115 = arith.addf %114, %113 : vector<2x128xf32>
    %116 = arith.divf %114, %115 : vector<2x128xf32>
    %117 = arith.mulf %108, %61 : vector<2x128xf32>
    %118 = arith.mulf %102, %110 : vector<2x128xf32>
    %119 = arith.addf %117, %118 : vector<2x128xf32>
    %120 = math.tanh %119 : vector<2x128xf32>
    %121 = arith.mulf %116, %120 : vector<2x128xf32>
    %c2_i32 = arith.constant 2 : i32
    %122 = arith.index_cast %c2_i32 : i32 to index
    %c0_25 = arith.constant 0 : index
    %c0_26 = arith.constant 0 : index
    %123 = vector.load %arg0[%122, %c0_25, %c0_26] : memref<8x2x512xf32, #tpu.memory_space<vmem>>, vector<1x2x512xf32>
    %124 = vector.shape_cast %123 : vector<1x2x512xf32> to vector<2x512xf32>
    %cst_27 = arith.constant dense<0.000000e+00> : vector<2x512xf32>
    %125 = tpu.matmul %93, %0, %cst_27 {dimension_numbers = #tpu.dot_dimension_numbers<[1], [0], [0], [1], [0, 0, 1, 1], [], []>} : vector<2x128xf32>, vector<128x512xf32>, vector<2x512xf32> -> vector<2x512xf32>
    %126 = arith.addf %124, %125 : vector<2x512xf32>
    %127 = vector.extract_strided_slice %126 {offsets = [0, 0], sizes = [2, 128], strides = [1, 1]} : vector<2x512xf32> to vector<2x128xf32>
    %128 = arith.negf %127 : vector<2x128xf32>
    %129 = math.exp %128 : vector<2x128xf32>
    %cst_28 = arith.constant 1.000000e+00 : f32
    %130 = vector.broadcast %cst_28 : f32 to vector<2x128xf32>
    %131 = arith.addf %130, %129 : vector<2x128xf32>
    %132 = arith.divf %130, %131 : vector<2x128xf32>
    %133 = vector.extract_strided_slice %126 {offsets = [0, 128], sizes = [2, 128], strides = [1, 1]} : vector<2x512xf32> to vector<2x128xf32>
    %134 = arith.negf %133 : vector<2x128xf32>
    %135 = math.exp %134 : vector<2x128xf32>
    %cst_29 = arith.constant 1.000000e+00 : f32
    %136 = vector.broadcast %cst_29 : f32 to vector<2x128xf32>
    %137 = arith.addf %136, %135 : vector<2x128xf32>
    %138 = arith.divf %136, %137 : vector<2x128xf32>
    %139 = vector.extract_strided_slice %126 {offsets = [0, 256], sizes = [2, 128], strides = [1, 1]} : vector<2x512xf32> to vector<2x128xf32>
    %140 = math.tanh %139 : vector<2x128xf32>
    %141 = vector.extract_strided_slice %126 {offsets = [0, 384], sizes = [2, 128], strides = [1, 1]} : vector<2x512xf32> to vector<2x128xf32>
    %142 = arith.negf %141 : vector<2x128xf32>
    %143 = math.exp %142 : vector<2x128xf32>
    %cst_30 = arith.constant 1.000000e+00 : f32
    %144 = vector.broadcast %cst_30 : f32 to vector<2x128xf32>
    %145 = arith.addf %144, %143 : vector<2x128xf32>
    %146 = arith.divf %144, %145 : vector<2x128xf32>
    %147 = arith.mulf %138, %91 : vector<2x128xf32>
    %148 = arith.mulf %132, %140 : vector<2x128xf32>
    %149 = arith.addf %147, %148 : vector<2x128xf32>
    %150 = math.tanh %149 : vector<2x128xf32>
    %151 = arith.mulf %146, %150 : vector<2x128xf32>
    %152 = tpu.concatenate %151, %121 in 1 : vector<2x128xf32>, vector<2x128xf32> -> vector<2x256xf32>
    %cst_31 = arith.constant dense<0.000000e+00> : vector<2x512xf32>
    %153 = tpu.matmul %152, %1, %cst_31 {dimension_numbers = #tpu.dot_dimension_numbers<[1], [0], [0], [1], [0, 0, 1, 1], [], []>} : vector<2x256xf32>, vector<256x512xf32>, vector<2x512xf32> -> vector<2x512xf32>
    %154 = arith.addf %153, %4 : vector<2x512xf32>
    %155 = vector.extract_strided_slice %154 {offsets = [0, 0], sizes = [2, 128], strides = [1, 1]} : vector<2x512xf32> to vector<2x128xf32>
    %156 = arith.negf %155 : vector<2x128xf32>
    %157 = math.exp %156 : vector<2x128xf32>
    %cst_32 = arith.constant 1.000000e+00 : f32
    %158 = vector.broadcast %cst_32 : f32 to vector<2x128xf32>
    %159 = arith.addf %158, %157 : vector<2x128xf32>
    %160 = arith.divf %158, %159 : vector<2x128xf32>
    %161 = vector.extract_strided_slice %154 {offsets = [0, 128], sizes = [2, 128], strides = [1, 1]} : vector<2x512xf32> to vector<2x128xf32>
    %162 = arith.negf %161 : vector<2x128xf32>
    %163 = math.exp %162 : vector<2x128xf32>
    %cst_33 = arith.constant 1.000000e+00 : f32
    %164 = vector.broadcast %cst_33 : f32 to vector<2x128xf32>
    %165 = arith.addf %164, %163 : vector<2x128xf32>
    %166 = arith.divf %164, %165 : vector<2x128xf32>
    %167 = vector.extract_strided_slice %154 {offsets = [0, 256], sizes = [2, 128], strides = [1, 1]} : vector<2x512xf32> to vector<2x128xf32>
    %168 = math.tanh %167 : vector<2x128xf32>
    %169 = vector.extract_strided_slice %154 {offsets = [0, 384], sizes = [2, 128], strides = [1, 1]} : vector<2x512xf32> to vector<2x128xf32>
    %170 = arith.negf %169 : vector<2x128xf32>
    %171 = math.exp %170 : vector<2x128xf32>
    %cst_34 = arith.constant 1.000000e+00 : f32
    %172 = vector.broadcast %cst_34 : f32 to vector<2x128xf32>
    %173 = arith.addf %172, %171 : vector<2x128xf32>
    %174 = arith.divf %172, %173 : vector<2x128xf32>
    %175 = arith.mulf %166, %119 : vector<2x128xf32>
    %176 = arith.mulf %160, %168 : vector<2x128xf32>
    %177 = arith.addf %175, %176 : vector<2x128xf32>
    %178 = math.tanh %177 : vector<2x128xf32>
    %179 = arith.mulf %174, %178 : vector<2x128xf32>
    %c3_i32 = arith.constant 3 : i32
    %180 = arith.index_cast %c3_i32 : i32 to index
    %c0_35 = arith.constant 0 : index
    %c0_36 = arith.constant 0 : index
    %181 = vector.load %arg0[%180, %c0_35, %c0_36] : memref<8x2x512xf32, #tpu.memory_space<vmem>>, vector<1x2x512xf32>
    %182 = vector.shape_cast %181 : vector<1x2x512xf32> to vector<2x512xf32>
    %cst_37 = arith.constant dense<0.000000e+00> : vector<2x512xf32>
    %183 = tpu.matmul %151, %0, %cst_37 {dimension_numbers = #tpu.dot_dimension_numbers<[1], [0], [0], [1], [0, 0, 1, 1], [], []>} : vector<2x128xf32>, vector<128x512xf32>, vector<2x512xf32> -> vector<2x512xf32>
    %184 = arith.addf %182, %183 : vector<2x512xf32>
    %185 = vector.extract_strided_slice %184 {offsets = [0, 0], sizes = [2, 128], strides = [1, 1]} : vector<2x512xf32> to vector<2x128xf32>
    %186 = arith.negf %185 : vector<2x128xf32>
    %187 = math.exp %186 : vector<2x128xf32>
    %cst_38 = arith.constant 1.000000e+00 : f32
    %188 = vector.broadcast %cst_38 : f32 to vector<2x128xf32>
    %189 = arith.addf %188, %187 : vector<2x128xf32>
    %190 = arith.divf %188, %189 : vector<2x128xf32>
    %191 = vector.extract_strided_slice %184 {offsets = [0, 128], sizes = [2, 128], strides = [1, 1]} : vector<2x512xf32> to vector<2x128xf32>
    %192 = arith.negf %191 : vector<2x128xf32>
    %193 = math.exp %192 : vector<2x128xf32>
    %cst_39 = arith.constant 1.000000e+00 : f32
    %194 = vector.broadcast %cst_39 : f32 to vector<2x128xf32>
    %195 = arith.addf %194, %193 : vector<2x128xf32>
    %196 = arith.divf %194, %195 : vector<2x128xf32>
    %197 = vector.extract_strided_slice %184 {offsets = [0, 256], sizes = [2, 128], strides = [1, 1]} : vector<2x512xf32> to vector<2x128xf32>
    %198 = math.tanh %197 : vector<2x128xf32>
    %199 = vector.extract_strided_slice %184 {offsets = [0, 384], sizes = [2, 128], strides = [1, 1]} : vector<2x512xf32> to vector<2x128xf32>
    %200 = arith.negf %199 : vector<2x128xf32>
    %201 = math.exp %200 : vector<2x128xf32>
    %cst_40 = arith.constant 1.000000e+00 : f32
    %202 = vector.broadcast %cst_40 : f32 to vector<2x128xf32>
    %203 = arith.addf %202, %201 : vector<2x128xf32>
    %204 = arith.divf %202, %203 : vector<2x128xf32>
    %205 = arith.mulf %196, %149 : vector<2x128xf32>
    %206 = arith.mulf %190, %198 : vector<2x128xf32>
    %207 = arith.addf %205, %206 : vector<2x128xf32>
    %208 = math.tanh %207 : vector<2x128xf32>
    %209 = arith.mulf %204, %208 : vector<2x128xf32>
    %210 = tpu.concatenate %209, %179 in 1 : vector<2x128xf32>, vector<2x128xf32> -> vector<2x256xf32>
    %cst_41 = arith.constant dense<0.000000e+00> : vector<2x512xf32>
    %211 = tpu.matmul %210, %1, %cst_41 {dimension_numbers = #tpu.dot_dimension_numbers<[1], [0], [0], [1], [0, 0, 1, 1], [], []>} : vector<2x256xf32>, vector<256x512xf32>, vector<2x512xf32> -> vector<2x512xf32>
    %212 = arith.addf %211, %4 : vector<2x512xf32>
    %213 = vector.extract_strided_slice %212 {offsets = [0, 0], sizes = [2, 128], strides = [1, 1]} : vector<2x512xf32> to vector<2x128xf32>
    %214 = arith.negf %213 : vector<2x128xf32>
    %215 = math.exp %214 : vector<2x128xf32>
    %cst_42 = arith.constant 1.000000e+00 : f32
    %216 = vector.broadcast %cst_42 : f32 to vector<2x128xf32>
    %217 = arith.addf %216, %215 : vector<2x128xf32>
    %218 = arith.divf %216, %217 : vector<2x128xf32>
    %219 = vector.extract_strided_slice %212 {offsets = [0, 128], sizes = [2, 128], strides = [1, 1]} : vector<2x512xf32> to vector<2x128xf32>
    %220 = arith.negf %219 : vector<2x128xf32>
    %221 = math.exp %220 : vector<2x128xf32>
    %cst_43 = arith.constant 1.000000e+00 : f32
    %222 = vector.broadcast %cst_43 : f32 to vector<2x128xf32>
    %223 = arith.addf %222, %221 : vector<2x128xf32>
    %224 = arith.divf %222, %223 : vector<2x128xf32>
    %225 = vector.extract_strided_slice %212 {offsets = [0, 256], sizes = [2, 128], strides = [1, 1]} : vector<2x512xf32> to vector<2x128xf32>
    %226 = math.tanh %225 : vector<2x128xf32>
    %227 = vector.extract_strided_slice %212 {offsets = [0, 384], sizes = [2, 128], strides = [1, 1]} : vector<2x512xf32> to vector<2x128xf32>
    %228 = arith.negf %227 : vector<2x128xf32>
    %229 = math.exp %228 : vector<2x128xf32>
    %cst_44 = arith.constant 1.000000e+00 : f32
    %230 = vector.broadcast %cst_44 : f32 to vector<2x128xf32>
    %231 = arith.addf %230, %229 : vector<2x128xf32>
    %232 = arith.divf %230, %231 : vector<2x128xf32>
    %233 = arith.mulf %224, %177 : vector<2x128xf32>
    %234 = arith.mulf %218, %226 : vector<2x128xf32>
    %235 = arith.addf %233, %234 : vector<2x128xf32>
    %236 = math.tanh %235 : vector<2x128xf32>
    %237 = arith.mulf %232, %236 : vector<2x128xf32>
    %c4_i32 = arith.constant 4 : i32
    %238 = arith.index_cast %c4_i32 : i32 to index
    %c0_45 = arith.constant 0 : index
    %c0_46 = arith.constant 0 : index
    %239 = vector.load %arg0[%238, %c0_45, %c0_46] : memref<8x2x512xf32, #tpu.memory_space<vmem>>, vector<1x2x512xf32>
    %240 = vector.shape_cast %239 : vector<1x2x512xf32> to vector<2x512xf32>
    %cst_47 = arith.constant dense<0.000000e+00> : vector<2x512xf32>
    %241 = tpu.matmul %209, %0, %cst_47 {dimension_numbers = #tpu.dot_dimension_numbers<[1], [0], [0], [1], [0, 0, 1, 1], [], []>} : vector<2x128xf32>, vector<128x512xf32>, vector<2x512xf32> -> vector<2x512xf32>
    %242 = arith.addf %240, %241 : vector<2x512xf32>
    %243 = vector.extract_strided_slice %242 {offsets = [0, 0], sizes = [2, 128], strides = [1, 1]} : vector<2x512xf32> to vector<2x128xf32>
    %244 = arith.negf %243 : vector<2x128xf32>
    %245 = math.exp %244 : vector<2x128xf32>
    %cst_48 = arith.constant 1.000000e+00 : f32
    %246 = vector.broadcast %cst_48 : f32 to vector<2x128xf32>
    %247 = arith.addf %246, %245 : vector<2x128xf32>
    %248 = arith.divf %246, %247 : vector<2x128xf32>
    %249 = vector.extract_strided_slice %242 {offsets = [0, 128], sizes = [2, 128], strides = [1, 1]} : vector<2x512xf32> to vector<2x128xf32>
    %250 = arith.negf %249 : vector<2x128xf32>
    %251 = math.exp %250 : vector<2x128xf32>
    %cst_49 = arith.constant 1.000000e+00 : f32
    %252 = vector.broadcast %cst_49 : f32 to vector<2x128xf32>
    %253 = arith.addf %252, %251 : vector<2x128xf32>
    %254 = arith.divf %252, %253 : vector<2x128xf32>
    %255 = vector.extract_strided_slice %242 {offsets = [0, 256], sizes = [2, 128], strides = [1, 1]} : vector<2x512xf32> to vector<2x128xf32>
    %256 = math.tanh %255 : vector<2x128xf32>
    %257 = vector.extract_strided_slice %242 {offsets = [0, 384], sizes = [2, 128], strides = [1, 1]} : vector<2x512xf32> to vector<2x128xf32>
    %258 = arith.negf %257 : vector<2x128xf32>
    %259 = math.exp %258 : vector<2x128xf32>
    %cst_50 = arith.constant 1.000000e+00 : f32
    %260 = vector.broadcast %cst_50 : f32 to vector<2x128xf32>
    %261 = arith.addf %260, %259 : vector<2x128xf32>
    %262 = arith.divf %260, %261 : vector<2x128xf32>
    %263 = arith.mulf %254, %207 : vector<2x128xf32>
    %264 = arith.mulf %248, %256 : vector<2x128xf32>
    %265 = arith.addf %263, %264 : vector<2x128xf32>
    %266 = math.tanh %265 : vector<2x128xf32>
    %267 = arith.mulf %262, %266 : vector<2x128xf32>
    %268 = tpu.concatenate %267, %237 in 1 : vector<2x128xf32>, vector<2x128xf32> -> vector<2x256xf32>
    %cst_51 = arith.constant dense<0.000000e+00> : vector<2x512xf32>
    %269 = tpu.matmul %268, %1, %cst_51 {dimension_numbers = #tpu.dot_dimension_numbers<[1], [0], [0], [1], [0, 0, 1, 1], [], []>} : vector<2x256xf32>, vector<256x512xf32>, vector<2x512xf32> -> vector<2x512xf32>
    %270 = arith.addf %269, %4 : vector<2x512xf32>
    %271 = vector.extract_strided_slice %270 {offsets = [0, 0], sizes = [2, 128], strides = [1, 1]} : vector<2x512xf32> to vector<2x128xf32>
    %272 = arith.negf %271 : vector<2x128xf32>
    %273 = math.exp %272 : vector<2x128xf32>
    %cst_52 = arith.constant 1.000000e+00 : f32
    %274 = vector.broadcast %cst_52 : f32 to vector<2x128xf32>
    %275 = arith.addf %274, %273 : vector<2x128xf32>
    %276 = arith.divf %274, %275 : vector<2x128xf32>
    %277 = vector.extract_strided_slice %270 {offsets = [0, 128], sizes = [2, 128], strides = [1, 1]} : vector<2x512xf32> to vector<2x128xf32>
    %278 = arith.negf %277 : vector<2x128xf32>
    %279 = math.exp %278 : vector<2x128xf32>
    %cst_53 = arith.constant 1.000000e+00 : f32
    %280 = vector.broadcast %cst_53 : f32 to vector<2x128xf32>
    %281 = arith.addf %280, %279 : vector<2x128xf32>
    %282 = arith.divf %280, %281 : vector<2x128xf32>
    %283 = vector.extract_strided_slice %270 {offsets = [0, 256], sizes = [2, 128], strides = [1, 1]} : vector<2x512xf32> to vector<2x128xf32>
    %284 = math.tanh %283 : vector<2x128xf32>
    %285 = vector.extract_strided_slice %270 {offsets = [0, 384], sizes = [2, 128], strides = [1, 1]} : vector<2x512xf32> to vector<2x128xf32>
    %286 = arith.negf %285 : vector<2x128xf32>
    %287 = math.exp %286 : vector<2x128xf32>
    %cst_54 = arith.constant 1.000000e+00 : f32
    %288 = vector.broadcast %cst_54 : f32 to vector<2x128xf32>
    %289 = arith.addf %288, %287 : vector<2x128xf32>
    %290 = arith.divf %288, %289 : vector<2x128xf32>
    %291 = arith.mulf %282, %235 : vector<2x128xf32>
    %292 = arith.mulf %276, %284 : vector<2x128xf32>
    %293 = arith.addf %291, %292 : vector<2x128xf32>
    %294 = math.tanh %293 : vector<2x128xf32>
    %295 = arith.mulf %290, %294 : vector<2x128xf32>
    %c5_i32 = arith.constant 5 : i32
    %296 = arith.index_cast %c5_i32 : i32 to index
    %c0_55 = arith.constant 0 : index
    %c0_56 = arith.constant 0 : index
    %297 = vector.load %arg0[%296, %c0_55, %c0_56] : memref<8x2x512xf32, #tpu.memory_space<vmem>>, vector<1x2x512xf32>
    %298 = vector.shape_cast %297 : vector<1x2x512xf32> to vector<2x512xf32>
    %cst_57 = arith.constant dense<0.000000e+00> : vector<2x512xf32>
    %299 = tpu.matmul %267, %0, %cst_57 {dimension_numbers = #tpu.dot_dimension_numbers<[1], [0], [0], [1], [0, 0, 1, 1], [], []>} : vector<2x128xf32>, vector<128x512xf32>, vector<2x512xf32> -> vector<2x512xf32>
    %300 = arith.addf %298, %299 : vector<2x512xf32>
    %301 = vector.extract_strided_slice %300 {offsets = [0, 0], sizes = [2, 128], strides = [1, 1]} : vector<2x512xf32> to vector<2x128xf32>
    %302 = arith.negf %301 : vector<2x128xf32>
    %303 = math.exp %302 : vector<2x128xf32>
    %cst_58 = arith.constant 1.000000e+00 : f32
    %304 = vector.broadcast %cst_58 : f32 to vector<2x128xf32>
    %305 = arith.addf %304, %303 : vector<2x128xf32>
    %306 = arith.divf %304, %305 : vector<2x128xf32>
    %307 = vector.extract_strided_slice %300 {offsets = [0, 128], sizes = [2, 128], strides = [1, 1]} : vector<2x512xf32> to vector<2x128xf32>
    %308 = arith.negf %307 : vector<2x128xf32>
    %309 = math.exp %308 : vector<2x128xf32>
    %cst_59 = arith.constant 1.000000e+00 : f32
    %310 = vector.broadcast %cst_59 : f32 to vector<2x128xf32>
    %311 = arith.addf %310, %309 : vector<2x128xf32>
    %312 = arith.divf %310, %311 : vector<2x128xf32>
    %313 = vector.extract_strided_slice %300 {offsets = [0, 256], sizes = [2, 128], strides = [1, 1]} : vector<2x512xf32> to vector<2x128xf32>
    %314 = math.tanh %313 : vector<2x128xf32>
    %315 = vector.extract_strided_slice %300 {offsets = [0, 384], sizes = [2, 128], strides = [1, 1]} : vector<2x512xf32> to vector<2x128xf32>
    %316 = arith.negf %315 : vector<2x128xf32>
    %317 = math.exp %316 : vector<2x128xf32>
    %cst_60 = arith.constant 1.000000e+00 : f32
    %318 = vector.broadcast %cst_60 : f32 to vector<2x128xf32>
    %319 = arith.addf %318, %317 : vector<2x128xf32>
    %320 = arith.divf %318, %319 : vector<2x128xf32>
    %321 = arith.mulf %312, %265 : vector<2x128xf32>
    %322 = arith.mulf %306, %314 : vector<2x128xf32>
    %323 = arith.addf %321, %322 : vector<2x128xf32>
    %324 = math.tanh %323 : vector<2x128xf32>
    %325 = arith.mulf %320, %324 : vector<2x128xf32>
    %326 = tpu.concatenate %325, %295 in 1 : vector<2x128xf32>, vector<2x128xf32> -> vector<2x256xf32>
    %cst_61 = arith.constant dense<0.000000e+00> : vector<2x512xf32>
    %327 = tpu.matmul %326, %1, %cst_61 {dimension_numbers = #tpu.dot_dimension_numbers<[1], [0], [0], [1], [0, 0, 1, 1], [], []>} : vector<2x256xf32>, vector<256x512xf32>, vector<2x512xf32> -> vector<2x512xf32>
    %328 = arith.addf %327, %4 : vector<2x512xf32>
    %329 = vector.extract_strided_slice %328 {offsets = [0, 0], sizes = [2, 128], strides = [1, 1]} : vector<2x512xf32> to vector<2x128xf32>
    %330 = arith.negf %329 : vector<2x128xf32>
    %331 = math.exp %330 : vector<2x128xf32>
    %cst_62 = arith.constant 1.000000e+00 : f32
    %332 = vector.broadcast %cst_62 : f32 to vector<2x128xf32>
    %333 = arith.addf %332, %331 : vector<2x128xf32>
    %334 = arith.divf %332, %333 : vector<2x128xf32>
    %335 = vector.extract_strided_slice %328 {offsets = [0, 128], sizes = [2, 128], strides = [1, 1]} : vector<2x512xf32> to vector<2x128xf32>
    %336 = arith.negf %335 : vector<2x128xf32>
    %337 = math.exp %336 : vector<2x128xf32>
    %cst_63 = arith.constant 1.000000e+00 : f32
    %338 = vector.broadcast %cst_63 : f32 to vector<2x128xf32>
    %339 = arith.addf %338, %337 : vector<2x128xf32>
    %340 = arith.divf %338, %339 : vector<2x128xf32>
    %341 = vector.extract_strided_slice %328 {offsets = [0, 256], sizes = [2, 128], strides = [1, 1]} : vector<2x512xf32> to vector<2x128xf32>
    %342 = math.tanh %341 : vector<2x128xf32>
    %343 = vector.extract_strided_slice %328 {offsets = [0, 384], sizes = [2, 128], strides = [1, 1]} : vector<2x512xf32> to vector<2x128xf32>
    %344 = arith.negf %343 : vector<2x128xf32>
    %345 = math.exp %344 : vector<2x128xf32>
    %cst_64 = arith.constant 1.000000e+00 : f32
    %346 = vector.broadcast %cst_64 : f32 to vector<2x128xf32>
    %347 = arith.addf %346, %345 : vector<2x128xf32>
    %348 = arith.divf %346, %347 : vector<2x128xf32>
    %349 = arith.mulf %340, %293 : vector<2x128xf32>
    %350 = arith.mulf %334, %342 : vector<2x128xf32>
    %351 = arith.addf %349, %350 : vector<2x128xf32>
    %352 = math.tanh %351 : vector<2x128xf32>
    %353 = arith.mulf %348, %352 : vector<2x128xf32>
    %c6_i32 = arith.constant 6 : i32
    %354 = arith.index_cast %c6_i32 : i32 to index
    %c0_65 = arith.constant 0 : index
    %c0_66 = arith.constant 0 : index
    %355 = vector.load %arg0[%354, %c0_65, %c0_66] : memref<8x2x512xf32, #tpu.memory_space<vmem>>, vector<1x2x512xf32>
    %356 = vector.shape_cast %355 : vector<1x2x512xf32> to vector<2x512xf32>
    %cst_67 = arith.constant dense<0.000000e+00> : vector<2x512xf32>
    %357 = tpu.matmul %325, %0, %cst_67 {dimension_numbers = #tpu.dot_dimension_numbers<[1], [0], [0], [1], [0, 0, 1, 1], [], []>} : vector<2x128xf32>, vector<128x512xf32>, vector<2x512xf32> -> vector<2x512xf32>
    %358 = arith.addf %356, %357 : vector<2x512xf32>
    %359 = vector.extract_strided_slice %358 {offsets = [0, 0], sizes = [2, 128], strides = [1, 1]} : vector<2x512xf32> to vector<2x128xf32>
    %360 = arith.negf %359 : vector<2x128xf32>
    %361 = math.exp %360 : vector<2x128xf32>
    %cst_68 = arith.constant 1.000000e+00 : f32
    %362 = vector.broadcast %cst_68 : f32 to vector<2x128xf32>
    %363 = arith.addf %362, %361 : vector<2x128xf32>
    %364 = arith.divf %362, %363 : vector<2x128xf32>
    %365 = vector.extract_strided_slice %358 {offsets = [0, 128], sizes = [2, 128], strides = [1, 1]} : vector<2x512xf32> to vector<2x128xf32>
    %366 = arith.negf %365 : vector<2x128xf32>
    %367 = math.exp %366 : vector<2x128xf32>
    %cst_69 = arith.constant 1.000000e+00 : f32
    %368 = vector.broadcast %cst_69 : f32 to vector<2x128xf32>
    %369 = arith.addf %368, %367 : vector<2x128xf32>
    %370 = arith.divf %368, %369 : vector<2x128xf32>
    %371 = vector.extract_strided_slice %358 {offsets = [0, 256], sizes = [2, 128], strides = [1, 1]} : vector<2x512xf32> to vector<2x128xf32>
    %372 = math.tanh %371 : vector<2x128xf32>
    %373 = vector.extract_strided_slice %358 {offsets = [0, 384], sizes = [2, 128], strides = [1, 1]} : vector<2x512xf32> to vector<2x128xf32>
    %374 = arith.negf %373 : vector<2x128xf32>
    %375 = math.exp %374 : vector<2x128xf32>
    %cst_70 = arith.constant 1.000000e+00 : f32
    %376 = vector.broadcast %cst_70 : f32 to vector<2x128xf32>
    %377 = arith.addf %376, %375 : vector<2x128xf32>
    %378 = arith.divf %376, %377 : vector<2x128xf32>
    %379 = arith.mulf %370, %323 : vector<2x128xf32>
    %380 = arith.mulf %364, %372 : vector<2x128xf32>
    %381 = arith.addf %379, %380 : vector<2x128xf32>
    %382 = math.tanh %381 : vector<2x128xf32>
    %383 = arith.mulf %378, %382 : vector<2x128xf32>
    %384 = tpu.concatenate %383, %353 in 1 : vector<2x128xf32>, vector<2x128xf32> -> vector<2x256xf32>
    %cst_71 = arith.constant dense<0.000000e+00> : vector<2x512xf32>
    %385 = tpu.matmul %384, %1, %cst_71 {dimension_numbers = #tpu.dot_dimension_numbers<[1], [0], [0], [1], [0, 0, 1, 1], [], []>} : vector<2x256xf32>, vector<256x512xf32>, vector<2x512xf32> -> vector<2x512xf32>
    %386 = arith.addf %385, %4 : vector<2x512xf32>
    %387 = vector.extract_strided_slice %386 {offsets = [0, 0], sizes = [2, 128], strides = [1, 1]} : vector<2x512xf32> to vector<2x128xf32>
    %388 = arith.negf %387 : vector<2x128xf32>
    %389 = math.exp %388 : vector<2x128xf32>
    %cst_72 = arith.constant 1.000000e+00 : f32
    %390 = vector.broadcast %cst_72 : f32 to vector<2x128xf32>
    %391 = arith.addf %390, %389 : vector<2x128xf32>
    %392 = arith.divf %390, %391 : vector<2x128xf32>
    %393 = vector.extract_strided_slice %386 {offsets = [0, 128], sizes = [2, 128], strides = [1, 1]} : vector<2x512xf32> to vector<2x128xf32>
    %394 = arith.negf %393 : vector<2x128xf32>
    %395 = math.exp %394 : vector<2x128xf32>
    %cst_73 = arith.constant 1.000000e+00 : f32
    %396 = vector.broadcast %cst_73 : f32 to vector<2x128xf32>
    %397 = arith.addf %396, %395 : vector<2x128xf32>
    %398 = arith.divf %396, %397 : vector<2x128xf32>
    %399 = vector.extract_strided_slice %386 {offsets = [0, 256], sizes = [2, 128], strides = [1, 1]} : vector<2x512xf32> to vector<2x128xf32>
    %400 = math.tanh %399 : vector<2x128xf32>
    %401 = vector.extract_strided_slice %386 {offsets = [0, 384], sizes = [2, 128], strides = [1, 1]} : vector<2x512xf32> to vector<2x128xf32>
    %402 = arith.negf %401 : vector<2x128xf32>
    %403 = math.exp %402 : vector<2x128xf32>
    %cst_74 = arith.constant 1.000000e+00 : f32
    %404 = vector.broadcast %cst_74 : f32 to vector<2x128xf32>
    %405 = arith.addf %404, %403 : vector<2x128xf32>
    %406 = arith.divf %404, %405 : vector<2x128xf32>
    %407 = arith.mulf %398, %351 : vector<2x128xf32>
    %408 = arith.mulf %392, %400 : vector<2x128xf32>
    %409 = arith.addf %407, %408 : vector<2x128xf32>
    %410 = math.tanh %409 : vector<2x128xf32>
    %411 = arith.mulf %406, %410 : vector<2x128xf32>
    %c7_i32 = arith.constant 7 : i32
    %412 = arith.index_cast %c7_i32 : i32 to index
    %c0_75 = arith.constant 0 : index
    %c0_76 = arith.constant 0 : index
    %413 = vector.load %arg0[%412, %c0_75, %c0_76] : memref<8x2x512xf32, #tpu.memory_space<vmem>>, vector<1x2x512xf32>
    %414 = vector.shape_cast %413 : vector<1x2x512xf32> to vector<2x512xf32>
    %cst_77 = arith.constant dense<0.000000e+00> : vector<2x512xf32>
    %415 = tpu.matmul %383, %0, %cst_77 {dimension_numbers = #tpu.dot_dimension_numbers<[1], [0], [0], [1], [0, 0, 1, 1], [], []>} : vector<2x128xf32>, vector<128x512xf32>, vector<2x512xf32> -> vector<2x512xf32>
    %416 = arith.addf %414, %415 : vector<2x512xf32>
    %417 = vector.extract_strided_slice %416 {offsets = [0, 0], sizes = [2, 128], strides = [1, 1]} : vector<2x512xf32> to vector<2x128xf32>
    %418 = arith.negf %417 : vector<2x128xf32>
    %419 = math.exp %418 : vector<2x128xf32>
    %cst_78 = arith.constant 1.000000e+00 : f32
    %420 = vector.broadcast %cst_78 : f32 to vector<2x128xf32>
    %421 = arith.addf %420, %419 : vector<2x128xf32>
    %422 = arith.divf %420, %421 : vector<2x128xf32>
    %423 = vector.extract_strided_slice %416 {offsets = [0, 128], sizes = [2, 128], strides = [1, 1]} : vector<2x512xf32> to vector<2x128xf32>
    %424 = arith.negf %423 : vector<2x128xf32>
    %425 = math.exp %424 : vector<2x128xf32>
    %cst_79 = arith.constant 1.000000e+00 : f32
    %426 = vector.broadcast %cst_79 : f32 to vector<2x128xf32>
    %427 = arith.addf %426, %425 : vector<2x128xf32>
    %428 = arith.divf %426, %427 : vector<2x128xf32>
    %429 = vector.extract_strided_slice %416 {offsets = [0, 256], sizes = [2, 128], strides = [1, 1]} : vector<2x512xf32> to vector<2x128xf32>
    %430 = math.tanh %429 : vector<2x128xf32>
    %431 = vector.extract_strided_slice %416 {offsets = [0, 384], sizes = [2, 128], strides = [1, 1]} : vector<2x512xf32> to vector<2x128xf32>
    %432 = arith.negf %431 : vector<2x128xf32>
    %433 = math.exp %432 : vector<2x128xf32>
    %cst_80 = arith.constant 1.000000e+00 : f32
    %434 = vector.broadcast %cst_80 : f32 to vector<2x128xf32>
    %435 = arith.addf %434, %433 : vector<2x128xf32>
    %436 = arith.divf %434, %435 : vector<2x128xf32>
    %437 = arith.mulf %428, %381 : vector<2x128xf32>
    %438 = arith.mulf %422, %430 : vector<2x128xf32>
    %439 = arith.addf %437, %438 : vector<2x128xf32>
    %440 = math.tanh %439 : vector<2x128xf32>
    %441 = arith.mulf %436, %440 : vector<2x128xf32>
    %442 = tpu.concatenate %441, %411 in 1 : vector<2x128xf32>, vector<2x128xf32> -> vector<2x256xf32>
    %cst_81 = arith.constant dense<0.000000e+00> : vector<2x512xf32>
    %443 = tpu.matmul %442, %1, %cst_81 {dimension_numbers = #tpu.dot_dimension_numbers<[1], [0], [0], [1], [0, 0, 1, 1], [], []>} : vector<2x256xf32>, vector<256x512xf32>, vector<2x512xf32> -> vector<2x512xf32>
    %444 = arith.addf %443, %4 : vector<2x512xf32>
    %445 = vector.extract_strided_slice %444 {offsets = [0, 0], sizes = [2, 128], strides = [1, 1]} : vector<2x512xf32> to vector<2x128xf32>
    %446 = arith.negf %445 : vector<2x128xf32>
    %447 = math.exp %446 : vector<2x128xf32>
    %cst_82 = arith.constant 1.000000e+00 : f32
    %448 = vector.broadcast %cst_82 : f32 to vector<2x128xf32>
    %449 = arith.addf %448, %447 : vector<2x128xf32>
    %450 = arith.divf %448, %449 : vector<2x128xf32>
    %451 = vector.extract_strided_slice %444 {offsets = [0, 128], sizes = [2, 128], strides = [1, 1]} : vector<2x512xf32> to vector<2x128xf32>
    %452 = arith.negf %451 : vector<2x128xf32>
    %453 = math.exp %452 : vector<2x128xf32>
    %cst_83 = arith.constant 1.000000e+00 : f32
    %454 = vector.broadcast %cst_83 : f32 to vector<2x128xf32>
    %455 = arith.addf %454, %453 : vector<2x128xf32>
    %456 = arith.divf %454, %455 : vector<2x128xf32>
    %457 = vector.extract_strided_slice %444 {offsets = [0, 256], sizes = [2, 128], strides = [1, 1]} : vector<2x512xf32> to vector<2x128xf32>
    %458 = math.tanh %457 : vector<2x128xf32>
    %459 = vector.extract_strided_slice %444 {offsets = [0, 384], sizes = [2, 128], strides = [1, 1]} : vector<2x512xf32> to vector<2x128xf32>
    %460 = arith.negf %459 : vector<2x128xf32>
    %461 = math.exp %460 : vector<2x128xf32>
    %cst_84 = arith.constant 1.000000e+00 : f32
    %462 = vector.broadcast %cst_84 : f32 to vector<2x128xf32>
    %463 = arith.addf %462, %461 : vector<2x128xf32>
    %464 = arith.divf %462, %463 : vector<2x128xf32>
    %465 = arith.mulf %456, %409 : vector<2x128xf32>
    %466 = arith.mulf %450, %458 : vector<2x128xf32>
    %467 = arith.addf %465, %466 : vector<2x128xf32>
    %468 = math.tanh %467 : vector<2x128xf32>
    %469 = arith.mulf %464, %468 : vector<2x128xf32>
    %c8_i32 = arith.constant 8 : i32
    %c0_85 = arith.constant 0 : index
    %c0_86 = arith.constant 0 : index
    %470 = vector.load %arg4[%c0_85, %c0_86] : memref<1x128xf32, #tpu.memory_space<vmem>>, vector<1x128xf32>
    %471 = vector.broadcast %470 : vector<1x128xf32> to vector<2x128xf32>
    %472 = arith.mulf %469, %471 : vector<2x128xf32>
    %cst_87 = arith.constant dense<0.000000e+00> : vector<2xf32>
    %473 = vector.multi_reduction <add>, %472, %cst_87 [1] : vector<2x128xf32> to vector<2xf32>
    %474 = vector.shape_cast %473 : vector<2xf32> to vector<2x1xf32>
    %c0_88 = arith.constant 0 : index
    %475 = memref.load %arg5[%c0_88] : memref<1xf32, #tpu.memory_space<smem>>
    %476 = vector.broadcast %475 : f32 to vector<2x1xf32>
    %477 = arith.addf %474, %476 : vector<2x1xf32>
    %c0_89 = arith.constant 0 : index
    %c0_90 = arith.constant 0 : index
    %478 = vector.load %arg6[%c0_89, %c0_90] : memref<2x1xf32, #tpu.memory_space<vmem>>, vector<2x1xf32>
    tpu.vector_store %arg6[%c0_89, %c0_90], %477 {strides = array<i32>} : memref<2x1xf32, #tpu.memory_space<vmem>>, vector<2x1xf32>,
    return
  }
}

</mosaic_0001>

<bundles_post_ra>
// kernel: tpu_custom_call.1
= control target key start
LH: loop header
LB: loop body
LE: loop exit
PB: predicated region body
PF: predicated region fallthrough
CT: control target
= control target key end

     0   :  { %12 = vsyncpa [#allocation4], 0  ;;  %s6332_s0 = inlined_call_operand.hbm [shape: f32[8,2,512], index: 0, kind: input, shape index: {}]   ;;  %s6333_s1 = inlined_call_operand.hbm [shape: f32[128,512], index: 1, kind: input, shape index: {}]   ;;  %s6334_s2 = inlined_call_operand.hbm [shape: f32[256,512], index: 2, kind: input, shape index: {}]   ;;  %s6335_s3 = inlined_call_operand.vmem [shape: f32[1,512], index: 3, kind: input, shape index: {}]   ;;  %s6336_s4 = inlined_call_operand.vmem [shape: f32[1,128], index: 4, kind: input, shape index: {}]   ;;  %s6337_s5 = inlined_call_operand.<no memory space> [shape: f32[1], index: 5, kind: input, shape index: {}]   ;;  %s6338_s6 = inlined_call_operand.vmem [shape: f32[2,1], index: 6, kind: output, shape index: {}]  }
   0x1   :  { %13 = vsyncpa [#allocation6], 0  ;;  %s5133_s21 = smov [#allocation5]   ;;  %s5063_s25 = scalar_lea.hbm %s6333_s1, 8192 }
   0x2   :  { %s31_s22 = sshll.u32 %s5133_s21, 4  ;;  %p5064_p0 = scmp.ne.s32.totalorder %s6333_s1, %s5063_s25  ;;  %s32_s22 = int_to_ptr.vmem [resolvable:$true] %s31_s22 }
   0x3   :  { %p5067_p1 = scmp.lt.u32.totalorder %s5063_s25, %s6333_s1 }
   0x5   :  { %p5069_p2 = pnand %p5067_p1, %p5064_p0 }
   0x7   :  { %5072 = shalt.err (!%p5069_p2)
}
   0x8   :  { %s5073_s30 = scalar_lea.vmem %s32_s22, 8192  ;;  %p5078_p4 = scmp.lt.s32.totalorder %s32_s22, %s32_s22 }
   0x9   :  { %p5074_p3 = scmp.ne.s32.totalorder %s32_s22, %s5073_s30  ;;  %p5079_p5 = scmp.lt.s32.totalorder %s5073_s30, %s5073_s30 }
   0xb   :  { %p5080_p6 = por %p5079_p5, %p5078_p4 }
   0xd   :  { %p5081_p7 = pnand %p5080_p6, %p5074_p3 }
   0xf   :  { %5084 = shalt.err (!%p5081_p7)
}
  0x10   :  { %s5134_s7 = smov 512   ;;  %s5135_s8 = smov 32  }
  0x11   :  { %37 = dma.hbm_to_vmem [thread:$0]  %s6333_s1, 8192, %s32_s22, [#allocation6], %s5134_s7, %s5134_s7, %s5135_s8  }
  0x12   :  { %s5136_s11 = smov [#allocation3]   ;;  %s5085_s15 = scalar_lea.hbm %s6332_s0, 1024 }
  0x13   :  { %s19_s12 = sshll.u32 %s5136_s11, 4  ;;  %p5086_p8 = scmp.ne.s32.totalorder %s6332_s0, %s5085_s15  ;;  %s20_s12 = int_to_ptr.vmem [resolvable:$true] %s19_s12 }
  0x14   :  { %p5089_p9 = scmp.lt.u32.totalorder %s5085_s15, %s6332_s0 }
  0x16   :  { %p5091_p10 = pnand %p5089_p9, %p5086_p8 }
  0x18   :  { %5094 = shalt.err (!%p5091_p10)
}
  0x19   :  { %s5095_s20 = scalar_lea.vmem %s20_s12, 1024  ;;  %p5100_p12 = scmp.lt.s32.totalorder %s20_s12, %s20_s12 }
  0x1a   :  { %p5096_p11 = scmp.ne.s32.totalorder %s20_s12, %s5095_s20  ;;  %p5101_p13 = scmp.lt.s32.totalorder %s5095_s20, %s5095_s20 }
  0x1c   :  { %p5102_p0 = por %p5101_p13, %p5100_p12 }
  0x1e   :  { %p5103_p1 = pnand %p5102_p0, %p5096_p11 }
  0x20   :  { %5106 = shalt.err (!%p5103_p1)
}
  0x21   :  { %s5137_s1 = smov 128   ;;  %s5138_s21 = smov 8  }
  0x22   :  { %25 = dma.hbm_to_vmem [thread:$0]  %s6332_s0, 1024, %s20_s12, [#allocation4], %s5137_s1, %s5137_s1, %s5138_s21  }
  0x23   :  { %s5139_s24 = smov [#allocation7]   ;;  %s5107_s28 = scalar_lea.hbm %s6334_s2, 16384 }
  0x24   :  { %s43_s25 = sshll.u32 %s5139_s24, 4  ;;  %p5108_p2 = scmp.ne.s32.totalorder %s6334_s2, %s5107_s28  ;;  %s44_s25 = int_to_ptr.vmem [resolvable:$true] %s43_s25 }
  0x25   :  { %p5111_p3 = scmp.lt.u32.totalorder %s5107_s28, %s6334_s2 }
  0x27   :  { %p5113_p4 = pnand %p5111_p3, %p5108_p2 }
  0x29   :  { %5116 = shalt.err (!%p5113_p4)
}
  0x2a   :  { %s5117_s11 = scalar_lea.vmem %s44_s25, 16384  ;;  %p5122_p6 = scmp.lt.s32.totalorder %s44_s25, %s44_s25 }
  0x2b   :  { %p5118_p5 = scmp.ne.s32.totalorder %s44_s25, %s5117_s11  ;;  %p5123_p7 = scmp.lt.s32.totalorder %s5117_s11, %s5117_s11 }
  0x2d   :  { %p5124_p8 = por %p5123_p7, %p5122_p6 }
  0x2f   :  { %p5125_p9 = pnand %p5124_p8, %p5118_p5 }
  0x31   :  { %5128 = shalt.err (!%p5125_p9)
}
  0x32   :  { %49 = dma.hbm_to_vmem [thread:$0]  %s6334_s2, 16384, %s44_s25, [#allocation6], %s5134_s7, %s5134_s7, %s5135_s8  }
  0x33   :  { %5129 = dma.done.wait [#allocation4], 1024  }
  0x34   :  { %5130 = vsyncadd [#allocation4], 4294966272 }
  0x35   :  { %5131 = dma.done.wait [#allocation6], 24576  }
  0x36   :  { %5132 = vsyncadd [#allocation6], 4294942720  ;;  %v6339_v0 = vmov 0.0   ;;  %v66_v1 = vld [vmem:[#allocation5 + $0x8] sm:$0xff]  ;;  %v68_v3 = vld [vmem:[#allocation5 + $0x18] sm:$0xff]  ;;  %vm3198_vm0 = vcmask 1041408  }
  0x37   :  { %344 = vmatprep.mubr.f32.mxu0 %v6339_v0  ;;  %415 = vmatprep.mubr.f32.mxu1 %v6339_v0  ;;  %v70_v2 = vld [vmem:[#allocation5 + $0x28] sm:$0xff]  ;;  %v72_v5 = vld [vmem:[#allocation5 + $0x38] sm:$0xff]  ;;  %v65_v6 = vld [vmem:[#allocation5] sm:$0xff]  ;;  %vm3205_vm1 = vcmask 1024  }
  0x38   :  { %v5221_v4 = vpack.c.bf16 %v70_v2, %v66_v1  ;;  %v69_v7 = vld [vmem:[#allocation5 + $0x20] sm:$0xff]  ;;  %v5223_v8 = vpack.c.bf16 %v72_v5, %v68_v3  ;;  %v67_v10 = vld [vmem:[#allocation5 + $0x10] sm:$0xff]  ;;  %v74_v12 = vld [vmem:[#allocation5 + $0x48] sm:$0xff] }
  0x39   :  { %v5225_v9 = vpack.c.bf16 %v69_v7, %v65_v6  ;;  %v71_v11 = vld [vmem:[#allocation5 + $0x30] sm:$0xff]  ;;  %v78_v14 = vld [vmem:[#allocation5 + $0x68] sm:$0xff]  ;;  %v76_v15 = vld [vmem:[#allocation5 + $0x58] sm:$0xff] }
  0x3a   :  { %6463 = vst [vmem:[#allocation10_spill] sm:$0xff] %v5221_v4  ;;  %6464 = vst [vmem:[#allocation11_spill] sm:$0xff] %v5223_v8  ;;  %3263 = vmatprep.subr.bf16.mxu0 %v5221_v4  ;;  %v5228_v13 = vpack.c.bf16 %v71_v11, %v67_v10  ;;  %v80_v16 = vld [vmem:[#allocation5 + $0x78] sm:$0xff]  ;;  %3295 = vmatprep.subr.bf16.mxu1 %v5223_v8  ;;  %v5232_v17 = vpack.c.bf16 %v78_v14, %v74_v12  ;;  %v73_v19 = vld [vmem:[#allocation5 + $0x40] sm:$0xff] }
  0x3b   :  { %3265 = vmatpush1.bf16.msra.mxu0 %v5225_v9  ;;  %v5234_v18 = vpack.c.bf16 %v80_v16, %v76_v15  ;;  %v77_v20 = vld [vmem:[#allocation5 + $0x60] sm:$0xff]  ;;  %v75_v21 = vld [vmem:[#allocation5 + $0x50] sm:$0xff]  ;;  %v82_v24 = vld [vmem:[#allocation5 + $0x88] sm:$0xff] }
  0x3c   :  { %3297 = vmatpush1.bf16.msra.mxu1 %v5228_v13  ;;  %v5237_v22 = vpack.c.bf16 %v77_v20, %v73_v19  ;;  %v79_v23 = vld [vmem:[#allocation5 + $0x70] sm:$0xff]  ;;  %v86_v25 = vld [vmem:[#allocation5 + $0xa8] sm:$0xff]  ;;  %3267 = vmatprep.subr.bf16.mxu0 %v5232_v17  ;;  %v84_v28 = vld [vmem:[#allocation5 + $0x98] sm:$0xff] }
  0x3d   :  { %3299 = vmatprep.subr.bf16.mxu1 %v5234_v18  ;;  %v5241_v26 = vpack.c.bf16 %v79_v23, %v75_v21  ;;  %v5243_v27 = vpack.c.bf16 %v86_v25, %v82_v24  ;;  %v88_v29 = vld [vmem:[#allocation5 + $0xb8] sm:$0xff]  ;;  %v81_v30 = vld [vmem:[#allocation5 + $0x80] sm:$0xff]  ;;  %v83_v33 = vld [vmem:[#allocation5 + $0x90] sm:$0xff] }
  0x3e   :  { %v5245_v31 = vpack.c.bf16 %v88_v29, %v84_v28  ;;  %v85_v32 = vld [vmem:[#allocation5 + $0xa0] sm:$0xff]  ;;  %v87_v34 = vld [vmem:[#allocation5 + $0xb0] sm:$0xff]  ;;  %v90_v36 = vld [vmem:[#allocation5 + $0xc8] sm:$0xff] }
  0x3f   :  { %3269 = vmatpush1.bf16.msra.mxu0 %v5237_v22  ;;  %v5248_v35 = vpack.c.bf16 %v85_v32, %v81_v30  ;;  %v94_v37 = vld [vmem:[#allocation5 + $0xe8] sm:$0xff]  ;;  %v92_v38 = vld [vmem:[#allocation5 + $0xd8] sm:$0xff]  ;;  %v5252_v39 = vpack.c.bf16 %v87_v34, %v83_v33  ;;  %v89_v42 = vld [vmem:[#allocation5 + $0xc0] sm:$0xff] }
  0x40   :  { %3301 = vmatpush1.bf16.msra.mxu1 %v5241_v26  ;;  %3271 = vmatprep.subr.bf16.mxu0 %v5243_v27  ;;  %v5254_v40 = vpack.c.bf16 %v94_v37, %v90_v36  ;;  %v96_v41 = vld [vmem:[#allocation5 + $0xf8] sm:$0xff]  ;;  %v93_v43 = vld [vmem:[#allocation5 + $0xe0] sm:$0xff]  ;;  %v91_v45 = vld [vmem:[#allocation5 + $0xd0] sm:$0xff] }
  0x41   :  { %3303 = vmatprep.subr.bf16.mxu1 %v5245_v31  ;;  %v5257_v44 = vpack.c.bf16 %v96_v41, %v92_v38  ;;  %v95_v46 = vld [vmem:[#allocation5 + $0xf0] sm:$0xff]  ;;  %v98_v47 = vld [vmem:[#allocation5 + $0x108] sm:$0xff]  ;;  %v100_v49 = vld [vmem:[#allocation5 + $0x118] sm:$0xff]  ;;  %v5260_v51 = vpack.c.bf16 %v93_v43, %v89_v42 }
  0x42   :  { %v102_v48 = vld [vmem:[#allocation5 + $0x128] sm:$0xff]  ;;  %v104_v50 = vld [vmem:[#allocation5 + $0x138] sm:$0xff]  ;;  %v5264_v52 = vpack.c.bf16 %v95_v46, %v91_v45  ;;  %v97_v54 = vld [vmem:[#allocation5 + $0x100] sm:$0xff] }
  0x43   :  { %3273 = vmatpush1.bf16.msra.mxu0 %v5248_v35  ;;  %v5266_v53 = vpack.c.bf16 %v102_v48, %v98_v47  ;;  %v101_v55 = vld [vmem:[#allocation5 + $0x120] sm:$0xff]  ;;  %v99_v56 = vld [vmem:[#allocation5 + $0x110] sm:$0xff]  ;;  %v5269_v57 = vpack.c.bf16 %v104_v50, %v100_v49  ;;  %v106_v59 = vld [vmem:[#allocation5 + $0x148] sm:$0xff] }
  0x44   :  { %3305 = vmatpush1.bf16.msra.mxu1 %v5252_v39  ;;  %3275 = vmatprep.subr.bf16.mxu0 %v5254_v40  ;;  %v103_v58 = vld [vmem:[#allocation5 + $0x130] sm:$0xff]  ;;  %v110_v60 = vld [vmem:[#allocation5 + $0x168] sm:$0xff]  ;;  %v108_v61 = vld [vmem:[#allocation5 + $0x158] sm:$0xff]  ;;  %v5272_v63 = vpack.c.bf16 %v101_v55, %v97_v54 }
  0x45   :  { %3307 = vmatprep.subr.bf16.mxu1 %v5257_v44  ;;  %v112_v62 = vld [vmem:[#allocation5 + $0x178] sm:$0xff]  ;;  %v5276_v1 = vpack.c.bf16 %v103_v58, %v99_v56  ;;  %v5278_v2 = vpack.c.bf16 %v110_v60, %v106_v59  ;;  %v105_v3 = vld [vmem:[#allocation5 + $0x140] sm:$0xff]  ;;  %v107_v6 = vld [vmem:[#allocation5 + $0x150] sm:$0xff] }
  0x46   :  { %v109_v5 = vld [vmem:[#allocation5 + $0x160] sm:$0xff]  ;;  %v5281_v7 = vpack.c.bf16 %v112_v62, %v108_v61  ;;  %v111_v10 = vld [vmem:[#allocation5 + $0x170] sm:$0xff]  ;;  %v114_v11 = vld [vmem:[#allocation5 + $0x188] sm:$0xff] }
  0x47   :  { %3277 = vmatpush1.bf16.msra.mxu0 %v5260_v51  ;;  %v118_v12 = vld [vmem:[#allocation5 + $0x1a8] sm:$0xff]  ;;  %v116_v14 = vld [vmem:[#allocation5 + $0x198] sm:$0xff]  ;;  %v5284_v16 = vpack.c.bf16 %v109_v5, %v105_v3  ;;  %v5288_v19 = vpack.c.bf16 %v111_v10, %v107_v6  ;;  %v113_v21 = vld [vmem:[#allocation5 + $0x180] sm:$0xff] }
  0x48   :  { %3309 = vmatpush1.bf16.msra.mxu1 %v5264_v52  ;;  %3279 = vmatprep.subr.bf16.mxu0 %v5266_v53  ;;  %v120_v15 = vld [vmem:[#allocation5 + $0x1b8] sm:$0xff]  ;;  %v5290_v20 = vpack.c.bf16 %v118_v12, %v114_v11  ;;  %v117_v23 = vld [vmem:[#allocation5 + $0x1a0] sm:$0xff]  ;;  %v115_v24 = vld [vmem:[#allocation5 + $0x190] sm:$0xff] }
  0x49   :  { %3311 = vmatprep.subr.bf16.mxu1 %v5269_v57  ;;  %v5293_v25 = vpack.c.bf16 %v120_v15, %v116_v14  ;;  %v119_v28 = vld [vmem:[#allocation5 + $0x1b0] sm:$0xff]  ;;  %v122_v29 = vld [vmem:[#allocation5 + $0x1c8] sm:$0xff]  ;;  %v124_v32 = vld [vmem:[#allocation5 + $0x1d8] sm:$0xff]  ;;  %v5296_v34 = vpack.c.bf16 %v117_v23, %v113_v21 }
  0x4a   :  { %v126_v30 = vld [vmem:[#allocation5 + $0x1e8] sm:$0xff]  ;;  %v128_v33 = vld [vmem:[#allocation5 + $0x1f8] sm:$0xff]  ;;  %v5300_v36 = vpack.c.bf16 %v119_v28, %v115_v24  ;;  %v121_v38 = vld [vmem:[#allocation5 + $0x1c0] sm:$0xff] }
  0x4b   :  { %3281 = vmatpush1.bf16.msra.mxu0 %v5272_v63  ;;  %v5302_v37 = vpack.c.bf16 %v126_v30, %v122_v29  ;;  %v125_v41 = vld [vmem:[#allocation5 + $0x1e0] sm:$0xff]  ;;  %v123_v42 = vld [vmem:[#allocation5 + $0x1d0] sm:$0xff]  ;;  %v5305_v43 = vpack.c.bf16 %v128_v33, %v124_v32  ;;  %v130_v46 = vld [vmem:[#allocation7 + $0x8] sm:$0xff] }
  0x4c   :  { %3313 = vmatpush1.bf16.msra.mxu1 %v5276_v1  ;;  %3283 = vmatprep.subr.bf16.mxu0 %v5278_v2  ;;  %v127_v45 = vld [vmem:[#allocation5 + $0x1f0] sm:$0xff]  ;;  %v134_v47 = vld [vmem:[#allocation7 + $0x28] sm:$0xff]  ;;  %v132_v48 = vld [vmem:[#allocation7 + $0x18] sm:$0xff]  ;;  %v5308_v50 = vpack.c.bf16 %v125_v41, %v121_v38 }
  0x4d   :  { %3315 = vmatprep.subr.bf16.mxu1 %v5281_v7  ;;  %v136_v49 = vld [vmem:[#allocation7 + $0x38] sm:$0xff]  ;;  %v5312_v54 = vpack.c.bf16 %v127_v45, %v123_v42  ;;  %v5314_v55 = vpack.c.bf16 %v134_v47, %v130_v46  ;;  %v129_v56 = vld [vmem:[#allocation7] sm:$0xff]  ;;  %v131_v59 = vld [vmem:[#allocation7 + $0x10] sm:$0xff] }
  0x4e   :  { %v133_v58 = vld [vmem:[#allocation7 + $0x20] sm:$0xff]  ;;  %v5317_v60 = vpack.c.bf16 %v136_v49, %v132_v48  ;;  %v135_v61 = vld [vmem:[#allocation7 + $0x30] sm:$0xff]  ;;  %v138_v62 = vld [vmem:[#allocation7 + $0x48] sm:$0xff] }
  0x4f   :  { %3285 = vmatpush1.bf16.msra.mxu0 %v5284_v16  ;;  %v142_v3 = vld [vmem:[#allocation7 + $0x68] sm:$0xff]  ;;  %v140_v5 = vld [vmem:[#allocation7 + $0x58] sm:$0xff]  ;;  %v5320_v10 = vpack.c.bf16 %v133_v58, %v129_v56  ;;  %v5324_v11 = vpack.c.bf16 %v135_v61, %v131_v59  ;;  %v137_v14 = vld [vmem:[#allocation7 + $0x40] sm:$0xff] }
  0x50   :  { %3317 = vmatpush1.bf16.msra.mxu1 %v5288_v19  ;;  %3287 = vmatprep.subr.bf16.mxu0 %v5290_v20  ;;  %v144_v6 = vld [vmem:[#allocation7 + $0x78] sm:$0xff]  ;;  %v5326_v12 = vpack.c.bf16 %v142_v3, %v138_v62  ;;  %v141_v15 = vld [vmem:[#allocation7 + $0x60] sm:$0xff]  ;;  %v139_v21 = vld [vmem:[#allocation7 + $0x50] sm:$0xff] }
  0x51   :  { %3319 = vmatprep.subr.bf16.mxu1 %v5293_v25  ;;  %v5329_v23 = vpack.c.bf16 %v144_v6, %v140_v5  ;;  %v143_v24 = vld [vmem:[#allocation7 + $0x70] sm:$0xff]  ;;  %v146_v28 = vld [vmem:[#allocation7 + $0x88] sm:$0xff]  ;;  %v148_v30 = vld [vmem:[#allocation7 + $0x98] sm:$0xff]  ;;  %v5334_v33 = vpack.c.bf16 %v141_v15, %v137_v14 }
  0x52   :  { %v150_v29 = vld [vmem:[#allocation7 + $0xa8] sm:$0xff]  ;;  %v152_v32 = vld [vmem:[#allocation7 + $0xb8] sm:$0xff]  ;;  %v5338_v38 = vpack.c.bf16 %v143_v24, %v139_v21  ;;  %v145_v42 = vld [vmem:[#allocation7 + $0x80] sm:$0xff] }
  0x53   :  { %3289 = vmatpush1.bf16.msra.mxu0 %v5296_v34  ;;  %v5340_v41 = vpack.c.bf16 %v150_v29, %v146_v28  ;;  %v149_v45 = vld [vmem:[#allocation7 + $0xa0] sm:$0xff]  ;;  %v5343_v46 = vpack.c.bf16 %v152_v32, %v148_v30  ;;  %v147_v47 = vld [vmem:[#allocation7 + $0x90] sm:$0xff]  ;;  %v154_v58 = vld [vmem:[#allocation7 + $0xc8] sm:$0xff] }
  0x54   :  { %3321 = vmatpush1.bf16.msra.mxu1 %v5300_v36  ;;  %3291 = vmatprep.subr.bf16.mxu0 %v5302_v37  ;;  %v151_v48 = vld [vmem:[#allocation7 + $0xb0] sm:$0xff]  ;;  %v5348_v49 = vpack.c.bf16 %v149_v45, %v145_v42  ;;  %v158_v59 = vld [vmem:[#allocation7 + $0xe8] sm:$0xff]  ;;  %v156_v61 = vld [vmem:[#allocation7 + $0xd8] sm:$0xff] }
  0x55   :  { %3323 = vmatprep.subr.bf16.mxu1 %v5305_v43  ;;  %v5352_v56 = vpack.c.bf16 %v151_v48, %v147_v47  ;;  %v5357_v62 = vpack.c.bf16 %v158_v59, %v154_v58  ;;  %v160_v3 = vld [vmem:[#allocation7 + $0xf8] sm:$0xff]  ;;  %v153_v5 = vld [vmem:[#allocation7 + $0xc0] sm:$0xff]  ;;  %v155_v21 = vld [vmem:[#allocation7 + $0xd0] sm:$0xff] }
  0x56   :  { %v157_v6 = vld [vmem:[#allocation7 + $0xe0] sm:$0xff]  ;;  %v5359_v14 = vpack.c.bf16 %v160_v3, %v156_v61  ;;  %v159_v24 = vld [vmem:[#allocation7 + $0xf0] sm:$0xff]  ;;  %v162_v29 = vld [vmem:[#allocation7 + $0x108] sm:$0xff] }
  0x57   :  { %3293 = vmatpush1.bf16.msra.mxu0 %v5308_v50  ;;  %6465 = vst [vmem:[#allocation12_spill] sm:$0xff] %v5352_v56  ;;  %6466 = vst [vmem:[#allocation13_spill] sm:$0xff] %v5357_v62  ;;  %v5361_v15 = vpack.c.bf16 %v157_v6, %v153_v5  ;;  %v5364_v28 = vpack.c.bf16 %v159_v24, %v155_v21  ;;  %v166_v30 = vld [vmem:[#allocation7 + $0x128] sm:$0xff]  ;;  %v164_v32 = vld [vmem:[#allocation7 + $0x118] sm:$0xff] }
  0x58   :  { %3325 = vmatpush1.bf16.msra.mxu1 %v5312_v54  ;;  %3327 = vmatprep.subr.bf16.mxu0 %v5314_v55  ;;  %6467 = vst [vmem:[#allocation14_spill] sm:$0xff] %v5359_v14  ;;  %v5369_v42 = vpack.c.bf16 %v166_v30, %v162_v29  ;;  %v168_v45 = vld [vmem:[#allocation7 + $0x138] sm:$0xff]  ;;  %v161_v47 = vld [vmem:[#allocation7 + $0x100] sm:$0xff]  ;;  %v163_v61 = vld [vmem:[#allocation7 + $0x110] sm:$0xff] }
  0x59   :  { %3391 = vmatprep.subr.bf16.mxu1 %v5317_v60  ;;  %6468 = vst [vmem:[#allocation15_spill] sm:$0xff] %v5361_v15  ;;  %6469 = vst [vmem:[#allocation16_spill] sm:$0xff] %v5364_v28  ;;  %v165_v48 = vld [vmem:[#allocation7 + $0x120] sm:$0xff]  ;;  %v5371_v58 = vpack.c.bf16 %v168_v45, %v164_v32  ;;  %v167_v3 = vld [vmem:[#allocation7 + $0x130] sm:$0xff] }
  0x5a   :  { %345 = vmatmul.mubr.f32.vlgmr.msra.gmra.mrb[0].mxu0 %v6339_v0  ;;  %6470 = vst [vmem:[#allocation17_spill] sm:$0xff] %v5369_v42  ;;  %v5373_v59 = vpack.c.bf16 %v165_v48, %v161_v47  ;;  %v5376_v5 = vpack.c.bf16 %v167_v3, %v163_v61  ;;  %v170_v6 = vld [vmem:[#allocation7 + $0x148] sm:$0xff]  ;;  %v172_v24 = vld [vmem:[#allocation7 + $0x158] sm:$0xff]  ;;  %v169_v32 = vld [vmem:[#allocation7 + $0x140] sm:$0xff] }
  0x5b   :  { %416 = vmatmul.mubr.f32.vlgmr.msra.gmra.mrb[0].mxu1 %v6339_v0  ;;  %3329 = vmatpush1.bf16.msra.mxu0 %v5320_v10  ;;  %6471 = vst [vmem:[#allocation18_spill] sm:$0xff] %v5371_v58  ;;  %v174_v21 = vld [vmem:[#allocation7 + $0x168] sm:$0xff]  ;;  %v176_v30 = vld [vmem:[#allocation7 + $0x178] sm:$0xff]  ;;  %v173_v45 = vld [vmem:[#allocation7 + $0x160] sm:$0xff] }
  0x5c   :  { %3393 = vmatpush1.bf16.msra.mxu1 %v5324_v11  ;;  %3331 = vmatprep.subr.bf16.mxu0 %v5326_v12  ;;  %6472 = vst [vmem:[#allocation19_spill] sm:$0xff] %v5373_v59  ;;  %6473 = vst [vmem:[#allocation20_spill] sm:$0xff] %v5376_v5  ;;  %v5381_v29 = vpack.c.bf16 %v174_v21, %v170_v6  ;;  %v5383_v47 = vpack.c.bf16 %v176_v30, %v172_v24  ;;  %v171_v61 = vld [vmem:[#allocation7 + $0x150] sm:$0xff]  ;;  %v182_v6 = vld [vmem:[#allocation7 + $0x1a8] sm:$0xff] }
  0x5d   :  { %3395 = vmatprep.subr.bf16.mxu1 %v5329_v23  ;;  %540 = vmatprep.mubr.f32.mxu0 %v6339_v0  ;;  %v5385_v48 = vpack.c.bf16 %v173_v45, %v169_v32  ;;  %v175_v3 = vld [vmem:[#allocation7 + $0x170] sm:$0xff]  ;;  %v180_v21 = vld [vmem:[#allocation7 + $0x198] sm:$0xff]  ;;  %v177_v30 = vld [vmem:[#allocation7 + $0x180] sm:$0xff] }
  0x5e   :  { %611 = vmatprep.mubr.f32.mxu1 %v6339_v0  ;;  %6474 = vst [vmem:[#allocation21_spill] sm:$0xff] %v5381_v29  ;;  %6475 = vst [vmem:[#allocation22_spill] sm:$0xff] %v5383_v47  ;;  %v5388_v0 = vpack.c.bf16 %v175_v3, %v171_v61  ;;  %v184_v24 = vld [vmem:[#allocation7 + $0x1b8] sm:$0xff]  ;;  %v181_v32 = vld [vmem:[#allocation7 + $0x1a0] sm:$0xff] }
  0x5f   :  { %3333 = vmatpush1.bf16.msra.mxu0 %v5334_v33  ;;  %6476 = vst [vmem:[#allocation23_spill] sm:$0xff] %v5385_v48  ;;  %v5395_v45 = vpack.c.bf16 %v184_v24, %v180_v21  ;;  %v179_v61 = vld [vmem:[#allocation7 + $0x190] sm:$0xff]  ;;  %v192_v21 = vld [vmem:[#allocation7 + $0x1f8] sm:$0xff]  ;;  %v185_v24 = vld [vmem:[#allocation7 + $0x1c0] sm:$0xff] }
  0x60   :  { %3397 = vmatpush1.bf16.msra.mxu1 %v5338_v38  ;;  %3335 = vmatprep.subr.bf16.mxu0 %v5340_v41  ;;  %6477 = vst [vmem:[#allocation24_spill] sm:$0xff] %v5388_v0  ;;  %v183_v3 = vld [vmem:[#allocation7 + $0x1b0] sm:$0xff] }
  0x61   :  { %3399 = vmatprep.subr.bf16.mxu1 %v5343_v46  ;;  %6479 = vst [vmem:[#allocation26_spill] sm:$0xff] %v5395_v45 }
  0x63   :  { %3337 = vmatpush1.bf16.msra.mxu0 %v5348_v49 }
  0x64   :  { %3401 = vmatpush1.bf16.msra.mxu1 %v5352_v56  ;;  %3339 = vmatprep.subr.bf16.mxu0 %v5357_v62 }
  0x65   :  { %3403 = vmatprep.subr.bf16.mxu1 %v5359_v14  ;;  %v252_v14 = vld [vmem:[#allocation7 + $0x3d8] sm:$0xff] }
  0x67   :  { %3341 = vmatpush1.bf16.msra.mxu0 %v5361_v15  ;;  %v250_v15 = vld [vmem:[#allocation7 + $0x3c8] sm:$0xff] }
  0x68   :  { %3405 = vmatpush1.bf16.msra.mxu1 %v5364_v28  ;;  %3343 = vmatprep.subr.bf16.mxu0 %v5369_v42  ;;  %v236_v42 = vld [vmem:[#allocation7 + $0x358] sm:$0xff] }
  0x69   :  { %3407 = vmatprep.subr.bf16.mxu1 %v5371_v58  ;;  %v5397_v58 = vpack.c.bf16 %v181_v32, %v177_v30  ;;  %v189_v30 = vld [vmem:[#allocation7 + $0x1e0] sm:$0xff]  ;;  %v240_v28 = vld [vmem:[#allocation7 + $0x378] sm:$0xff] }
  0x6b   :  { %3345 = vmatpush1.bf16.msra.mxu0 %v5373_v59  ;;  %6480 = vst [vmem:[#allocation27_spill] sm:$0xff] %v5397_v58 }
  0x6c   :  { %3409 = vmatpush1.bf16.msra.mxu1 %v5376_v5  ;;  %3347 = vmatprep.subr.bf16.mxu0 %v5381_v29  ;;  %v178_v5 = vld [vmem:[#allocation7 + $0x188] sm:$0xff]  ;;  %v5409_v29 = vpack.c.bf16 %v189_v30, %v185_v24  ;;  %v197_v24 = vld [vmem:[#allocation7 + $0x220] sm:$0xff] }
  0x6d   :  { %3411 = vmatprep.subr.bf16.mxu1 %v5383_v47  ;;  %v5393_v59 = vpack.c.bf16 %v182_v6, %v178_v5  ;;  %v5400_v47 = vpack.c.bf16 %v183_v3, %v179_v61  ;;  %v190_v5 = vld [vmem:[#allocation7 + $0x1e8] sm:$0xff]  ;;  %v188_v6 = vld [vmem:[#allocation7 + $0x1d8] sm:$0xff]  ;;  %v187_v61 = vld [vmem:[#allocation7 + $0x1d0] sm:$0xff] }
  0x6e   :  { %v5407_v32 = vpack.c.bf16 %v192_v21, %v188_v6  ;;  %6484 = vst [vmem:[#allocation31_spill] sm:$0xff] %v5409_v29  ;;  %v191_v3 = vld [vmem:[#allocation7 + $0x1f0] sm:$0xff]  ;;  %v200_v6 = vld [vmem:[#allocation7 + $0x238] sm:$0xff]  ;;  %v193_v21 = vld [vmem:[#allocation7 + $0x200] sm:$0xff] }
  0x6f   :  { %3349 = vmatpush1.bf16.msra.mxu0 %v5385_v48  ;;  %6478 = vst [vmem:[#allocation25_spill] sm:$0xff] %v5393_v59  ;;  %6481 = vst [vmem:[#allocation28_spill] sm:$0xff] %v5400_v47 }
  0x70   :  { %3413 = vmatpush1.bf16.msra.mxu1 %v5388_v0  ;;  %3351 = vmatprep.subr.bf16.mxu0 %v5393_v59  ;;  %v186_v0 = vld [vmem:[#allocation7 + $0x1c8] sm:$0xff]  ;;  %6483 = vst [vmem:[#allocation30_spill] sm:$0xff] %v5407_v32  ;;  %v5421_v59 = vpack.c.bf16 %v197_v24, %v193_v21  ;;  %v205_v21 = vld [vmem:[#allocation7 + $0x260] sm:$0xff] }
  0x71   :  { %3415 = vmatprep.subr.bf16.mxu1 %v5395_v45  ;;  %v5405_v48 = vpack.c.bf16 %v190_v5, %v186_v0  ;;  %v5412_v45 = vpack.c.bf16 %v191_v3, %v187_v61  ;;  %v198_v0 = vld [vmem:[#allocation7 + $0x228] sm:$0xff]  ;;  %v196_v5 = vld [vmem:[#allocation7 + $0x218] sm:$0xff]  ;;  %v195_v61 = vld [vmem:[#allocation7 + $0x210] sm:$0xff] }
  0x72   :  { %v5419_v30 = vpack.c.bf16 %v200_v6, %v196_v5  ;;  %6488 = vst [vmem:[#allocation35_spill] sm:$0xff] %v5421_v59  ;;  %v199_v3 = vld [vmem:[#allocation7 + $0x230] sm:$0xff]  ;;  %v208_v5 = vld [vmem:[#allocation7 + $0x278] sm:$0xff]  ;;  %v201_v6 = vld [vmem:[#allocation7 + $0x240] sm:$0xff] }
  0x73   :  { %3353 = vmatpush1.bf16.msra.mxu0 %v5397_v58  ;;  %6482 = vst [vmem:[#allocation29_spill] sm:$0xff] %v5405_v48  ;;  %6485 = vst [vmem:[#allocation32_spill] sm:$0xff] %v5412_v45 }
  0x74   :  { %3417 = vmatpush1.bf16.msra.mxu1 %v5400_v47  ;;  %3355 = vmatprep.subr.bf16.mxu0 %v5405_v48  ;;  %v194_v47 = vld [vmem:[#allocation7 + $0x208] sm:$0xff]  ;;  %6487 = vst [vmem:[#allocation34_spill] sm:$0xff] %v5419_v30  ;;  %v5433_v48 = vpack.c.bf16 %v205_v21, %v201_v6  ;;  %v213_v6 = vld [vmem:[#allocation7 + $0x2a0] sm:$0xff] }
  0x75   :  { %3419 = vmatprep.subr.bf16.mxu1 %v5407_v32  ;;  %v5417_v58 = vpack.c.bf16 %v198_v0, %v194_v47  ;;  %v5424_v32 = vpack.c.bf16 %v199_v3, %v195_v61  ;;  %v206_v47 = vld [vmem:[#allocation7 + $0x268] sm:$0xff]  ;;  %v204_v0 = vld [vmem:[#allocation7 + $0x258] sm:$0xff]  ;;  %v203_v61 = vld [vmem:[#allocation7 + $0x250] sm:$0xff] }
  0x76   :  { %v5431_v24 = vpack.c.bf16 %v208_v5, %v204_v0  ;;  %6492 = vst [vmem:[#allocation39_spill] sm:$0xff] %v5433_v48  ;;  %v207_v3 = vld [vmem:[#allocation7 + $0x270] sm:$0xff]  ;;  %v216_v0 = vld [vmem:[#allocation7 + $0x2b8] sm:$0xff]  ;;  %v209_v5 = vld [vmem:[#allocation7 + $0x280] sm:$0xff] }
  0x77   :  { %3357 = vmatpush1.bf16.msra.mxu0 %v5409_v29  ;;  %6486 = vst [vmem:[#allocation33_spill] sm:$0xff] %v5417_v58  ;;  %6489 = vst [vmem:[#allocation36_spill] sm:$0xff] %v5424_v32 }
  0x78   :  { %3421 = vmatpush1.bf16.msra.mxu1 %v5412_v45  ;;  %3359 = vmatprep.subr.bf16.mxu0 %v5417_v58  ;;  %v202_v45 = vld [vmem:[#allocation7 + $0x248] sm:$0xff]  ;;  %6491 = vst [vmem:[#allocation38_spill] sm:$0xff] %v5431_v24  ;;  %v5445_v58 = vpack.c.bf16 %v213_v6, %v209_v5  ;;  %v221_v5 = vld [vmem:[#allocation7 + $0x2e0] sm:$0xff] }
  0x79   :  { %3423 = vmatprep.subr.bf16.mxu1 %v5419_v30  ;;  %v5429_v29 = vpack.c.bf16 %v206_v47, %v202_v45  ;;  %v5436_v30 = vpack.c.bf16 %v207_v3, %v203_v61  ;;  %v214_v45 = vld [vmem:[#allocation7 + $0x2a8] sm:$0xff]  ;;  %v212_v47 = vld [vmem:[#allocation7 + $0x298] sm:$0xff]  ;;  %v211_v61 = vld [vmem:[#allocation7 + $0x290] sm:$0xff] }
  0x7a   :  { %v5443_v21 = vpack.c.bf16 %v216_v0, %v212_v47  ;;  %6496 = vst [vmem:[#allocation43_spill] sm:$0xff] %v5445_v58  ;;  %v215_v3 = vld [vmem:[#allocation7 + $0x2b0] sm:$0xff]  ;;  %v224_v47 = vld [vmem:[#allocation7 + $0x2f8] sm:$0xff]  ;;  %v217_v0 = vld [vmem:[#allocation7 + $0x2c0] sm:$0xff] }
  0x7b   :  { %3361 = vmatpush1.bf16.msra.mxu0 %v5421_v59  ;;  %6490 = vst [vmem:[#allocation37_spill] sm:$0xff] %v5429_v29  ;;  %6493 = vst [vmem:[#allocation40_spill] sm:$0xff] %v5436_v30 }
  0x7c   :  { %3425 = vmatpush1.bf16.msra.mxu1 %v5424_v32  ;;  %3363 = vmatprep.subr.bf16.mxu0 %v5429_v29  ;;  %v210_v32 = vld [vmem:[#allocation7 + $0x288] sm:$0xff]  ;;  %6495 = vst [vmem:[#allocation42_spill] sm:$0xff] %v5443_v21  ;;  %v5457_v29 = vpack.c.bf16 %v221_v5, %v217_v0  ;;  %v229_v0 = vld [vmem:[#allocation7 + $0x320] sm:$0xff] }
  0x7d   :  { %3427 = vmatprep.subr.bf16.mxu1 %v5431_v24  ;;  %v5441_v59 = vpack.c.bf16 %v214_v45, %v210_v32  ;;  %v5448_v24 = vpack.c.bf16 %v215_v3, %v211_v61  ;;  %v222_v32 = vld [vmem:[#allocation7 + $0x2e8] sm:$0xff]  ;;  %v220_v45 = vld [vmem:[#allocation7 + $0x2d8] sm:$0xff]  ;;  %v219_v61 = vld [vmem:[#allocation7 + $0x2d0] sm:$0xff] }
  0x7e   :  { %v5455_v6 = vpack.c.bf16 %v224_v47, %v220_v45  ;;  %6500 = vst [vmem:[#allocation47_spill] sm:$0xff] %v5457_v29  ;;  %v223_v3 = vld [vmem:[#allocation7 + $0x2f0] sm:$0xff]  ;;  %v232_v45 = vld [vmem:[#allocation7 + $0x338] sm:$0xff]  ;;  %v225_v47 = vld [vmem:[#allocation7 + $0x300] sm:$0xff] }
  0x7f   :  { %3365 = vmatpush1.bf16.msra.mxu0 %v5433_v48  ;;  %6494 = vst [vmem:[#allocation41_spill] sm:$0xff] %v5441_v59  ;;  %6497 = vst [vmem:[#allocation44_spill] sm:$0xff] %v5448_v24 }
  0x80   :  { %3429 = vmatpush1.bf16.msra.mxu1 %v5436_v30  ;;  %3367 = vmatprep.subr.bf16.mxu0 %v5441_v59  ;;  %v218_v30 = vld [vmem:[#allocation7 + $0x2c8] sm:$0xff]  ;;  %6499 = vst [vmem:[#allocation46_spill] sm:$0xff] %v5455_v6  ;;  %v5469_v59 = vpack.c.bf16 %v229_v0, %v225_v47  ;;  %v235_v47 = vld [vmem:[#allocation7 + $0x350] sm:$0xff] }
  0x81   :  { %3431 = vmatprep.subr.bf16.mxu1 %v5443_v21  ;;  %v5453_v48 = vpack.c.bf16 %v222_v32, %v218_v30  ;;  %v5460_v21 = vpack.c.bf16 %v223_v3, %v219_v61  ;;  %v230_v30 = vld [vmem:[#allocation7 + $0x328] sm:$0xff]  ;;  %v228_v32 = vld [vmem:[#allocation7 + $0x318] sm:$0xff]  ;;  %v227_v61 = vld [vmem:[#allocation7 + $0x310] sm:$0xff] }
  0x82   :  { %v5467_v5 = vpack.c.bf16 %v232_v45, %v228_v32  ;;  %6504 = vst [vmem:[#allocation51_spill] sm:$0xff] %v5469_v59  ;;  %v231_v3 = vld [vmem:[#allocation7 + $0x330] sm:$0xff]  ;;  %v233_v32 = vld [vmem:[#allocation7 + $0x340] sm:$0xff] }
  0x83   :  { %3369 = vmatpush1.bf16.msra.mxu0 %v5445_v58  ;;  %6498 = vst [vmem:[#allocation45_spill] sm:$0xff] %v5453_v48  ;;  %6501 = vst [vmem:[#allocation48_spill] sm:$0xff] %v5460_v21  ;;  %v237_v45 = vld [vmem:[#allocation7 + $0x360] sm:$0xff] }
  0x84   :  { %3433 = vmatpush1.bf16.msra.mxu1 %v5448_v24  ;;  %3371 = vmatprep.subr.bf16.mxu0 %v5453_v48  ;;  %v226_v24 = vld [vmem:[#allocation7 + $0x308] sm:$0xff]  ;;  %6503 = vst [vmem:[#allocation50_spill] sm:$0xff] %v5467_v5  ;;  %v5481_v0 = vpack.c.bf16 %v237_v45, %v233_v32  ;;  %v247_v32 = vld [vmem:[#allocation7 + $0x3b0] sm:$0xff] }
  0x85   :  { %3435 = vmatprep.subr.bf16.mxu1 %v5455_v6  ;;  %v5465_v58 = vpack.c.bf16 %v230_v30, %v226_v24  ;;  %v234_v48 = vld [vmem:[#allocation7 + $0x348] sm:$0xff]  ;;  %v5478_v30 = vpack.c.bf16 %v240_v28, %v236_v42  ;;  %v244_v28 = vld [vmem:[#allocation7 + $0x398] sm:$0xff] }
  0x86   :  { %v238_v6 = vld [vmem:[#allocation7 + $0x368] sm:$0xff]  ;;  %6508 = vst [vmem:[#allocation55_spill] sm:$0xff] %v5481_v0  ;;  %v248_v42 = vld [vmem:[#allocation7 + $0x3b8] sm:$0xff] }
  0x87   :  { %3373 = vmatpush1.bf16.msra.mxu0 %v5457_v29  ;;  %6502 = vst [vmem:[#allocation49_spill] sm:$0xff] %v5465_v58  ;;  %v5472_v29 = vpack.c.bf16 %v231_v3, %v227_v61  ;;  %v5476_v24 = vpack.c.bf16 %v238_v6, %v234_v48  ;;  %6507 = vst [vmem:[#allocation54_spill] sm:$0xff] %v5478_v30  ;;  %v239_v61 = vld [vmem:[#allocation7 + $0x370] sm:$0xff]  ;;  %v242_v3 = vld [vmem:[#allocation7 + $0x388] sm:$0xff] }
  0x88   :  { %3437 = vmatpush1.bf16.msra.mxu1 %v5460_v21  ;;  %3375 = vmatprep.subr.bf16.mxu0 %v5465_v58  ;;  %v246_v58 = vld [vmem:[#allocation7 + $0x3a8] sm:$0xff]  ;;  %v241_v6 = vld [vmem:[#allocation7 + $0x380] sm:$0xff] }
  0x89   :  { %6505 = vst [vmem:[#allocation52_spill] sm:$0xff] %v5472_v29  ;;  %3439 = vmatprep.subr.bf16.mxu1 %v5467_v5  ;;  %6506 = vst [vmem:[#allocation53_spill] sm:$0xff] %v5476_v24  ;;  %v5485_v5 = vpack.c.bf16 %v239_v61, %v235_v47  ;;  %v5487_v48 = vpack.c.bf16 %v246_v58, %v242_v3  ;;  %v245_v21 = vld [vmem:[#allocation7 + $0x3a0] sm:$0xff]  ;;  %v256_v61 = vld [vmem:[#allocation7 + $0x3f8] sm:$0xff] }
  0x8a   :  { %v5492_v45 = vpack.c.bf16 %v245_v21, %v241_v6  ;;  %v249_v3 = vld [vmem:[#allocation7 + $0x3c0] sm:$0xff]  ;;  %v251_v21 = vld [vmem:[#allocation7 + $0x3d0] sm:$0xff] }
  0x8b   :  { %3377 = vmatpush1.bf16.msra.mxu0 %v5469_v59  ;;  %6509 = vst [vmem:[#allocation56_spill] sm:$0xff] %v5485_v5  ;;  %6510 = vst [vmem:[#allocation57_spill] sm:$0xff] %v5487_v48  ;;  %v5489_v59 = vpack.c.bf16 %v248_v42, %v244_v28  ;;  %v253_v28 = vld [vmem:[#allocation7 + $0x3e0] sm:$0xff]  ;;  %v5501_v42 = vpack.c.bf16 %v256_v61, %v252_v14  ;;  %v255_v6 = vld [vmem:[#allocation7 + $0x3f0] sm:$0xff]  ;;  %v259_v14 = vlaneseq }
  0x8c   :  { %3441 = vmatpush1.bf16.msra.mxu1 %v5472_v29  ;;  %3379 = vmatprep.subr.bf16.mxu0 %v5476_v24  ;;  %v243_v29 = vld [vmem:[#allocation7 + $0x390] sm:$0xff]  ;;  %6512 = vst [vmem:[#allocation59_spill] sm:$0xff] %v5492_v45  ;;  %v254_v24 = vld [vmem:[#allocation7 + $0x3e8] sm:$0xff] }
  0x8d   :  { %3443 = vmatprep.subr.bf16.mxu1 %v5478_v30  ;;  %6511 = vst [vmem:[#allocation58_spill] sm:$0xff] %v5489_v59  ;;  %v5496_v58 = vpack.c.bf16 %v247_v32, %v243_v29  ;;  %v5498_v47 = vpack.c.bf16 %v254_v24, %v250_v15  ;;  %6515 = vst [vmem:[#allocation62_spill] sm:$0xff] %v5501_v42  ;;  %v5508_v29 = vpack.c.bf16 %v255_v6, %v251_v21  ;;  %v5141_v15 = vmov 1983009808  }
  0x8e   :  { %v429_v24 = vunpack.c.l.s4 %v5141_v15  ;;  %v5515_v32 = vshrl.u32 %v259_v14, 7 }
  0x8f   :  { %3381 = vmatpush1.bf16.msra.mxu0 %v5481_v0  ;;  %6513 = vst [vmem:[#allocation60_spill] sm:$0xff] %v5496_v58  ;;  %6514 = vst [vmem:[#allocation61_spill] sm:$0xff] %v5498_v47  ;;  %v5504_v0 = vpack.c.bf16 %v253_v28, %v249_v3 }
  0x90   :  { %3445 = vmatpush1.bf16.msra.mxu1 %v5485_v5  ;;  %3383 = vmatprep.subr.bf16.mxu0 %v5487_v48  ;;  %6517 = vst [vmem:[#allocation64_spill] sm:$0xff] %v5508_v29  ;;  %6518 = vst [vmem:[#allocation65_spill] sm:$0xff] %v5515_v32  ;;  %v430_v61 = vunpack.c.0.s8 %v429_v24 }
  0x91   :  { %3447 = vmatprep.subr.bf16.mxu1 %v5489_v59  ;;  %6516 = vst [vmem:[#allocation63_spill] sm:$0xff] %v5504_v0 }
  0x92   :  { %v5518_v28 = vsub.s32 %v430_v61, %v5515_v32 }
  0x93   :  { %3385 = vmatpush1.bf16.msra.mxu0 %v5492_v45 }
  0x94   :  { %3449 = vmatpush1.bf16.msra.mxu1 %v5496_v58  ;;  %3387 = vmatprep.subr.bf16.mxu0 %v5498_v47 }
  0x95   :  { %3451 = vmatprep.subr.bf16.mxu1 %v5501_v42 }
  0x97   :  { %3389 = vmatpush1.bf16.msra.mxu0 %v5504_v0 }
  0x98   :  { %3453 = vmatpush1.bf16.msra.mxu1 %v5508_v29  ;;  %3455 = vmatprep.subr.bf16.mxu0 %v5221_v4 }
  0x99   :  { %3487 = vmatprep.subr.bf16.mxu1 %v5223_v8  ;;  %v279_v8 = vld [vmem:[#allocation3] sm:$0xff] }
 0x12d   :  { %v346_v3 = vpop.f32.mrb[0].mxu0 }
 0x12e   :  { %v417_v21 = vpop.f32.mrb[0].mxu1  ;;  %v348_v6 = vpop.f32.mrb[1].mxu0 }
 0x12f   :  { %v426_v42 = vcombine.low %v346_v3, %v348_v6  ;;  %v419_v0 = vpop.f32.mrb[1].mxu1 }
 0x130   :  { %v427_v47 = vcombine.low %v417_v21, %v419_v0 }
 0x131   :  { %v434_v29 = vrot.slane %v426_v42, %v5518_v28 }
 0x132   :  { %v441_v4 = vrot.slane %v427_v47, %v5518_v28 }
 0x134   :  { %v442_v58 = vcombine.low %v434_v29, %v441_v4 }
 0x136   :  { %v444_v45 = vadd.f32 %v442_v58, %v279_v8 }
 0x138   :  { %v3213_v15 = vmul.f32 -1.442695, %v444_v45  ;;  %v452_v14 = vrot.slane %v444_v45, 2  ;;  %v463_v59 = vrot.slane %v444_v45, 6  ;;  %v460_v48 = vrot.slane %v444_v45, 4 }
 0x13a   :  { %4807 = vpow2.f32 %v3213_v15  ;;  %v3214_v24 = vmul.f32 -1.442695, %v452_v14  ;;  %v3215_v61 = vmul.f32 -1.442695, %v463_v59  ;;  %v6521_v15 = vld [vmem:[#allocation15_spill] sm:$0xff]  ;;  %v6522_v14 = vld [vmem:[#allocation16_spill] sm:$0xff] }
 0x13c   :  { %4809 = vpow2.f32 %v3214_v24  ;;  %v6523_v24 = vld [vmem:[#allocation17_spill] sm:$0xff] }
 0x13d   :  { %4811 = vpow2.f32 %v3215_v61  ;;  %v6524_v61 = vld [vmem:[#allocation18_spill] sm:$0xff] }
 0x144   :  { %v4808_v32 = vpop.eup %4807 }
 0x145   :  { %v448_v5 = vadd.f32 1.0, %v4808_v32 }
 0x146   :  { %v4810_v3 = vpop.eup %4809 }
 0x147   :  { %4813 = vrcp.f32 %v448_v5  ;;  %v457_v0 = vadd.f32 1.0, %v4810_v3  ;;  %v4812_v47 = vpop.eup %4811  ;;  %v6519_v5 = vmov 0.0   ;;  %v6525_v3 = vld [vmem:[#allocation19_spill] sm:$0xff] }
 0x148   :  { %4815 = vtanh.f32 %v460_v48  ;;  %v468_v58 = vadd.f32 1.0, %v4812_v47  ;;  %v6520_v48 = vld [vmem:[#allocation14_spill] sm:$0xff]  ;;  %v6527_v47 = vld [vmem:[#allocation21_spill] sm:$0xff] }
 0x149   :  { %4817 = vrcp.f32 %v457_v0  ;;  %v6526_v0 = vld [vmem:[#allocation20_spill] sm:$0xff] }
 0x14a   :  { %4819 = vrcp.f32 %v468_v58  ;;  %v6531_v58 = vld [vmem:[#allocation25_spill] sm:$0xff] }
 0x151   :  { %v4814_v42 = vpop.eup %4813 }
 0x152   :  { %v4816_v4 = vpop.eup %4815 }
 0x153   :  { %v4818_v8 = vpop.eup %4817  ;;  %v472_v21 = vmul.f32 %v4816_v4, %v4814_v42  ;;  %v6528_v42 = vld [vmem:[#allocation22_spill] sm:$0xff]  ;;  %v6529_v4 = vld [vmem:[#allocation23_spill] sm:$0xff] }
 0x154   :  { %v471_v29 = vmul.f32 0.0, %v4818_v8  ;;  %v4820_v59 = vpop.eup %4819  ;;  %v6530_v8 = vld [vmem:[#allocation24_spill] sm:$0xff] }
 0x156   :  { %v5522_v6 = vadd.f32 %v472_v21, %v471_v29  ;;  %v6532_v29 = vld [vmem:[#allocation26_spill] sm:$0xff]  ;;  %v6533_v21 = vld [vmem:[#allocation27_spill] sm:$0xff] }
 0x158   :  { %4821 = vtanh.f32 %v5522_v6 }
 0x162   :  { %v4822_v45 = vpop.eup %4821 }
 0x163   :  { %v475_v32 = vmul.f32 %v4822_v45, %v4820_v59  ;;  %v6534_v59 = vld [vmem:[#allocation28_spill] sm:$0xff]  ;;  %v6535_v45 = vld [vmem:[#allocation29_spill] sm:$0xff] }
 0x165   :  { %541 = vmatmul.mubr.f32.vlgmr.msra.gmra.mrb[2].mxu0 %v475_v32  ;;  %612 = vmatmul.mubr.f32.vlgmr.msra.gmra.mrb[2].mxu1 %v475_v32 }
 0x166   :  { %3457 = vmatpush1.bf16.msra.mxu0 %v5225_v9  ;;  %3489 = vmatpush1.bf16.msra.mxu1 %v5228_v13 }
 0x167   :  { %3459 = vmatprep.subr.bf16.mxu0 %v5232_v17  ;;  %3491 = vmatprep.subr.bf16.mxu1 %v5234_v18 }
 0x168   :  { %708 = vmatprep.mubr.f32.mxu0 %v6519_v5  ;;  %779 = vmatprep.mubr.f32.mxu1 %v6519_v5 }
 0x16a   :  { %3461 = vmatpush1.bf16.msra.mxu0 %v5237_v22  ;;  %3493 = vmatpush1.bf16.msra.mxu1 %v5241_v26 }
 0x16b   :  { %3463 = vmatprep.subr.bf16.mxu0 %v5243_v27  ;;  %3495 = vmatprep.subr.bf16.mxu1 %v5245_v31 }
 0x16e   :  { %3465 = vmatpush1.bf16.msra.mxu0 %v5248_v35  ;;  %3497 = vmatpush1.bf16.msra.mxu1 %v5252_v39 }
 0x16f   :  { %3467 = vmatprep.subr.bf16.mxu0 %v5254_v40  ;;  %3499 = vmatprep.subr.bf16.mxu1 %v5257_v44 }
 0x172   :  { %3469 = vmatpush1.bf16.msra.mxu0 %v5260_v51  ;;  %3501 = vmatpush1.bf16.msra.mxu1 %v5264_v52 }
 0x173   :  { %3471 = vmatprep.subr.bf16.mxu0 %v5266_v53  ;;  %3503 = vmatprep.subr.bf16.mxu1 %v5269_v57 }
 0x176   :  { %3473 = vmatpush1.bf16.msra.mxu0 %v5272_v63  ;;  %3505 = vmatpush1.bf16.msra.mxu1 %v5276_v1 }
 0x177   :  { %3475 = vmatprep.subr.bf16.mxu0 %v5278_v2  ;;  %3507 = vmatprep.subr.bf16.mxu1 %v5281_v7 }
 0x17a   :  { %3477 = vmatpush1.bf16.msra.mxu0 %v5284_v16  ;;  %3509 = vmatpush1.bf16.msra.mxu1 %v5288_v19 }
 0x17b   :  { %3479 = vmatprep.subr.bf16.mxu0 %v5290_v20  ;;  %3511 = vmatprep.subr.bf16.mxu1 %v5293_v25 }
 0x17e   :  { %3481 = vmatpush1.bf16.msra.mxu0 %v5296_v34  ;;  %3513 = vmatpush1.bf16.msra.mxu1 %v5300_v36 }
 0x17f   :  { %3483 = vmatprep.subr.bf16.mxu0 %v5302_v37  ;;  %3515 = vmatprep.subr.bf16.mxu1 %v5305_v43 }
 0x182   :  { %3485 = vmatpush1.bf16.msra.mxu0 %v5308_v50  ;;  %3517 = vmatpush1.bf16.msra.mxu1 %v5312_v54 }
 0x183   :  { %3519 = vmatprep.subr.bf16.mxu0 %v5314_v55  ;;  %3583 = vmatprep.subr.bf16.mxu1 %v5317_v60 }
 0x185   :  { %709 = vmatmul.mubr.f32.vlgmr.msra.gmra.mrb[4].mxu0 %v475_v32  ;;  %780 = vmatmul.mubr.f32.vlgmr.msra.gmra.mrb[4].mxu1 %v475_v32  ;;  %v6536_v32 = vld [vmem:[#allocation30_spill] sm:$0xff] }
 0x186   :  { %3521 = vmatpush1.bf16.msra.mxu0 %v5320_v10  ;;  %3585 = vmatpush1.bf16.msra.mxu1 %v5324_v11 }
 0x187   :  { %3523 = vmatprep.subr.bf16.mxu0 %v5326_v12  ;;  %3587 = vmatprep.subr.bf16.mxu1 %v5329_v23 }
 0x18a   :  { %3525 = vmatpush1.bf16.msra.mxu0 %v5334_v33  ;;  %3589 = vmatpush1.bf16.msra.mxu1 %v5338_v38 }
 0x18b   :  { %3527 = vmatprep.subr.bf16.mxu0 %v5340_v41  ;;  %3591 = vmatprep.subr.bf16.mxu1 %v5343_v46 }
 0x18e   :  { %3529 = vmatpush1.bf16.msra.mxu0 %v5348_v49  ;;  %3593 = vmatpush1.bf16.msra.mxu1 %v5352_v56 }
 0x18f   :  { %3531 = vmatprep.subr.bf16.mxu0 %v5357_v62  ;;  %3595 = vmatprep.subr.bf16.mxu1 %v6520_v48 }
 0x192   :  { %3533 = vmatpush1.bf16.msra.mxu0 %v6521_v15  ;;  %3597 = vmatpush1.bf16.msra.mxu1 %v6522_v14 }
 0x193   :  { %3535 = vmatprep.subr.bf16.mxu0 %v6523_v24  ;;  %3599 = vmatprep.subr.bf16.mxu1 %v6524_v61 }
 0x196   :  { %3537 = vmatpush1.bf16.msra.mxu0 %v6525_v3  ;;  %3601 = vmatpush1.bf16.msra.mxu1 %v6526_v0  ;;  %v6537_v0 = vld [vmem:[#allocation31_spill] sm:$0xff] }
 0x197   :  { %3539 = vmatprep.subr.bf16.mxu0 %v6527_v47  ;;  %3603 = vmatprep.subr.bf16.mxu1 %v6528_v42  ;;  %v6538_v47 = vld [vmem:[#allocation32_spill] sm:$0xff]  ;;  %v6539_v42 = vld [vmem:[#allocation33_spill] sm:$0xff] }
 0x19a   :  { %3541 = vmatpush1.bf16.msra.mxu0 %v6529_v4  ;;  %3605 = vmatpush1.bf16.msra.mxu1 %v6530_v8  ;;  %v6540_v4 = vld [vmem:[#allocation34_spill] sm:$0xff]  ;;  %v6541_v8 = vld [vmem:[#allocation35_spill] sm:$0xff] }
 0x19b   :  { %3543 = vmatprep.subr.bf16.mxu0 %v6531_v58  ;;  %3607 = vmatprep.subr.bf16.mxu1 %v6532_v29  ;;  %v6542_v58 = vld [vmem:[#allocation36_spill] sm:$0xff]  ;;  %v6543_v29 = vld [vmem:[#allocation37_spill] sm:$0xff] }
 0x19e   :  { %3545 = vmatpush1.bf16.msra.mxu0 %v6533_v21  ;;  %3609 = vmatpush1.bf16.msra.mxu1 %v6534_v59  ;;  %v6544_v21 = vld [vmem:[#allocation38_spill] sm:$0xff]  ;;  %v6545_v59 = vld [vmem:[#allocation39_spill] sm:$0xff] }
 0x19f   :  { %3547 = vmatprep.subr.bf16.mxu0 %v6535_v45  ;;  %3611 = vmatprep.subr.bf16.mxu1 %v6536_v32  ;;  %v6546_v45 = vld [vmem:[#allocation40_spill] sm:$0xff]  ;;  %v6547_v32 = vld [vmem:[#allocation41_spill] sm:$0xff] }
 0x1a2   :  { %3549 = vmatpush1.bf16.msra.mxu0 %v6537_v0  ;;  %3613 = vmatpush1.bf16.msra.mxu1 %v6538_v47  ;;  %v6548_v0 = vld [vmem:[#allocation42_spill] sm:$0xff]  ;;  %v6549_v47 = vld [vmem:[#allocation43_spill] sm:$0xff] }
 0x1a3   :  { %3551 = vmatprep.subr.bf16.mxu0 %v6539_v42  ;;  %3615 = vmatprep.subr.bf16.mxu1 %v6540_v4  ;;  %v6550_v42 = vld [vmem:[#allocation44_spill] sm:$0xff]  ;;  %v6551_v4 = vld [vmem:[#allocation45_spill] sm:$0xff] }
 0x1a6   :  { %3553 = vmatpush1.bf16.msra.mxu0 %v6541_v8  ;;  %3617 = vmatpush1.bf16.msra.mxu1 %v6542_v58  ;;  %v6552_v8 = vld [vmem:[#allocation46_spill] sm:$0xff]  ;;  %v6553_v58 = vld [vmem:[#allocation47_spill] sm:$0xff] }
 0x1a7   :  { %3555 = vmatprep.subr.bf16.mxu0 %v6543_v29  ;;  %3619 = vmatprep.subr.bf16.mxu1 %v6544_v21  ;;  %v6554_v29 = vld [vmem:[#allocation48_spill] sm:$0xff]  ;;  %v6555_v21 = vld [vmem:[#allocation49_spill] sm:$0xff] }
 0x1aa   :  { %3557 = vmatpush1.bf16.msra.mxu0 %v6545_v59  ;;  %3621 = vmatpush1.bf16.msra.mxu1 %v6546_v45  ;;  %v6556_v59 = vld [vmem:[#allocation50_spill] sm:$0xff]  ;;  %v6557_v45 = vld [vmem:[#allocation51_spill] sm:$0xff] }
 0x1ab   :  { %3559 = vmatprep.subr.bf16.mxu0 %v6547_v32  ;;  %3623 = vmatprep.subr.bf16.mxu1 %v6548_v0  ;;  %v6558_v32 = vld [vmem:[#allocation52_spill] sm:$0xff]  ;;  %v6559_v0 = vld [vmem:[#allocation53_spill] sm:$0xff] }
 0x1ae   :  { %3561 = vmatpush1.bf16.msra.mxu0 %v6549_v47  ;;  %3625 = vmatpush1.bf16.msra.mxu1 %v6550_v42  ;;  %v6560_v42 = vld [vmem:[#allocation55_spill] sm:$0xff] }
 0x1af   :  { %3563 = vmatprep.subr.bf16.mxu0 %v6551_v4  ;;  %3627 = vmatprep.subr.bf16.mxu1 %v6552_v8  ;;  %v6561_v4 = vld [vmem:[#allocation56_spill] sm:$0xff]  ;;  %v6562_v8 = vld [vmem:[#allocation57_spill] sm:$0xff] }
 0x1b2   :  { %3565 = vmatpush1.bf16.msra.mxu0 %v6553_v58  ;;  %3629 = vmatpush1.bf16.msra.mxu1 %v6554_v29  ;;  %v6563_v58 = vld [vmem:[#allocation58_spill] sm:$0xff]  ;;  %v6564_v29 = vld [vmem:[#allocation59_spill] sm:$0xff] }
 0x1b3   :  { %3567 = vmatprep.subr.bf16.mxu0 %v6555_v21  ;;  %3631 = vmatprep.subr.bf16.mxu1 %v6556_v59  ;;  %v6565_v21 = vld [vmem:[#allocation60_spill] sm:$0xff]  ;;  %v6566_v59 = vld [vmem:[#allocation61_spill] sm:$0xff] }
 0x1b6   :  { %3569 = vmatpush1.bf16.msra.mxu0 %v6557_v45  ;;  %3633 = vmatpush1.bf16.msra.mxu1 %v6558_v32  ;;  %v6567_v45 = vld [vmem:[#allocation62_spill] sm:$0xff]  ;;  %v6568_v32 = vld [vmem:[#allocation63_spill] sm:$0xff] }
 0x1b7   :  { %3571 = vmatprep.subr.bf16.mxu0 %v6559_v0  ;;  %3635 = vmatprep.subr.bf16.mxu1 %v5478_v30  ;;  %v6569_v0 = vld [vmem:[#allocation64_spill] sm:$0xff]  ;;  %v6570_v30 = vld [vmem:[#allocation10_spill] sm:$0xff] }
 0x1ba   :  { %3573 = vmatpush1.bf16.msra.mxu0 %v6560_v42  ;;  %3637 = vmatpush1.bf16.msra.mxu1 %v6561_v4  ;;  %v6571_v42 = vld [vmem:[#allocation11_spill] sm:$0xff]  ;;  %v6572_v4 = vld [vmem:[#allocation65_spill] sm:$0xff] }
 0x1bb   :  { %3575 = vmatprep.subr.bf16.mxu0 %v6562_v8  ;;  %3639 = vmatprep.subr.bf16.mxu1 %v6563_v58  ;;  %v261_v8 = vsub.s32 0, %v6572_v4 }
 0x1be   :  { %3577 = vmatpush1.bf16.msra.mxu0 %v6564_v29  ;;  %3641 = vmatpush1.bf16.msra.mxu1 %v6565_v21  ;;  %v257_v29 = vld [vmem:[%s6335_s3] sm:$0xf]  ;;  %v265_v21 = vsub.s32 1, %v6572_v4 }
 0x1bf   :  { %3579 = vmatprep.subr.bf16.mxu0 %v6566_v59  ;;  %3643 = vmatprep.subr.bf16.mxu1 %v6567_v45  ;;  %v5628_v58 = vrot.slane %v257_v29, %v261_v8  ;;  %v269_v8 = vsub.s32 2, %v6572_v4 }
 0x1c0   :  { %v5630_v59 = vrot.slane %v257_v29, %v265_v21 }
 0x1c1   :  { %6573 = vst [vmem:[#allocation65_spill] sm:$0xff] %v5628_v58  ;;  %v5639_v15 = vrot.slane %v257_v29, %v269_v8 }
 0x1c2   :  { %3581 = vmatpush1.bf16.msra.mxu0 %v6568_v32  ;;  %3645 = vmatpush1.bf16.msra.mxu1 %v6569_v0  ;;  %6574 = vst [vmem:[#allocation66_spill] sm:$0xff] %v5630_v59  ;;  %v273_v0 = vsub.s32 3, %v6572_v4 }
 0x1c3   :  { %3647 = vmatprep.subr.bf16.mxu0 %v6570_v30  ;;  %3679 = vmatprep.subr.bf16.mxu1 %v6571_v42  ;;  %6576 = vst [vmem:[#allocation68_spill] sm:$0xff] %v5639_v15 }
 0x1c4   :  { %v5635_v14 = vrot.slane %v257_v29, %v273_v0 }
 0x1c6   :  { %6575 = vst [vmem:[#allocation67_spill] sm:$0xff] %v5635_v14 }
 0x238   :  { %v542_v45 = vpop.f32.mrb[2].mxu0  ;;  %v613_v32 = vpop.f32.mrb[2].mxu1 }
 0x239   :  { %v543_v30 = vadd.f32 %v542_v45, %v5628_v58  ;;  %v544_v47 = vpop.f32.mrb[3].mxu0  ;;  %v615_v42 = vpop.f32.mrb[3].mxu1  ;;  %v614_v62 = vadd.f32 %v613_v32, %v5639_v15 }
 0x23a   :  { %v545_v3 = vadd.f32 %v544_v47, %v5630_v59  ;;  %v616_v21 = vadd.f32 %v615_v42, %v5635_v14 }
 0x23b   :  { %v3216_v61 = vmul.f32 -1.442695, %v543_v30 }
 0x23c   :  { %v3217_v24 = vmul.f32 -1.442695, %v545_v3  ;;  %v3218_v48 = vmul.f32 -1.442695, %v616_v21 }
 0x23d   :  { %4823 = vpow2.f32 %v3216_v61 }
 0x23e   :  { %4825 = vpow2.f32 %v3217_v24 }
 0x23f   :  { %4827 = vpow2.f32 %v3218_v48 }
 0x240   :  { %4829 = vtanh.f32 %v614_v62 }
 0x247   :  { %v4824_v45 = vpop.eup %4823 }
 0x248   :  { %v4826_v58 = vpop.eup %4825  ;;  %v621_v56 = vadd.f32 1.0, %v4824_v45  ;;  %v643_v45 = vld [vmem:[#allocation3 + $0x8] sm:$0xff] }
 0x249   :  { %v627_v30 = vadd.f32 1.0, %v4826_v58  ;;  %v4828_v3 = vpop.eup %4827 }
 0x24a   :  { %4831 = vrcp.f32 %v621_v56  ;;  %v4830_v61 = vpop.eup %4829  ;;  %v634_v4 = vadd.f32 1.0, %v4828_v3 }
 0x24b   :  { %4833 = vrcp.f32 %v627_v30 }
 0x24c   :  { %4835 = vrcp.f32 %v634_v4 }
 0x254   :  { %v4832_v0 = vpop.eup %4831 }
 0x255   :  { %v4834_v47 = vpop.eup %4833  ;;  %v638_v24 = vmul.f32 %v4832_v0, %v4830_v61 }
 0x256   :  { %v637_v42 = vmul.f32 0.0, %v4834_v47  ;;  %v4836_v47 = vpop.eup %4835 }
 0x258   :  { %v5642_v29 = vadd.f32 %v638_v24, %v637_v42  ;;  %v710_v8 = vpop.f32.mrb[4].mxu0  ;;  %v781_v21 = vpop.f32.mrb[4].mxu1 }
 0x259   :  { %v712_v32 = vpop.f32.mrb[5].mxu0  ;;  %v783_v15 = vpop.f32.mrb[5].mxu1 }
 0x25a   :  { %6577 = vst [vmem:[#allocation69_spill] sm:$0xff] %v5642_v29  ;;  %4837 = vtanh.f32 %v5642_v29  ;;  %v790_v62 = vcombine.low %v710_v8, %v712_v32  ;;  %v791_v48 = vcombine.low %v781_v21, %v783_v15 }
 0x25c   :  { %v798_v56 = vrot.slane %v790_v62, %v5518_v28  ;;  %v805_v58 = vrot.slane %v791_v48, %v5518_v28 }
 0x25e   :  { %v806_v30 = vcombine.low %v798_v56, %v805_v58 }
 0x260   :  { %v808_v61 = vadd.f32 %v806_v30, %v643_v45 }
 0x262   :  { %v3219_v3 = vmul.f32 -1.442695, %v808_v61  ;;  %v816_v0 = vrot.slane %v808_v61, 2  ;;  %v827_v29 = vrot.slane %v808_v61, 6  ;;  %v824_v21 = vrot.slane %v808_v61, 4 }
 0x264   :  { %v4838_v24 = vpop.eup %4837  ;;  %4839 = vpow2.f32 %v3219_v3  ;;  %v3220_v42 = vmul.f32 -1.442695, %v816_v0  ;;  %v3221_v8 = vmul.f32 -1.442695, %v827_v29 }
 0x265   :  { %v641_v4 = vmul.f32 %v4838_v24, %v4836_v47 }
 0x266   :  { %4841 = vpow2.f32 %v3220_v42 }
 0x267   :  { %904 = vmatprep.mubr.f32.mxu0 %v641_v4  ;;  %975 = vmatprep.mubr.f32.mxu1 %v641_v4  ;;  %4843 = vpow2.f32 %v3221_v8  ;;  %v6579_v4 = vld [vmem:[#allocation13_spill] sm:$0xff]  ;;  %v6580_v8 = vld [vmem:[#allocation14_spill] sm:$0xff] }
 0x26e   :  { %v4840_v15 = vpop.eup %4839 }
 0x26f   :  { %v812_v32 = vadd.f32 1.0, %v4840_v15  ;;  %v6581_v15 = vld [vmem:[#allocation15_spill] sm:$0xff] }
 0x270   :  { %v4842_v62 = vpop.eup %4841 }
 0x271   :  { %4845 = vrcp.f32 %v812_v32  ;;  %v821_v48 = vadd.f32 1.0, %v4842_v62  ;;  %v4844_v56 = vpop.eup %4843  ;;  %v6583_v32 = vld [vmem:[#allocation17_spill] sm:$0xff]  ;;  %v6584_v62 = vld [vmem:[#allocation18_spill] sm:$0xff] }
 0x272   :  { %4847 = vtanh.f32 %v824_v21  ;;  %v832_v3 = vadd.f32 1.0, %v4844_v56  ;;  %v6582_v21 = vld [vmem:[#allocation16_spill] sm:$0xff] }
 0x273   :  { %4849 = vrcp.f32 %v821_v48  ;;  %v6585_v48 = vld [vmem:[#allocation19_spill] sm:$0xff]  ;;  %v6586_v56 = vld [vmem:[#allocation20_spill] sm:$0xff] }
 0x274   :  { %4851 = vrcp.f32 %v832_v3  ;;  %v6590_v3 = vld [vmem:[#allocation24_spill] sm:$0xff] }
 0x27b   :  { %v4846_v58 = vpop.eup %4845 }
 0x27c   :  { %v4848_v45 = vpop.eup %4847 }
 0x27d   :  { %v4850_v30 = vpop.eup %4849  ;;  %v836_v47 = vmul.f32 %v4848_v45, %v4846_v58  ;;  %v6587_v58 = vld [vmem:[#allocation21_spill] sm:$0xff]  ;;  %v6588_v45 = vld [vmem:[#allocation22_spill] sm:$0xff] }
 0x27e   :  { %v835_v0 = vmul.f32 %v4850_v30, %v5522_v6  ;;  %v4852_v29 = vpop.eup %4851  ;;  %v6578_v6 = vld [vmem:[#allocation12_spill] sm:$0xff]  ;;  %v6589_v30 = vld [vmem:[#allocation23_spill] sm:$0xff] }
 0x280   :  { %v5648_v24 = vadd.f32 %v836_v47, %v835_v0  ;;  %v6591_v0 = vld [vmem:[#allocation25_spill] sm:$0xff]  ;;  %v6592_v47 = vld [vmem:[#allocation26_spill] sm:$0xff] }
 0x282   :  { %4853 = vtanh.f32 %v5648_v24 }
 0x28c   :  { %v4854_v61 = vpop.eup %4853 }
 0x28d   :  { %v839_v42 = vmul.f32 %v4854_v61, %v4852_v29  ;;  %v6593_v29 = vld [vmem:[#allocation27_spill] sm:$0xff]  ;;  %v6594_v61 = vld [vmem:[#allocation28_spill] sm:$0xff] }
 0x28f   :  { %905 = vmatmul.mubr.f32.vlgmr.msra.gmra.mrb[6].mxu0 %v839_v42  ;;  %976 = vmatmul.mubr.f32.vlgmr.msra.gmra.mrb[6].mxu1 %v839_v42 }
 0x290   :  { %3649 = vmatpush1.bf16.msra.mxu0 %v5225_v9  ;;  %3681 = vmatpush1.bf16.msra.mxu1 %v5228_v13 }
 0x291   :  { %3651 = vmatprep.subr.bf16.mxu0 %v5232_v17  ;;  %3683 = vmatprep.subr.bf16.mxu1 %v5234_v18 }
 0x292   :  { %1072 = vmatprep.mubr.f32.mxu0 %v6519_v5  ;;  %1143 = vmatprep.mubr.f32.mxu1 %v6519_v5 }
 0x294   :  { %3653 = vmatpush1.bf16.msra.mxu0 %v5237_v22  ;;  %3685 = vmatpush1.bf16.msra.mxu1 %v5241_v26 }
 0x295   :  { %3655 = vmatprep.subr.bf16.mxu0 %v5243_v27  ;;  %3687 = vmatprep.subr.bf16.mxu1 %v5245_v31 }
 0x298   :  { %3657 = vmatpush1.bf16.msra.mxu0 %v5248_v35  ;;  %3689 = vmatpush1.bf16.msra.mxu1 %v5252_v39 }
 0x299   :  { %3659 = vmatprep.subr.bf16.mxu0 %v5254_v40  ;;  %3691 = vmatprep.subr.bf16.mxu1 %v5257_v44 }
 0x29c   :  { %3661 = vmatpush1.bf16.msra.mxu0 %v5260_v51  ;;  %3693 = vmatpush1.bf16.msra.mxu1 %v5264_v52 }
 0x29d   :  { %3663 = vmatprep.subr.bf16.mxu0 %v5266_v53  ;;  %3695 = vmatprep.subr.bf16.mxu1 %v5269_v57 }
 0x2a0   :  { %3665 = vmatpush1.bf16.msra.mxu0 %v5272_v63  ;;  %3697 = vmatpush1.bf16.msra.mxu1 %v5276_v1 }
 0x2a1   :  { %3667 = vmatprep.subr.bf16.mxu0 %v5278_v2  ;;  %3699 = vmatprep.subr.bf16.mxu1 %v5281_v7 }
 0x2a4   :  { %3669 = vmatpush1.bf16.msra.mxu0 %v5284_v16  ;;  %3701 = vmatpush1.bf16.msra.mxu1 %v5288_v19 }
 0x2a5   :  { %3671 = vmatprep.subr.bf16.mxu0 %v5290_v20  ;;  %3703 = vmatprep.subr.bf16.mxu1 %v5293_v25 }
 0x2a8   :  { %3673 = vmatpush1.bf16.msra.mxu0 %v5296_v34  ;;  %3705 = vmatpush1.bf16.msra.mxu1 %v5300_v36 }
 0x2a9   :  { %3675 = vmatprep.subr.bf16.mxu0 %v5302_v37  ;;  %3707 = vmatprep.subr.bf16.mxu1 %v5305_v43 }
 0x2ac   :  { %3677 = vmatpush1.bf16.msra.mxu0 %v5308_v50  ;;  %3709 = vmatpush1.bf16.msra.mxu1 %v5312_v54 }
 0x2ad   :  { %3711 = vmatprep.subr.bf16.mxu0 %v5314_v55  ;;  %3775 = vmatprep.subr.bf16.mxu1 %v5317_v60 }
 0x2af   :  { %1073 = vmatmul.mubr.f32.vlgmr.msra.gmra.mrb[8].mxu0 %v839_v42  ;;  %1144 = vmatmul.mubr.f32.vlgmr.msra.gmra.mrb[8].mxu1 %v839_v42  ;;  %v6595_v42 = vld [vmem:[#allocation29_spill] sm:$0xff] }
 0x2b0   :  { %3713 = vmatpush1.bf16.msra.mxu0 %v5320_v10  ;;  %3777 = vmatpush1.bf16.msra.mxu1 %v5324_v11 }
 0x2b1   :  { %3715 = vmatprep.subr.bf16.mxu0 %v5326_v12  ;;  %3779 = vmatprep.subr.bf16.mxu1 %v5329_v23 }
 0x2b4   :  { %3717 = vmatpush1.bf16.msra.mxu0 %v5334_v33  ;;  %3781 = vmatpush1.bf16.msra.mxu1 %v5338_v38 }
 0x2b5   :  { %3719 = vmatprep.subr.bf16.mxu0 %v5340_v41  ;;  %3783 = vmatprep.subr.bf16.mxu1 %v5343_v46 }
 0x2b8   :  { %3721 = vmatpush1.bf16.msra.mxu0 %v5348_v49  ;;  %3785 = vmatpush1.bf16.msra.mxu1 %v6578_v6 }
 0x2b9   :  { %3723 = vmatprep.subr.bf16.mxu0 %v6579_v4  ;;  %3787 = vmatprep.subr.bf16.mxu1 %v6580_v8 }
 0x2bc   :  { %3725 = vmatpush1.bf16.msra.mxu0 %v6581_v15  ;;  %3789 = vmatpush1.bf16.msra.mxu1 %v6582_v21 }
 0x2bd   :  { %3727 = vmatprep.subr.bf16.mxu0 %v6583_v32  ;;  %3791 = vmatprep.subr.bf16.mxu1 %v6584_v62  ;;  %v6633_v62 = vld [vmem:[#allocation65_spill] sm:$0xff] }
 0x2c0   :  { %3729 = vmatpush1.bf16.msra.mxu0 %v6585_v48  ;;  %3793 = vmatpush1.bf16.msra.mxu1 %v6586_v56  ;;  %v6596_v48 = vld [vmem:[#allocation30_spill] sm:$0xff]  ;;  %v6597_v56 = vld [vmem:[#allocation31_spill] sm:$0xff] }
 0x2c1   :  { %3731 = vmatprep.subr.bf16.mxu0 %v6587_v58  ;;  %3795 = vmatprep.subr.bf16.mxu1 %v6588_v45  ;;  %v6598_v58 = vld [vmem:[#allocation32_spill] sm:$0xff]  ;;  %v6599_v45 = vld [vmem:[#allocation33_spill] sm:$0xff] }
 0x2c4   :  { %3733 = vmatpush1.bf16.msra.mxu0 %v6589_v30  ;;  %3797 = vmatpush1.bf16.msra.mxu1 %v6590_v3  ;;  %v6600_v30 = vld [vmem:[#allocation34_spill] sm:$0xff]  ;;  %v6601_v3 = vld [vmem:[#allocation35_spill] sm:$0xff] }
 0x2c5   :  { %3735 = vmatprep.subr.bf16.mxu0 %v6591_v0  ;;  %3799 = vmatprep.subr.bf16.mxu1 %v6592_v47  ;;  %v6602_v0 = vld [vmem:[#allocation36_spill] sm:$0xff]  ;;  %v6603_v47 = vld [vmem:[#allocation37_spill] sm:$0xff] }
 0x2c8   :  { %3737 = vmatpush1.bf16.msra.mxu0 %v6593_v29  ;;  %3801 = vmatpush1.bf16.msra.mxu1 %v6594_v61  ;;  %v6604_v29 = vld [vmem:[#allocation38_spill] sm:$0xff]  ;;  %v6605_v61 = vld [vmem:[#allocation39_spill] sm:$0xff] }
 0x2c9   :  { %3739 = vmatprep.subr.bf16.mxu0 %v6595_v42  ;;  %3803 = vmatprep.subr.bf16.mxu1 %v6596_v48  ;;  %v6606_v42 = vld [vmem:[#allocation40_spill] sm:$0xff]  ;;  %v6607_v48 = vld [vmem:[#allocation41_spill] sm:$0xff] }
 0x2cc   :  { %3741 = vmatpush1.bf16.msra.mxu0 %v6597_v56  ;;  %3805 = vmatpush1.bf16.msra.mxu1 %v6598_v58  ;;  %v6608_v56 = vld [vmem:[#allocation42_spill] sm:$0xff]  ;;  %v6609_v58 = vld [vmem:[#allocation43_spill] sm:$0xff] }
 0x2cd   :  { %3743 = vmatprep.subr.bf16.mxu0 %v6599_v45  ;;  %3807 = vmatprep.subr.bf16.mxu1 %v6600_v30  ;;  %v6610_v45 = vld [vmem:[#allocation44_spill] sm:$0xff]  ;;  %v6611_v30 = vld [vmem:[#allocation45_spill] sm:$0xff] }
 0x2d0   :  { %3745 = vmatpush1.bf16.msra.mxu0 %v6601_v3  ;;  %3809 = vmatpush1.bf16.msra.mxu1 %v6602_v0  ;;  %v6612_v3 = vld [vmem:[#allocation46_spill] sm:$0xff]  ;;  %v6613_v0 = vld [vmem:[#allocation47_spill] sm:$0xff] }
 0x2d1   :  { %3747 = vmatprep.subr.bf16.mxu0 %v6603_v47  ;;  %3811 = vmatprep.subr.bf16.mxu1 %v6604_v29  ;;  %v6614_v47 = vld [vmem:[#allocation48_spill] sm:$0xff]  ;;  %v6615_v29 = vld [vmem:[#allocation49_spill] sm:$0xff] }
 0x2d4   :  { %3749 = vmatpush1.bf16.msra.mxu0 %v6605_v61  ;;  %3813 = vmatpush1.bf16.msra.mxu1 %v6606_v42  ;;  %v6616_v61 = vld [vmem:[#allocation50_spill] sm:$0xff]  ;;  %v6617_v42 = vld [vmem:[#allocation51_spill] sm:$0xff] }
 0x2d5   :  { %3751 = vmatprep.subr.bf16.mxu0 %v6607_v48  ;;  %3815 = vmatprep.subr.bf16.mxu1 %v6608_v56  ;;  %v6618_v48 = vld [vmem:[#allocation52_spill] sm:$0xff]  ;;  %v6619_v56 = vld [vmem:[#allocation53_spill] sm:$0xff] }
 0x2d8   :  { %3753 = vmatpush1.bf16.msra.mxu0 %v6609_v58  ;;  %3817 = vmatpush1.bf16.msra.mxu1 %v6610_v45  ;;  %v6620_v58 = vld [vmem:[#allocation54_spill] sm:$0xff]  ;;  %v6621_v45 = vld [vmem:[#allocation55_spill] sm:$0xff] }
 0x2d9   :  { %3755 = vmatprep.subr.bf16.mxu0 %v6611_v30  ;;  %3819 = vmatprep.subr.bf16.mxu1 %v6612_v3  ;;  %v6622_v30 = vld [vmem:[#allocation56_spill] sm:$0xff]  ;;  %v6623_v3 = vld [vmem:[#allocation57_spill] sm:$0xff] }
 0x2dc   :  { %3757 = vmatpush1.bf16.msra.mxu0 %v6613_v0  ;;  %3821 = vmatpush1.bf16.msra.mxu1 %v6614_v47  ;;  %v6624_v0 = vld [vmem:[#allocation58_spill] sm:$0xff]  ;;  %v6625_v47 = vld [vmem:[#allocation59_spill] sm:$0xff] }
 0x2dd   :  { %3759 = vmatprep.subr.bf16.mxu0 %v6615_v29  ;;  %3823 = vmatprep.subr.bf16.mxu1 %v6616_v61  ;;  %v6626_v29 = vld [vmem:[#allocation60_spill] sm:$0xff]  ;;  %v6627_v61 = vld [vmem:[#allocation61_spill] sm:$0xff] }
 0x2e0   :  { %3761 = vmatpush1.bf16.msra.mxu0 %v6617_v42  ;;  %3825 = vmatpush1.bf16.msra.mxu1 %v6618_v48  ;;  %v6628_v42 = vld [vmem:[#allocation62_spill] sm:$0xff]  ;;  %v6629_v48 = vld [vmem:[#allocation63_spill] sm:$0xff] }
 0x2e1   :  { %3763 = vmatprep.subr.bf16.mxu0 %v6619_v56  ;;  %3827 = vmatprep.subr.bf16.mxu1 %v6620_v58  ;;  %v6630_v56 = vld [vmem:[#allocation64_spill] sm:$0xff]  ;;  %v6631_v58 = vld [vmem:[#allocation10_spill] sm:$0xff] }
 0x2e4   :  { %3765 = vmatpush1.bf16.msra.mxu0 %v6621_v45  ;;  %3829 = vmatpush1.bf16.msra.mxu1 %v6622_v30  ;;  %v6632_v45 = vld [vmem:[#allocation11_spill] sm:$0xff] }
 0x2e5   :  { %3767 = vmatprep.subr.bf16.mxu0 %v6623_v3  ;;  %3831 = vmatprep.subr.bf16.mxu1 %v6624_v0 }
 0x2e8   :  { %3769 = vmatpush1.bf16.msra.mxu0 %v6625_v47  ;;  %3833 = vmatpush1.bf16.msra.mxu1 %v6626_v29 }
 0x2e9   :  { %3771 = vmatprep.subr.bf16.mxu0 %v6627_v61  ;;  %3835 = vmatprep.subr.bf16.mxu1 %v6628_v42 }
 0x2ec   :  { %3773 = vmatpush1.bf16.msra.mxu0 %v6629_v48  ;;  %3837 = vmatpush1.bf16.msra.mxu1 %v6630_v56  ;;  %v6634_v56 = vld [vmem:[#allocation68_spill] sm:$0xff] }
 0x2ed   :  { %3839 = vmatprep.subr.bf16.mxu0 %v6631_v58  ;;  %3871 = vmatprep.subr.bf16.mxu1 %v6632_v45 }
 0x362   :  { %v906_v30 = vpop.f32.mrb[6].mxu0  ;;  %v977_v3 = vpop.f32.mrb[6].mxu1 }
 0x363   :  { %v907_v0 = vadd.f32 %v906_v30, %v6633_v62  ;;  %v908_v32 = vpop.f32.mrb[7].mxu0  ;;  %v979_v47 = vpop.f32.mrb[7].mxu1  ;;  %v978_v15 = vadd.f32 %v977_v3, %v6634_v56 }
 0x364   :  { %v909_v29 = vadd.f32 %v908_v32, %v5630_v59  ;;  %v980_v48 = vadd.f32 %v979_v47, %v5635_v14 }
 0x365   :  { %v3222_v21 = vmul.f32 -1.442695, %v907_v0 }
 0x366   :  { %v3223_v61 = vmul.f32 -1.442695, %v909_v29  ;;  %v3224_v42 = vmul.f32 -1.442695, %v980_v48 }
 0x367   :  { %4855 = vpow2.f32 %v3222_v21 }
 0x368   :  { %4857 = vpow2.f32 %v3223_v61  ;;  %v6635_v61 = vld [vmem:[#allocation69_spill] sm:$0xff] }
 0x369   :  { %4859 = vpow2.f32 %v3224_v42 }
 0x36a   :  { %4861 = vtanh.f32 %v978_v15 }
 0x371   :  { %v4856_v58 = vpop.eup %4855 }
 0x372   :  { %v4858_v8 = vpop.eup %4857  ;;  %v985_v45 = vadd.f32 1.0, %v4856_v58 }
 0x373   :  { %v991_v4 = vadd.f32 1.0, %v4858_v8  ;;  %v4860_v30 = vpop.eup %4859 }
 0x374   :  { %4863 = vrcp.f32 %v985_v45  ;;  %v4862_v62 = vpop.eup %4861  ;;  %v998_v21 = vadd.f32 1.0, %v4860_v30  ;;  %v1007_v45 = vld [vmem:[#allocation3 + $0x10] sm:$0xff] }
 0x375   :  { %4865 = vrcp.f32 %v991_v4 }
 0x376   :  { %4867 = vrcp.f32 %v998_v21 }
 0x37e   :  { %v4864_v32 = vpop.eup %4863 }
 0x37f   :  { %v4866_v0 = vpop.eup %4865  ;;  %v1002_v29 = vmul.f32 %v4864_v32, %v4862_v62 }
 0x380   :  { %v1001_v59 = vmul.f32 %v4866_v0, %v6635_v61  ;;  %v4868_v61 = vpop.eup %4867 }
 0x382   :  { %v1074_v47 = vpop.f32.mrb[8].mxu0  ;;  %v1145_v48 = vpop.f32.mrb[8].mxu1  ;;  %v5754_v14 = vadd.f32 %v1002_v29, %v1001_v59 }
 0x383   :  { %v1076_v3 = vpop.f32.mrb[9].mxu0  ;;  %v1147_v58 = vpop.f32.mrb[9].mxu1 }
 0x384   :  { %v1154_v42 = vcombine.low %v1074_v47, %v1076_v3  ;;  %v1155_v15 = vcombine.low %v1145_v48, %v1147_v58  ;;  %4869 = vtanh.f32 %v5754_v14 }
 0x386   :  { %v1162_v4 = vrot.slane %v1154_v42, %v5518_v28  ;;  %v1169_v8 = vrot.slane %v1155_v15, %v5518_v28 }
 0x388   :  { %v1170_v62 = vcombine.low %v1162_v4, %v1169_v8 }
 0x38a   :  { %v1172_v30 = vadd.f32 %v1170_v62, %v1007_v45 }
 0x38c   :  { %v3225_v32 = vmul.f32 -1.442695, %v1172_v30  ;;  %v1180_v0 = vrot.slane %v1172_v30, 2  ;;  %v1191_v21 = vrot.slane %v1172_v30, 6  ;;  %v1188_v3 = vrot.slane %v1172_v30, 4 }
 0x38e   :  { %v4870_v56 = vpop.eup %4869  ;;  %4871 = vpow2.f32 %v3225_v32  ;;  %v3226_v59 = vmul.f32 -1.442695, %v1180_v0  ;;  %v3227_v47 = vmul.f32 -1.442695, %v1191_v21  ;;  %v6637_v21 = vld [vmem:[#allocation14_spill] sm:$0xff] }
 0x38f   :  { %v1005_v29 = vmul.f32 %v4870_v56, %v4868_v61 }
 0x390   :  { %4873 = vpow2.f32 %v3226_v59 }
 0x391   :  { %1268 = vmatprep.mubr.f32.mxu0 %v1005_v29  ;;  %1339 = vmatprep.mubr.f32.mxu1 %v1005_v29  ;;  %4875 = vpow2.f32 %v3227_v47  ;;  %v6638_v47 = vld [vmem:[#allocation15_spill] sm:$0xff] }
 0x398   :  { %v4872_v48 = vpop.eup %4871 }
 0x399   :  { %v1176_v58 = vadd.f32 1.0, %v4872_v48  ;;  %v6639_v48 = vld [vmem:[#allocation16_spill] sm:$0xff] }
 0x39a   :  { %v4874_v42 = vpop.eup %4873 }
 0x39b   :  { %4877 = vrcp.f32 %v1176_v58  ;;  %v1185_v15 = vadd.f32 1.0, %v4874_v42  ;;  %v4876_v4 = vpop.eup %4875  ;;  %v6641_v58 = vld [vmem:[#allocation18_spill] sm:$0xff]  ;;  %v6642_v42 = vld [vmem:[#allocation19_spill] sm:$0xff] }
 0x39c   :  { %4879 = vtanh.f32 %v1188_v3  ;;  %v1196_v32 = vadd.f32 1.0, %v4876_v4  ;;  %v6640_v3 = vld [vmem:[#allocation17_spill] sm:$0xff] }
 0x39d   :  { %4881 = vrcp.f32 %v1185_v15  ;;  %v6643_v15 = vld [vmem:[#allocation20_spill] sm:$0xff]  ;;  %v6644_v4 = vld [vmem:[#allocation21_spill] sm:$0xff] }
 0x39e   :  { %4883 = vrcp.f32 %v1196_v32  ;;  %v6648_v32 = vld [vmem:[#allocation25_spill] sm:$0xff] }
 0x3a5   :  { %v4878_v8 = vpop.eup %4877 }
 0x3a6   :  { %v4880_v45 = vpop.eup %4879 }
 0x3a7   :  { %v4882_v62 = vpop.eup %4881  ;;  %v1200_v0 = vmul.f32 %v4880_v45, %v4878_v8  ;;  %v6645_v8 = vld [vmem:[#allocation22_spill] sm:$0xff]  ;;  %v6646_v45 = vld [vmem:[#allocation23_spill] sm:$0xff] }
 0x3a8   :  { %v1199_v56 = vmul.f32 %v4882_v62, %v5648_v24  ;;  %v4884_v30 = vpop.eup %4883  ;;  %v6636_v24 = vld [vmem:[#allocation13_spill] sm:$0xff]  ;;  %v6647_v62 = vld [vmem:[#allocation24_spill] sm:$0xff] }
 0x3aa   :  { %v5760_v61 = vadd.f32 %v1200_v0, %v1199_v56  ;;  %v6649_v56 = vld [vmem:[#allocation26_spill] sm:$0xff]  ;;  %v6650_v0 = vld [vmem:[#allocation27_spill] sm:$0xff] }
 0x3ac   :  { %4885 = vtanh.f32 %v5760_v61 }
 0x3b6   :  { %v4886_v59 = vpop.eup %4885 }
 0x3b7   :  { %v1203_v29 = vmul.f32 %v4886_v59, %v4884_v30  ;;  %v6651_v30 = vld [vmem:[#allocation28_spill] sm:$0xff]  ;;  %v6652_v59 = vld [vmem:[#allocation29_spill] sm:$0xff] }
 0x3b9   :  { %1269 = vmatmul.mubr.f32.vlgmr.msra.gmra.mrb[10].mxu0 %v1203_v29  ;;  %1340 = vmatmul.mubr.f32.vlgmr.msra.gmra.mrb[10].mxu1 %v1203_v29 }
 0x3ba   :  { %3841 = vmatpush1.bf16.msra.mxu0 %v5225_v9  ;;  %3873 = vmatpush1.bf16.msra.mxu1 %v5228_v13 }
 0x3bb   :  { %3843 = vmatprep.subr.bf16.mxu0 %v5232_v17  ;;  %3875 = vmatprep.subr.bf16.mxu1 %v5234_v18 }
 0x3bc   :  { %1436 = vmatprep.mubr.f32.mxu0 %v6519_v5  ;;  %1507 = vmatprep.mubr.f32.mxu1 %v6519_v5 }
 0x3be   :  { %3845 = vmatpush1.bf16.msra.mxu0 %v5237_v22  ;;  %3877 = vmatpush1.bf16.msra.mxu1 %v5241_v26 }
 0x3bf   :  { %3847 = vmatprep.subr.bf16.mxu0 %v5243_v27  ;;  %3879 = vmatprep.subr.bf16.mxu1 %v5245_v31 }
 0x3c2   :  { %3849 = vmatpush1.bf16.msra.mxu0 %v5248_v35  ;;  %3881 = vmatpush1.bf16.msra.mxu1 %v5252_v39 }
 0x3c3   :  { %3851 = vmatprep.subr.bf16.mxu0 %v5254_v40  ;;  %3883 = vmatprep.subr.bf16.mxu1 %v5257_v44 }
 0x3c6   :  { %3853 = vmatpush1.bf16.msra.mxu0 %v5260_v51  ;;  %3885 = vmatpush1.bf16.msra.mxu1 %v5264_v52 }
 0x3c7   :  { %3855 = vmatprep.subr.bf16.mxu0 %v5266_v53  ;;  %3887 = vmatprep.subr.bf16.mxu1 %v5269_v57 }
 0x3ca   :  { %3857 = vmatpush1.bf16.msra.mxu0 %v5272_v63  ;;  %3889 = vmatpush1.bf16.msra.mxu1 %v5276_v1 }
 0x3cb   :  { %3859 = vmatprep.subr.bf16.mxu0 %v5278_v2  ;;  %3891 = vmatprep.subr.bf16.mxu1 %v5281_v7 }
 0x3ce   :  { %3861 = vmatpush1.bf16.msra.mxu0 %v5284_v16  ;;  %3893 = vmatpush1.bf16.msra.mxu1 %v5288_v19 }
 0x3cf   :  { %3863 = vmatprep.subr.bf16.mxu0 %v5290_v20  ;;  %3895 = vmatprep.subr.bf16.mxu1 %v5293_v25 }
 0x3d2   :  { %3865 = vmatpush1.bf16.msra.mxu0 %v5296_v34  ;;  %3897 = vmatpush1.bf16.msra.mxu1 %v5300_v36 }
 0x3d3   :  { %3867 = vmatprep.subr.bf16.mxu0 %v5302_v37  ;;  %3899 = vmatprep.subr.bf16.mxu1 %v5305_v43 }
 0x3d6   :  { %3869 = vmatpush1.bf16.msra.mxu0 %v5308_v50  ;;  %3901 = vmatpush1.bf16.msra.mxu1 %v5312_v54 }
 0x3d7   :  { %3903 = vmatprep.subr.bf16.mxu0 %v5314_v55  ;;  %3967 = vmatprep.subr.bf16.mxu1 %v5317_v60 }
 0x3d9   :  { %1437 = vmatmul.mubr.f32.vlgmr.msra.gmra.mrb[12].mxu0 %v1203_v29  ;;  %1508 = vmatmul.mubr.f32.vlgmr.msra.gmra.mrb[12].mxu1 %v1203_v29  ;;  %v6653_v29 = vld [vmem:[#allocation30_spill] sm:$0xff] }
 0x3da   :  { %3905 = vmatpush1.bf16.msra.mxu0 %v5320_v10  ;;  %3969 = vmatpush1.bf16.msra.mxu1 %v5324_v11 }
 0x3db   :  { %3907 = vmatprep.subr.bf16.mxu0 %v5326_v12  ;;  %3971 = vmatprep.subr.bf16.mxu1 %v5329_v23 }
 0x3de   :  { %3909 = vmatpush1.bf16.msra.mxu0 %v5334_v33  ;;  %3973 = vmatpush1.bf16.msra.mxu1 %v5338_v38 }
 0x3df   :  { %3911 = vmatprep.subr.bf16.mxu0 %v5340_v41  ;;  %3975 = vmatprep.subr.bf16.mxu1 %v5343_v46 }
 0x3e2   :  { %3913 = vmatpush1.bf16.msra.mxu0 %v5348_v49  ;;  %3977 = vmatpush1.bf16.msra.mxu1 %v6578_v6 }
 0x3e3   :  { %3915 = vmatprep.subr.bf16.mxu0 %v6636_v24  ;;  %3979 = vmatprep.subr.bf16.mxu1 %v6637_v21 }
 0x3e6   :  { %3917 = vmatpush1.bf16.msra.mxu0 %v6638_v47  ;;  %3981 = vmatpush1.bf16.msra.mxu1 %v6639_v48 }
 0x3e7   :  { %3919 = vmatprep.subr.bf16.mxu0 %v6640_v3  ;;  %3983 = vmatprep.subr.bf16.mxu1 %v6641_v58  ;;  %v6691_v3 = vld [vmem:[#allocation66_spill] sm:$0xff] }
 0x3ea   :  { %3921 = vmatpush1.bf16.msra.mxu0 %v6642_v42  ;;  %3985 = vmatpush1.bf16.msra.mxu1 %v6643_v15  ;;  %v6654_v15 = vld [vmem:[#allocation31_spill] sm:$0xff]  ;;  %v6690_v42 = vld [vmem:[#allocation65_spill] sm:$0xff] }
 0x3eb   :  { %3923 = vmatprep.subr.bf16.mxu0 %v6644_v4  ;;  %3987 = vmatprep.subr.bf16.mxu1 %v6645_v8  ;;  %v6655_v4 = vld [vmem:[#allocation32_spill] sm:$0xff]  ;;  %v6656_v8 = vld [vmem:[#allocation33_spill] sm:$0xff] }
 0x3ee   :  { %3925 = vmatpush1.bf16.msra.mxu0 %v6646_v45  ;;  %3989 = vmatpush1.bf16.msra.mxu1 %v6647_v62  ;;  %v6657_v45 = vld [vmem:[#allocation34_spill] sm:$0xff]  ;;  %v6658_v62 = vld [vmem:[#allocation35_spill] sm:$0xff] }
 0x3ef   :  { %3927 = vmatprep.subr.bf16.mxu0 %v6648_v32  ;;  %3991 = vmatprep.subr.bf16.mxu1 %v6649_v56  ;;  %v6659_v32 = vld [vmem:[#allocation36_spill] sm:$0xff]  ;;  %v6660_v56 = vld [vmem:[#allocation37_spill] sm:$0xff] }
 0x3f2   :  { %3929 = vmatpush1.bf16.msra.mxu0 %v6650_v0  ;;  %3993 = vmatpush1.bf16.msra.mxu1 %v6651_v30  ;;  %v6661_v0 = vld [vmem:[#allocation38_spill] sm:$0xff]  ;;  %v6662_v30 = vld [vmem:[#allocation39_spill] sm:$0xff] }
 0x3f3   :  { %3931 = vmatprep.subr.bf16.mxu0 %v6652_v59  ;;  %3995 = vmatprep.subr.bf16.mxu1 %v6653_v29  ;;  %v6663_v59 = vld [vmem:[#allocation40_spill] sm:$0xff]  ;;  %v6664_v29 = vld [vmem:[#allocation41_spill] sm:$0xff] }
 0x3f6   :  { %3933 = vmatpush1.bf16.msra.mxu0 %v6654_v15  ;;  %3997 = vmatpush1.bf16.msra.mxu1 %v6655_v4  ;;  %v6665_v15 = vld [vmem:[#allocation42_spill] sm:$0xff]  ;;  %v6666_v4 = vld [vmem:[#allocation43_spill] sm:$0xff] }
 0x3f7   :  { %3935 = vmatprep.subr.bf16.mxu0 %v6656_v8  ;;  %3999 = vmatprep.subr.bf16.mxu1 %v6657_v45  ;;  %v6667_v8 = vld [vmem:[#allocation44_spill] sm:$0xff]  ;;  %v6668_v45 = vld [vmem:[#allocation45_spill] sm:$0xff] }
 0x3fa   :  { %3937 = vmatpush1.bf16.msra.mxu0 %v6658_v62  ;;  %4001 = vmatpush1.bf16.msra.mxu1 %v6659_v32  ;;  %v6669_v62 = vld [vmem:[#allocation46_spill] sm:$0xff]  ;;  %v6670_v32 = vld [vmem:[#allocation47_spill] sm:$0xff] }
 0x3fb   :  { %3939 = vmatprep.subr.bf16.mxu0 %v6660_v56  ;;  %4003 = vmatprep.subr.bf16.mxu1 %v6661_v0  ;;  %v6671_v56 = vld [vmem:[#allocation48_spill] sm:$0xff]  ;;  %v6672_v0 = vld [vmem:[#allocation49_spill] sm:$0xff] }
 0x3fe   :  { %3941 = vmatpush1.bf16.msra.mxu0 %v6662_v30  ;;  %4005 = vmatpush1.bf16.msra.mxu1 %v6663_v59  ;;  %v6673_v30 = vld [vmem:[#allocation50_spill] sm:$0xff]  ;;  %v6674_v59 = vld [vmem:[#allocation51_spill] sm:$0xff] }
 0x3ff   :  { %3943 = vmatprep.subr.bf16.mxu0 %v6664_v29  ;;  %4007 = vmatprep.subr.bf16.mxu1 %v6665_v15  ;;  %v6675_v29 = vld [vmem:[#allocation52_spill] sm:$0xff]  ;;  %v6676_v15 = vld [vmem:[#allocation53_spill] sm:$0xff] }
 0x402   :  { %3945 = vmatpush1.bf16.msra.mxu0 %v6666_v4  ;;  %4009 = vmatpush1.bf16.msra.mxu1 %v6667_v8  ;;  %v6677_v4 = vld [vmem:[#allocation54_spill] sm:$0xff]  ;;  %v6678_v8 = vld [vmem:[#allocation55_spill] sm:$0xff] }
 0x403   :  { %3947 = vmatprep.subr.bf16.mxu0 %v6668_v45  ;;  %4011 = vmatprep.subr.bf16.mxu1 %v6669_v62  ;;  %v6679_v45 = vld [vmem:[#allocation56_spill] sm:$0xff]  ;;  %v6680_v62 = vld [vmem:[#allocation57_spill] sm:$0xff] }
 0x406   :  { %3949 = vmatpush1.bf16.msra.mxu0 %v6670_v32  ;;  %4013 = vmatpush1.bf16.msra.mxu1 %v6671_v56  ;;  %v6681_v32 = vld [vmem:[#allocation58_spill] sm:$0xff]  ;;  %v6682_v56 = vld [vmem:[#allocation59_spill] sm:$0xff] }
 0x407   :  { %3951 = vmatprep.subr.bf16.mxu0 %v6672_v0  ;;  %4015 = vmatprep.subr.bf16.mxu1 %v6673_v30  ;;  %v6683_v0 = vld [vmem:[#allocation60_spill] sm:$0xff]  ;;  %v6684_v30 = vld [vmem:[#allocation61_spill] sm:$0xff] }
 0x40a   :  { %3953 = vmatpush1.bf16.msra.mxu0 %v6674_v59  ;;  %4017 = vmatpush1.bf16.msra.mxu1 %v6675_v29  ;;  %v6685_v59 = vld [vmem:[#allocation62_spill] sm:$0xff]  ;;  %v6686_v29 = vld [vmem:[#allocation63_spill] sm:$0xff] }
 0x40b   :  { %3955 = vmatprep.subr.bf16.mxu0 %v6676_v15  ;;  %4019 = vmatprep.subr.bf16.mxu1 %v6677_v4  ;;  %v6687_v15 = vld [vmem:[#allocation64_spill] sm:$0xff]  ;;  %v6688_v4 = vld [vmem:[#allocation10_spill] sm:$0xff] }
 0x40e   :  { %3957 = vmatpush1.bf16.msra.mxu0 %v6678_v8  ;;  %4021 = vmatpush1.bf16.msra.mxu1 %v6679_v45  ;;  %v6689_v8 = vld [vmem:[#allocation11_spill] sm:$0xff] }
 0x40f   :  { %3959 = vmatprep.subr.bf16.mxu0 %v6680_v62  ;;  %4023 = vmatprep.subr.bf16.mxu1 %v6681_v32 }
 0x412   :  { %3961 = vmatpush1.bf16.msra.mxu0 %v6682_v56  ;;  %4025 = vmatpush1.bf16.msra.mxu1 %v6683_v0 }
 0x413   :  { %3963 = vmatprep.subr.bf16.mxu0 %v6684_v30  ;;  %4027 = vmatprep.subr.bf16.mxu1 %v6685_v59  ;;  %v6692_v59 = vld [vmem:[#allocation67_spill] sm:$0xff] }
 0x416   :  { %3965 = vmatpush1.bf16.msra.mxu0 %v6686_v29  ;;  %4029 = vmatpush1.bf16.msra.mxu1 %v6687_v15  ;;  %v6693_v15 = vld [vmem:[#allocation68_spill] sm:$0xff] }
 0x417   :  { %4031 = vmatprep.subr.bf16.mxu0 %v6688_v4  ;;  %4063 = vmatprep.subr.bf16.mxu1 %v6689_v8 }
 0x48c   :  { %v1270_v45 = vpop.f32.mrb[10].mxu0  ;;  %v1341_v62 = vpop.f32.mrb[10].mxu1 }
 0x48d   :  { %v1271_v32 = vadd.f32 %v1270_v45, %v6690_v42  ;;  %v1272_v58 = vpop.f32.mrb[11].mxu0  ;;  %v1343_v56 = vpop.f32.mrb[11].mxu1  ;;  %v1342_v21 = vadd.f32 %v1341_v62, %v6693_v15 }
 0x48e   :  { %v1273_v0 = vadd.f32 %v1272_v58, %v6691_v3  ;;  %v1344_v29 = vadd.f32 %v1343_v56, %v6692_v59 }
 0x48f   :  { %v3228_v48 = vmul.f32 -1.442695, %v1271_v32 }
 0x490   :  { %v3229_v30 = vmul.f32 -1.442695, %v1273_v0  ;;  %v3230_v47 = vmul.f32 -1.442695, %v1344_v29 }
 0x491   :  { %4887 = vpow2.f32 %v3228_v48 }
 0x492   :  { %4889 = vpow2.f32 %v3229_v30 }
 0x493   :  { %4891 = vpow2.f32 %v3230_v47 }
 0x494   :  { %4893 = vtanh.f32 %v1342_v21 }
 0x49b   :  { %v4888_v4 = vpop.eup %4887 }
 0x49c   :  { %v4890_v24 = vpop.eup %4889  ;;  %v1349_v8 = vadd.f32 1.0, %v4888_v4 }
 0x49d   :  { %v1355_v6 = vadd.f32 1.0, %v4890_v24  ;;  %v4892_v45 = vpop.eup %4891 }
 0x49e   :  { %4895 = vrcp.f32 %v1349_v8  ;;  %v4894_v42 = vpop.eup %4893  ;;  %v1362_v48 = vadd.f32 1.0, %v4892_v45  ;;  %v1371_v8 = vld [vmem:[#allocation3 + $0x18] sm:$0xff] }
 0x49f   :  { %4897 = vrcp.f32 %v1355_v6 }
 0x4a0   :  { %4899 = vrcp.f32 %v1362_v48 }
 0x4a8   :  { %v4896_v58 = vpop.eup %4895 }
 0x4a9   :  { %v4898_v32 = vpop.eup %4897  ;;  %v1366_v0 = vmul.f32 %v4896_v58, %v4894_v42 }
 0x4aa   :  { %v1365_v30 = vmul.f32 %v4898_v32, %v5754_v14  ;;  %v4900_v32 = vpop.eup %4899 }
 0x4ac   :  { %v1438_v56 = vpop.f32.mrb[12].mxu0  ;;  %v1509_v29 = vpop.f32.mrb[12].mxu1  ;;  %v5866_v59 = vadd.f32 %v1366_v0, %v1365_v30 }
 0x4ad   :  { %v1440_v62 = vpop.f32.mrb[13].mxu0  ;;  %v1511_v4 = vpop.f32.mrb[13].mxu1 }
 0x4ae   :  { %v1518_v47 = vcombine.low %v1438_v56, %v1440_v62  ;;  %v1519_v21 = vcombine.low %v1509_v29, %v1511_v4  ;;  %4901 = vtanh.f32 %v5866_v59 }
 0x4b0   :  { %v1526_v6 = vrot.slane %v1518_v47, %v5518_v28  ;;  %v1533_v24 = vrot.slane %v1519_v21, %v5518_v28 }
 0x4b2   :  { %v1534_v42 = vcombine.low %v1526_v6, %v1533_v24 }
 0x4b4   :  { %v1536_v45 = vadd.f32 %v1534_v42, %v1371_v8 }
 0x4b6   :  { %v3231_v58 = vmul.f32 -1.442695, %v1536_v45  ;;  %v1544_v14 = vrot.slane %v1536_v45, 2  ;;  %v1555_v30 = vrot.slane %v1536_v45, 6  ;;  %v1552_v62 = vrot.slane %v1536_v45, 4 }
 0x4b8   :  { %v4902_v15 = vpop.eup %4901  ;;  %4903 = vpow2.f32 %v3231_v58  ;;  %v3232_v0 = vmul.f32 -1.442695, %v1544_v14  ;;  %v3233_v56 = vmul.f32 -1.442695, %v1555_v30  ;;  %v6695_v30 = vld [vmem:[#allocation13_spill] sm:$0xff] }
 0x4b9   :  { %v1369_v48 = vmul.f32 %v4902_v15, %v4900_v32 }
 0x4ba   :  { %4905 = vpow2.f32 %v3232_v0 }
 0x4bb   :  { %1632 = vmatprep.mubr.f32.mxu0 %v1369_v48  ;;  %1703 = vmatprep.mubr.f32.mxu1 %v1369_v48  ;;  %4907 = vpow2.f32 %v3233_v56  ;;  %v6696_v56 = vld [vmem:[#allocation14_spill] sm:$0xff] }
 0x4c2   :  { %v4904_v29 = vpop.eup %4903 }
 0x4c3   :  { %v1540_v4 = vadd.f32 1.0, %v4904_v29  ;;  %v6697_v29 = vld [vmem:[#allocation15_spill] sm:$0xff] }
 0x4c4   :  { %v4906_v47 = vpop.eup %4905 }
 0x4c5   :  { %4909 = vrcp.f32 %v1540_v4  ;;  %v1549_v21 = vadd.f32 1.0, %v4906_v47  ;;  %v4908_v6 = vpop.eup %4907  ;;  %v6699_v4 = vld [vmem:[#allocation17_spill] sm:$0xff]  ;;  %v6700_v47 = vld [vmem:[#allocation18_spill] sm:$0xff] }
 0x4c6   :  { %4911 = vtanh.f32 %v1552_v62  ;;  %v1560_v58 = vadd.f32 1.0, %v4908_v6  ;;  %v6698_v62 = vld [vmem:[#allocation16_spill] sm:$0xff] }
 0x4c7   :  { %4913 = vrcp.f32 %v1549_v21  ;;  %v6701_v21 = vld [vmem:[#allocation19_spill] sm:$0xff]  ;;  %v6702_v6 = vld [vmem:[#allocation20_spill] sm:$0xff] }
 0x4c8   :  { %4915 = vrcp.f32 %v1560_v58  ;;  %v6706_v58 = vld [vmem:[#allocation24_spill] sm:$0xff] }
 0x4cf   :  { %v4910_v24 = vpop.eup %4909 }
 0x4d0   :  { %v4912_v8 = vpop.eup %4911 }
 0x4d1   :  { %v4914_v42 = vpop.eup %4913  ;;  %v1564_v14 = vmul.f32 %v4912_v8, %v4910_v24  ;;  %v6703_v24 = vld [vmem:[#allocation21_spill] sm:$0xff]  ;;  %v6704_v8 = vld [vmem:[#allocation22_spill] sm:$0xff] }
 0x4d2   :  { %v1563_v15 = vmul.f32 %v4914_v42, %v5760_v61  ;;  %v4916_v45 = vpop.eup %4915  ;;  %v6694_v61 = vld [vmem:[#allocation12_spill] sm:$0xff]  ;;  %v6705_v42 = vld [vmem:[#allocation23_spill] sm:$0xff] }
 0x4d4   :  { %v5872_v32 = vadd.f32 %v1564_v14, %v1563_v15  ;;  %v6707_v15 = vld [vmem:[#allocation25_spill] sm:$0xff]  ;;  %v6708_v14 = vld [vmem:[#allocation26_spill] sm:$0xff] }
 0x4d6   :  { %4917 = vtanh.f32 %v5872_v32 }
 0x4e0   :  { %v4918_v0 = vpop.eup %4917 }
 0x4e1   :  { %v1567_v48 = vmul.f32 %v4918_v0, %v4916_v45  ;;  %v6709_v45 = vld [vmem:[#allocation27_spill] sm:$0xff]  ;;  %v6710_v0 = vld [vmem:[#allocation28_spill] sm:$0xff] }
 0x4e3   :  { %1633 = vmatmul.mubr.f32.vlgmr.msra.gmra.mrb[14].mxu0 %v1567_v48  ;;  %1704 = vmatmul.mubr.f32.vlgmr.msra.gmra.mrb[14].mxu1 %v1567_v48 }
 0x4e4   :  { %4033 = vmatpush1.bf16.msra.mxu0 %v5225_v9  ;;  %4065 = vmatpush1.bf16.msra.mxu1 %v5228_v13 }
 0x4e5   :  { %4035 = vmatprep.subr.bf16.mxu0 %v5232_v17  ;;  %4067 = vmatprep.subr.bf16.mxu1 %v5234_v18 }
 0x4e6   :  { %1800 = vmatprep.mubr.f32.mxu0 %v6519_v5  ;;  %1871 = vmatprep.mubr.f32.mxu1 %v6519_v5 }
 0x4e8   :  { %4037 = vmatpush1.bf16.msra.mxu0 %v5237_v22  ;;  %4069 = vmatpush1.bf16.msra.mxu1 %v5241_v26 }
 0x4e9   :  { %4039 = vmatprep.subr.bf16.mxu0 %v5243_v27  ;;  %4071 = vmatprep.subr.bf16.mxu1 %v5245_v31 }
 0x4ec   :  { %4041 = vmatpush1.bf16.msra.mxu0 %v5248_v35  ;;  %4073 = vmatpush1.bf16.msra.mxu1 %v5252_v39 }
 0x4ed   :  { %4043 = vmatprep.subr.bf16.mxu0 %v5254_v40  ;;  %4075 = vmatprep.subr.bf16.mxu1 %v5257_v44 }
 0x4f0   :  { %4045 = vmatpush1.bf16.msra.mxu0 %v5260_v51  ;;  %4077 = vmatpush1.bf16.msra.mxu1 %v5264_v52 }
 0x4f1   :  { %4047 = vmatprep.subr.bf16.mxu0 %v5266_v53  ;;  %4079 = vmatprep.subr.bf16.mxu1 %v5269_v57 }
 0x4f4   :  { %4049 = vmatpush1.bf16.msra.mxu0 %v5272_v63  ;;  %4081 = vmatpush1.bf16.msra.mxu1 %v5276_v1 }
 0x4f5   :  { %4051 = vmatprep.subr.bf16.mxu0 %v5278_v2  ;;  %4083 = vmatprep.subr.bf16.mxu1 %v5281_v7 }
 0x4f8   :  { %4053 = vmatpush1.bf16.msra.mxu0 %v5284_v16  ;;  %4085 = vmatpush1.bf16.msra.mxu1 %v5288_v19 }
 0x4f9   :  { %4055 = vmatprep.subr.bf16.mxu0 %v5290_v20  ;;  %4087 = vmatprep.subr.bf16.mxu1 %v5293_v25 }
 0x4fc   :  { %4057 = vmatpush1.bf16.msra.mxu0 %v5296_v34  ;;  %4089 = vmatpush1.bf16.msra.mxu1 %v5300_v36 }
 0x4fd   :  { %4059 = vmatprep.subr.bf16.mxu0 %v5302_v37  ;;  %4091 = vmatprep.subr.bf16.mxu1 %v5305_v43 }
 0x500   :  { %4061 = vmatpush1.bf16.msra.mxu0 %v5308_v50  ;;  %4093 = vmatpush1.bf16.msra.mxu1 %v5312_v54 }
 0x501   :  { %4095 = vmatprep.subr.bf16.mxu0 %v5314_v55  ;;  %4159 = vmatprep.subr.bf16.mxu1 %v5317_v60 }
 0x503   :  { %1801 = vmatmul.mubr.f32.vlgmr.msra.gmra.mrb[16].mxu0 %v1567_v48  ;;  %1872 = vmatmul.mubr.f32.vlgmr.msra.gmra.mrb[16].mxu1 %v1567_v48  ;;  %v6711_v48 = vld [vmem:[#allocation29_spill] sm:$0xff] }
 0x504   :  { %4097 = vmatpush1.bf16.msra.mxu0 %v5320_v10  ;;  %4161 = vmatpush1.bf16.msra.mxu1 %v5324_v11 }
 0x505   :  { %4099 = vmatprep.subr.bf16.mxu0 %v5326_v12  ;;  %4163 = vmatprep.subr.bf16.mxu1 %v5329_v23 }
 0x508   :  { %4101 = vmatpush1.bf16.msra.mxu0 %v5334_v33  ;;  %4165 = vmatpush1.bf16.msra.mxu1 %v5338_v38 }
 0x509   :  { %4103 = vmatprep.subr.bf16.mxu0 %v5340_v41  ;;  %4167 = vmatprep.subr.bf16.mxu1 %v5343_v46 }
 0x50c   :  { %4105 = vmatpush1.bf16.msra.mxu0 %v5348_v49  ;;  %4169 = vmatpush1.bf16.msra.mxu1 %v6694_v61 }
 0x50d   :  { %4107 = vmatprep.subr.bf16.mxu0 %v6695_v30  ;;  %4171 = vmatprep.subr.bf16.mxu1 %v6696_v56 }
 0x510   :  { %4109 = vmatpush1.bf16.msra.mxu0 %v6697_v29  ;;  %4173 = vmatpush1.bf16.msra.mxu1 %v6698_v62 }
 0x511   :  { %4111 = vmatprep.subr.bf16.mxu0 %v6699_v4  ;;  %4175 = vmatprep.subr.bf16.mxu1 %v6700_v47  ;;  %v6749_v47 = vld [vmem:[#allocation65_spill] sm:$0xff] }
 0x514   :  { %4113 = vmatpush1.bf16.msra.mxu0 %v6701_v21  ;;  %4177 = vmatpush1.bf16.msra.mxu1 %v6702_v6  ;;  %v6712_v21 = vld [vmem:[#allocation30_spill] sm:$0xff]  ;;  %v6713_v6 = vld [vmem:[#allocation31_spill] sm:$0xff] }
 0x515   :  { %4115 = vmatprep.subr.bf16.mxu0 %v6703_v24  ;;  %4179 = vmatprep.subr.bf16.mxu1 %v6704_v8  ;;  %v6714_v24 = vld [vmem:[#allocation32_spill] sm:$0xff]  ;;  %v6715_v8 = vld [vmem:[#allocation33_spill] sm:$0xff] }
 0x518   :  { %4117 = vmatpush1.bf16.msra.mxu0 %v6705_v42  ;;  %4181 = vmatpush1.bf16.msra.mxu1 %v6706_v58  ;;  %v6716_v42 = vld [vmem:[#allocation34_spill] sm:$0xff]  ;;  %v6717_v58 = vld [vmem:[#allocation35_spill] sm:$0xff] }
 0x519   :  { %4119 = vmatprep.subr.bf16.mxu0 %v6707_v15  ;;  %4183 = vmatprep.subr.bf16.mxu1 %v6708_v14  ;;  %v6718_v15 = vld [vmem:[#allocation36_spill] sm:$0xff]  ;;  %v6719_v14 = vld [vmem:[#allocation37_spill] sm:$0xff] }
 0x51c   :  { %4121 = vmatpush1.bf16.msra.mxu0 %v6709_v45  ;;  %4185 = vmatpush1.bf16.msra.mxu1 %v6710_v0  ;;  %v6720_v45 = vld [vmem:[#allocation38_spill] sm:$0xff]  ;;  %v6721_v0 = vld [vmem:[#allocation39_spill] sm:$0xff] }
 0x51d   :  { %4123 = vmatprep.subr.bf16.mxu0 %v6711_v48  ;;  %4187 = vmatprep.subr.bf16.mxu1 %v6712_v21  ;;  %v6722_v48 = vld [vmem:[#allocation40_spill] sm:$0xff]  ;;  %v6723_v21 = vld [vmem:[#allocation41_spill] sm:$0xff] }
 0x520   :  { %4125 = vmatpush1.bf16.msra.mxu0 %v6713_v6  ;;  %4189 = vmatpush1.bf16.msra.mxu1 %v6714_v24  ;;  %v6724_v6 = vld [vmem:[#allocation42_spill] sm:$0xff]  ;;  %v6725_v24 = vld [vmem:[#allocation43_spill] sm:$0xff] }
 0x521   :  { %4127 = vmatprep.subr.bf16.mxu0 %v6715_v8  ;;  %4191 = vmatprep.subr.bf16.mxu1 %v6716_v42  ;;  %v6726_v8 = vld [vmem:[#allocation44_spill] sm:$0xff]  ;;  %v6727_v42 = vld [vmem:[#allocation45_spill] sm:$0xff] }
 0x524   :  { %4129 = vmatpush1.bf16.msra.mxu0 %v6717_v58  ;;  %4193 = vmatpush1.bf16.msra.mxu1 %v6718_v15  ;;  %v6728_v58 = vld [vmem:[#allocation46_spill] sm:$0xff]  ;;  %v6729_v15 = vld [vmem:[#allocation47_spill] sm:$0xff] }
 0x525   :  { %4131 = vmatprep.subr.bf16.mxu0 %v6719_v14  ;;  %4195 = vmatprep.subr.bf16.mxu1 %v6720_v45  ;;  %v6730_v14 = vld [vmem:[#allocation48_spill] sm:$0xff]  ;;  %v6731_v45 = vld [vmem:[#allocation49_spill] sm:$0xff] }
 0x528   :  { %4133 = vmatpush1.bf16.msra.mxu0 %v6721_v0  ;;  %4197 = vmatpush1.bf16.msra.mxu1 %v6722_v48  ;;  %v6732_v0 = vld [vmem:[#allocation50_spill] sm:$0xff]  ;;  %v6733_v48 = vld [vmem:[#allocation51_spill] sm:$0xff] }
 0x529   :  { %4135 = vmatprep.subr.bf16.mxu0 %v6723_v21  ;;  %4199 = vmatprep.subr.bf16.mxu1 %v6724_v6  ;;  %v6734_v21 = vld [vmem:[#allocation52_spill] sm:$0xff]  ;;  %v6735_v6 = vld [vmem:[#allocation53_spill] sm:$0xff] }
 0x52c   :  { %4137 = vmatpush1.bf16.msra.mxu0 %v6725_v24  ;;  %4201 = vmatpush1.bf16.msra.mxu1 %v6726_v8  ;;  %v6736_v24 = vld [vmem:[#allocation54_spill] sm:$0xff]  ;;  %v6737_v8 = vld [vmem:[#allocation55_spill] sm:$0xff] }
 0x52d   :  { %4139 = vmatprep.subr.bf16.mxu0 %v6727_v42  ;;  %4203 = vmatprep.subr.bf16.mxu1 %v6728_v58  ;;  %v6738_v42 = vld [vmem:[#allocation56_spill] sm:$0xff]  ;;  %v6739_v58 = vld [vmem:[#allocation57_spill] sm:$0xff] }
 0x530   :  { %4141 = vmatpush1.bf16.msra.mxu0 %v6729_v15  ;;  %4205 = vmatpush1.bf16.msra.mxu1 %v6730_v14  ;;  %v6740_v15 = vld [vmem:[#allocation58_spill] sm:$0xff]  ;;  %v6741_v14 = vld [vmem:[#allocation59_spill] sm:$0xff] }
 0x531   :  { %4143 = vmatprep.subr.bf16.mxu0 %v6731_v45  ;;  %4207 = vmatprep.subr.bf16.mxu1 %v6732_v0  ;;  %v6742_v45 = vld [vmem:[#allocation60_spill] sm:$0xff]  ;;  %v6743_v0 = vld [vmem:[#allocation61_spill] sm:$0xff] }
 0x534   :  { %4145 = vmatpush1.bf16.msra.mxu0 %v6733_v48  ;;  %4209 = vmatpush1.bf16.msra.mxu1 %v6734_v21  ;;  %v6744_v48 = vld [vmem:[#allocation62_spill] sm:$0xff]  ;;  %v6745_v21 = vld [vmem:[#allocation63_spill] sm:$0xff] }
 0x535   :  { %4147 = vmatprep.subr.bf16.mxu0 %v6735_v6  ;;  %4211 = vmatprep.subr.bf16.mxu1 %v6736_v24  ;;  %v6746_v6 = vld [vmem:[#allocation64_spill] sm:$0xff]  ;;  %v6747_v24 = vld [vmem:[#allocation10_spill] sm:$0xff] }
 0x538   :  { %4149 = vmatpush1.bf16.msra.mxu0 %v6737_v8  ;;  %4213 = vmatpush1.bf16.msra.mxu1 %v6738_v42  ;;  %v6748_v8 = vld [vmem:[#allocation11_spill] sm:$0xff] }
 0x539   :  { %4151 = vmatprep.subr.bf16.mxu0 %v6739_v58  ;;  %4215 = vmatprep.subr.bf16.mxu1 %v6740_v15 }
 0x53c   :  { %4153 = vmatpush1.bf16.msra.mxu0 %v6741_v14  ;;  %4217 = vmatpush1.bf16.msra.mxu1 %v6742_v45 }
 0x53d   :  { %4155 = vmatprep.subr.bf16.mxu0 %v6743_v0  ;;  %4219 = vmatprep.subr.bf16.mxu1 %v6744_v48  ;;  %v6750_v48 = vld [vmem:[#allocation67_spill] sm:$0xff] }
 0x540   :  { %4157 = vmatpush1.bf16.msra.mxu0 %v6745_v21  ;;  %4221 = vmatpush1.bf16.msra.mxu1 %v6746_v6  ;;  %v6751_v6 = vld [vmem:[#allocation68_spill] sm:$0xff] }
 0x541   :  { %4223 = vmatprep.subr.bf16.mxu0 %v6747_v24  ;;  %4255 = vmatprep.subr.bf16.mxu1 %v6748_v8 }
 0x5b6   :  { %v1634_v42 = vpop.f32.mrb[14].mxu0  ;;  %v1705_v58 = vpop.f32.mrb[14].mxu1 }
 0x5b7   :  { %v1635_v15 = vadd.f32 %v1634_v42, %v6749_v47  ;;  %v1636_v4 = vpop.f32.mrb[15].mxu0  ;;  %v1707_v14 = vpop.f32.mrb[15].mxu1  ;;  %v1706_v56 = vadd.f32 %v1705_v58, %v6751_v6 }
 0x5b8   :  { %v1637_v45 = vadd.f32 %v1636_v4, %v6691_v3  ;;  %v1708_v21 = vadd.f32 %v1707_v14, %v6750_v48 }
 0x5b9   :  { %v3234_v62 = vmul.f32 -1.442695, %v1635_v15 }
 0x5ba   :  { %v3235_v0 = vmul.f32 -1.442695, %v1637_v45  ;;  %v3236_v29 = vmul.f32 -1.442695, %v1708_v21 }
 0x5bb   :  { %4919 = vpow2.f32 %v3234_v62 }
 0x5bc   :  { %4921 = vpow2.f32 %v3235_v0 }
 0x5bd   :  { %4923 = vpow2.f32 %v3236_v29 }
 0x5be   :  { %4925 = vtanh.f32 %v1706_v56 }
 0x5c5   :  { %v4920_v24 = vpop.eup %4919 }
 0x5c6   :  { %v4922_v30 = vpop.eup %4921  ;;  %v1713_v8 = vadd.f32 1.0, %v4920_v24 }
 0x5c7   :  { %v1719_v61 = vadd.f32 1.0, %v4922_v30  ;;  %v4924_v42 = vpop.eup %4923 }
 0x5c8   :  { %4927 = vrcp.f32 %v1713_v8  ;;  %v4926_v47 = vpop.eup %4925  ;;  %v1726_v62 = vadd.f32 1.0, %v4924_v42  ;;  %v1735_v8 = vld [vmem:[#allocation3 + $0x20] sm:$0xff] }
 0x5c9   :  { %4929 = vrcp.f32 %v1719_v61 }
 0x5ca   :  { %4931 = vrcp.f32 %v1726_v62 }
 0x5d2   :  { %v4928_v4 = vpop.eup %4927 }
 0x5d3   :  { %v4930_v15 = vpop.eup %4929  ;;  %v1730_v45 = vmul.f32 %v4928_v4, %v4926_v47 }
 0x5d4   :  { %v1729_v0 = vmul.f32 %v4930_v15, %v5866_v59  ;;  %v4932_v15 = vpop.eup %4931 }
 0x5d6   :  { %v1802_v14 = vpop.f32.mrb[16].mxu0  ;;  %v1873_v21 = vpop.f32.mrb[16].mxu1  ;;  %v5978_v48 = vadd.f32 %v1730_v45, %v1729_v0 }
 0x5d7   :  { %v1804_v58 = vpop.f32.mrb[17].mxu0  ;;  %v1875_v24 = vpop.f32.mrb[17].mxu1 }
 0x5d8   :  { %v1882_v29 = vcombine.low %v1802_v14, %v1804_v58  ;;  %v1883_v56 = vcombine.low %v1873_v21, %v1875_v24  ;;  %4933 = vtanh.f32 %v5978_v48 }
 0x5da   :  { %v1890_v61 = vrot.slane %v1882_v29, %v5518_v28  ;;  %v1897_v30 = vrot.slane %v1883_v56, %v5518_v28 }
 0x5dc   :  { %v1898_v47 = vcombine.low %v1890_v61, %v1897_v30 }
 0x5de   :  { %v1900_v42 = vadd.f32 %v1898_v47, %v1735_v8 }
 0x5e0   :  { %v3237_v4 = vmul.f32 -1.442695, %v1900_v42  ;;  %v1908_v59 = vrot.slane %v1900_v42, 2  ;;  %v1919_v0 = vrot.slane %v1900_v42, 6  ;;  %v1916_v58 = vrot.slane %v1900_v42, 4 }
 0x5e2   :  { %v4934_v6 = vpop.eup %4933  ;;  %4935 = vpow2.f32 %v3237_v4  ;;  %v3238_v45 = vmul.f32 -1.442695, %v1908_v59  ;;  %v3239_v14 = vmul.f32 -1.442695, %v1919_v0  ;;  %v6753_v0 = vld [vmem:[#allocation13_spill] sm:$0xff] }
 0x5e3   :  { %v1733_v62 = vmul.f32 %v4934_v6, %v4932_v15 }
 0x5e4   :  { %4937 = vpow2.f32 %v3238_v45 }
 0x5e5   :  { %1996 = vmatprep.mubr.f32.mxu0 %v1733_v62  ;;  %2067 = vmatprep.mubr.f32.mxu1 %v1733_v62  ;;  %4939 = vpow2.f32 %v3239_v14  ;;  %v6754_v14 = vld [vmem:[#allocation14_spill] sm:$0xff] }
 0x5ec   :  { %v4936_v21 = vpop.eup %4935 }
 0x5ed   :  { %v1904_v24 = vadd.f32 1.0, %v4936_v21  ;;  %v6755_v21 = vld [vmem:[#allocation15_spill] sm:$0xff] }
 0x5ee   :  { %v4938_v29 = vpop.eup %4937 }
 0x5ef   :  { %4941 = vrcp.f32 %v1904_v24  ;;  %v1913_v56 = vadd.f32 1.0, %v4938_v29  ;;  %v4940_v61 = vpop.eup %4939  ;;  %v6757_v24 = vld [vmem:[#allocation17_spill] sm:$0xff]  ;;  %v6758_v29 = vld [vmem:[#allocation18_spill] sm:$0xff] }
 0x5f0   :  { %4943 = vtanh.f32 %v1916_v58  ;;  %v1924_v4 = vadd.f32 1.0, %v4940_v61  ;;  %v6756_v58 = vld [vmem:[#allocation16_spill] sm:$0xff] }
 0x5f1   :  { %4945 = vrcp.f32 %v1913_v56  ;;  %v6759_v56 = vld [vmem:[#allocation19_spill] sm:$0xff]  ;;  %v6760_v61 = vld [vmem:[#allocation20_spill] sm:$0xff] }
 0x5f2   :  { %4947 = vrcp.f32 %v1924_v4  ;;  %v6764_v4 = vld [vmem:[#allocation24_spill] sm:$0xff] }
 0x5f9   :  { %v4942_v30 = vpop.eup %4941 }
 0x5fa   :  { %v4944_v8 = vpop.eup %4943 }
 0x5fb   :  { %v4946_v47 = vpop.eup %4945  ;;  %v1928_v59 = vmul.f32 %v4944_v8, %v4942_v30  ;;  %v6761_v30 = vld [vmem:[#allocation21_spill] sm:$0xff]  ;;  %v6762_v8 = vld [vmem:[#allocation22_spill] sm:$0xff] }
 0x5fc   :  { %v1927_v6 = vmul.f32 %v4946_v47, %v5872_v32  ;;  %v4948_v42 = vpop.eup %4947  ;;  %v6752_v32 = vld [vmem:[#allocation12_spill] sm:$0xff]  ;;  %v6763_v47 = vld [vmem:[#allocation23_spill] sm:$0xff] }
 0x5fe   :  { %v5984_v15 = vadd.f32 %v1928_v59, %v1927_v6  ;;  %v6765_v6 = vld [vmem:[#allocation25_spill] sm:$0xff]  ;;  %v6766_v59 = vld [vmem:[#allocation26_spill] sm:$0xff] }
 0x600   :  { %4949 = vtanh.f32 %v5984_v15 }
 0x60a   :  { %v4950_v45 = vpop.eup %4949 }
 0x60b   :  { %v1931_v62 = vmul.f32 %v4950_v45, %v4948_v42  ;;  %v6767_v42 = vld [vmem:[#allocation27_spill] sm:$0xff]  ;;  %v6768_v45 = vld [vmem:[#allocation28_spill] sm:$0xff] }
 0x60d   :  { %1997 = vmatmul.mubr.f32.vlgmr.msra.gmra.mrb[18].mxu0 %v1931_v62  ;;  %2068 = vmatmul.mubr.f32.vlgmr.msra.gmra.mrb[18].mxu1 %v1931_v62 }
 0x60e   :  { %4225 = vmatpush1.bf16.msra.mxu0 %v5225_v9  ;;  %4257 = vmatpush1.bf16.msra.mxu1 %v5228_v13 }
 0x60f   :  { %4227 = vmatprep.subr.bf16.mxu0 %v5232_v17  ;;  %4259 = vmatprep.subr.bf16.mxu1 %v5234_v18 }
 0x610   :  { %2164 = vmatprep.mubr.f32.mxu0 %v6519_v5  ;;  %2235 = vmatprep.mubr.f32.mxu1 %v6519_v5 }
 0x612   :  { %4229 = vmatpush1.bf16.msra.mxu0 %v5237_v22  ;;  %4261 = vmatpush1.bf16.msra.mxu1 %v5241_v26 }
 0x613   :  { %4231 = vmatprep.subr.bf16.mxu0 %v5243_v27  ;;  %4263 = vmatprep.subr.bf16.mxu1 %v5245_v31 }
 0x616   :  { %4233 = vmatpush1.bf16.msra.mxu0 %v5248_v35  ;;  %4265 = vmatpush1.bf16.msra.mxu1 %v5252_v39 }
 0x617   :  { %4235 = vmatprep.subr.bf16.mxu0 %v5254_v40  ;;  %4267 = vmatprep.subr.bf16.mxu1 %v5257_v44 }
 0x61a   :  { %4237 = vmatpush1.bf16.msra.mxu0 %v5260_v51  ;;  %4269 = vmatpush1.bf16.msra.mxu1 %v5264_v52 }
 0x61b   :  { %4239 = vmatprep.subr.bf16.mxu0 %v5266_v53  ;;  %4271 = vmatprep.subr.bf16.mxu1 %v5269_v57 }
 0x61e   :  { %4241 = vmatpush1.bf16.msra.mxu0 %v5272_v63  ;;  %4273 = vmatpush1.bf16.msra.mxu1 %v5276_v1 }
 0x61f   :  { %4243 = vmatprep.subr.bf16.mxu0 %v5278_v2  ;;  %4275 = vmatprep.subr.bf16.mxu1 %v5281_v7 }
 0x622   :  { %4245 = vmatpush1.bf16.msra.mxu0 %v5284_v16  ;;  %4277 = vmatpush1.bf16.msra.mxu1 %v5288_v19 }
 0x623   :  { %4247 = vmatprep.subr.bf16.mxu0 %v5290_v20  ;;  %4279 = vmatprep.subr.bf16.mxu1 %v5293_v25 }
 0x626   :  { %4249 = vmatpush1.bf16.msra.mxu0 %v5296_v34  ;;  %4281 = vmatpush1.bf16.msra.mxu1 %v5300_v36 }
 0x627   :  { %4251 = vmatprep.subr.bf16.mxu0 %v5302_v37  ;;  %4283 = vmatprep.subr.bf16.mxu1 %v5305_v43 }
 0x62a   :  { %4253 = vmatpush1.bf16.msra.mxu0 %v5308_v50  ;;  %4285 = vmatpush1.bf16.msra.mxu1 %v5312_v54 }
 0x62b   :  { %4287 = vmatprep.subr.bf16.mxu0 %v5314_v55  ;;  %4351 = vmatprep.subr.bf16.mxu1 %v5317_v60 }
 0x62d   :  { %2165 = vmatmul.mubr.f32.vlgmr.msra.gmra.mrb[20].mxu0 %v1931_v62  ;;  %2236 = vmatmul.mubr.f32.vlgmr.msra.gmra.mrb[20].mxu1 %v1931_v62  ;;  %v6769_v62 = vld [vmem:[#allocation29_spill] sm:$0xff] }
 0x62e   :  { %4289 = vmatpush1.bf16.msra.mxu0 %v5320_v10  ;;  %4353 = vmatpush1.bf16.msra.mxu1 %v5324_v11 }
 0x62f   :  { %4291 = vmatprep.subr.bf16.mxu0 %v5326_v12  ;;  %4355 = vmatprep.subr.bf16.mxu1 %v5329_v23 }
 0x632   :  { %4293 = vmatpush1.bf16.msra.mxu0 %v5334_v33  ;;  %4357 = vmatpush1.bf16.msra.mxu1 %v5338_v38 }
 0x633   :  { %4295 = vmatprep.subr.bf16.mxu0 %v5340_v41  ;;  %4359 = vmatprep.subr.bf16.mxu1 %v5343_v46 }
 0x636   :  { %4297 = vmatpush1.bf16.msra.mxu0 %v5348_v49  ;;  %4361 = vmatpush1.bf16.msra.mxu1 %v6752_v32 }
 0x637   :  { %4299 = vmatprep.subr.bf16.mxu0 %v6753_v0  ;;  %4363 = vmatprep.subr.bf16.mxu1 %v6754_v14 }
 0x63a   :  { %4301 = vmatpush1.bf16.msra.mxu0 %v6755_v21  ;;  %4365 = vmatpush1.bf16.msra.mxu1 %v6756_v58 }
 0x63b   :  { %4303 = vmatprep.subr.bf16.mxu0 %v6757_v24  ;;  %4367 = vmatprep.subr.bf16.mxu1 %v6758_v29  ;;  %v6807_v29 = vld [vmem:[#allocation65_spill] sm:$0xff] }
 0x63e   :  { %4305 = vmatpush1.bf16.msra.mxu0 %v6759_v56  ;;  %4369 = vmatpush1.bf16.msra.mxu1 %v6760_v61  ;;  %v6770_v56 = vld [vmem:[#allocation30_spill] sm:$0xff]  ;;  %v6771_v61 = vld [vmem:[#allocation31_spill] sm:$0xff] }
 0x63f   :  { %4307 = vmatprep.subr.bf16.mxu0 %v6761_v30  ;;  %4371 = vmatprep.subr.bf16.mxu1 %v6762_v8  ;;  %v6772_v30 = vld [vmem:[#allocation32_spill] sm:$0xff]  ;;  %v6773_v8 = vld [vmem:[#allocation33_spill] sm:$0xff] }
 0x642   :  { %4309 = vmatpush1.bf16.msra.mxu0 %v6763_v47  ;;  %4373 = vmatpush1.bf16.msra.mxu1 %v6764_v4  ;;  %v6774_v47 = vld [vmem:[#allocation34_spill] sm:$0xff]  ;;  %v6775_v4 = vld [vmem:[#allocation35_spill] sm:$0xff] }
 0x643   :  { %4311 = vmatprep.subr.bf16.mxu0 %v6765_v6  ;;  %4375 = vmatprep.subr.bf16.mxu1 %v6766_v59  ;;  %v6776_v6 = vld [vmem:[#allocation36_spill] sm:$0xff]  ;;  %v6777_v59 = vld [vmem:[#allocation37_spill] sm:$0xff] }
 0x646   :  { %4313 = vmatpush1.bf16.msra.mxu0 %v6767_v42  ;;  %4377 = vmatpush1.bf16.msra.mxu1 %v6768_v45  ;;  %v6778_v42 = vld [vmem:[#allocation38_spill] sm:$0xff]  ;;  %v6779_v45 = vld [vmem:[#allocation39_spill] sm:$0xff] }
 0x647   :  { %4315 = vmatprep.subr.bf16.mxu0 %v6769_v62  ;;  %4379 = vmatprep.subr.bf16.mxu1 %v6770_v56  ;;  %v6780_v62 = vld [vmem:[#allocation40_spill] sm:$0xff]  ;;  %v6781_v56 = vld [vmem:[#allocation41_spill] sm:$0xff] }
 0x64a   :  { %4317 = vmatpush1.bf16.msra.mxu0 %v6771_v61  ;;  %4381 = vmatpush1.bf16.msra.mxu1 %v6772_v30  ;;  %v6782_v61 = vld [vmem:[#allocation42_spill] sm:$0xff]  ;;  %v6783_v30 = vld [vmem:[#allocation43_spill] sm:$0xff] }
 0x64b   :  { %4319 = vmatprep.subr.bf16.mxu0 %v6773_v8  ;;  %4383 = vmatprep.subr.bf16.mxu1 %v6774_v47  ;;  %v6784_v8 = vld [vmem:[#allocation44_spill] sm:$0xff]  ;;  %v6785_v47 = vld [vmem:[#allocation45_spill] sm:$0xff] }
 0x64e   :  { %4321 = vmatpush1.bf16.msra.mxu0 %v6775_v4  ;;  %4385 = vmatpush1.bf16.msra.mxu1 %v6776_v6  ;;  %v6786_v4 = vld [vmem:[#allocation46_spill] sm:$0xff]  ;;  %v6787_v6 = vld [vmem:[#allocation47_spill] sm:$0xff] }
 0x64f   :  { %4323 = vmatprep.subr.bf16.mxu0 %v6777_v59  ;;  %4387 = vmatprep.subr.bf16.mxu1 %v6778_v42  ;;  %v6788_v59 = vld [vmem:[#allocation48_spill] sm:$0xff]  ;;  %v6789_v42 = vld [vmem:[#allocation49_spill] sm:$0xff] }
 0x652   :  { %4325 = vmatpush1.bf16.msra.mxu0 %v6779_v45  ;;  %4389 = vmatpush1.bf16.msra.mxu1 %v6780_v62  ;;  %v6790_v45 = vld [vmem:[#allocation50_spill] sm:$0xff]  ;;  %v6791_v62 = vld [vmem:[#allocation51_spill] sm:$0xff] }
 0x653   :  { %4327 = vmatprep.subr.bf16.mxu0 %v6781_v56  ;;  %4391 = vmatprep.subr.bf16.mxu1 %v6782_v61  ;;  %v6792_v56 = vld [vmem:[#allocation52_spill] sm:$0xff]  ;;  %v6793_v61 = vld [vmem:[#allocation53_spill] sm:$0xff] }
 0x656   :  { %4329 = vmatpush1.bf16.msra.mxu0 %v6783_v30  ;;  %4393 = vmatpush1.bf16.msra.mxu1 %v6784_v8  ;;  %v6794_v30 = vld [vmem:[#allocation54_spill] sm:$0xff]  ;;  %v6795_v8 = vld [vmem:[#allocation55_spill] sm:$0xff] }
 0x657   :  { %4331 = vmatprep.subr.bf16.mxu0 %v6785_v47  ;;  %4395 = vmatprep.subr.bf16.mxu1 %v6786_v4  ;;  %v6796_v47 = vld [vmem:[#allocation56_spill] sm:$0xff]  ;;  %v6797_v4 = vld [vmem:[#allocation57_spill] sm:$0xff] }
 0x65a   :  { %4333 = vmatpush1.bf16.msra.mxu0 %v6787_v6  ;;  %4397 = vmatpush1.bf16.msra.mxu1 %v6788_v59  ;;  %v6798_v6 = vld [vmem:[#allocation58_spill] sm:$0xff]  ;;  %v6799_v59 = vld [vmem:[#allocation59_spill] sm:$0xff] }
 0x65b   :  { %4335 = vmatprep.subr.bf16.mxu0 %v6789_v42  ;;  %4399 = vmatprep.subr.bf16.mxu1 %v6790_v45  ;;  %v6800_v42 = vld [vmem:[#allocation60_spill] sm:$0xff]  ;;  %v6801_v45 = vld [vmem:[#allocation61_spill] sm:$0xff] }
 0x65e   :  { %4337 = vmatpush1.bf16.msra.mxu0 %v6791_v62  ;;  %4401 = vmatpush1.bf16.msra.mxu1 %v6792_v56  ;;  %v6802_v62 = vld [vmem:[#allocation62_spill] sm:$0xff]  ;;  %v6803_v56 = vld [vmem:[#allocation63_spill] sm:$0xff] }
 0x65f   :  { %4339 = vmatprep.subr.bf16.mxu0 %v6793_v61  ;;  %4403 = vmatprep.subr.bf16.mxu1 %v6794_v30  ;;  %v6804_v61 = vld [vmem:[#allocation64_spill] sm:$0xff]  ;;  %v6805_v30 = vld [vmem:[#allocation10_spill] sm:$0xff] }
 0x662   :  { %4341 = vmatpush1.bf16.msra.mxu0 %v6795_v8  ;;  %4405 = vmatpush1.bf16.msra.mxu1 %v6796_v47  ;;  %v6806_v8 = vld [vmem:[#allocation11_spill] sm:$0xff] }
 0x663   :  { %4343 = vmatprep.subr.bf16.mxu0 %v6797_v4  ;;  %4407 = vmatprep.subr.bf16.mxu1 %v6798_v6 }
 0x666   :  { %4345 = vmatpush1.bf16.msra.mxu0 %v6799_v59  ;;  %4409 = vmatpush1.bf16.msra.mxu1 %v6800_v42 }
 0x667   :  { %4347 = vmatprep.subr.bf16.mxu0 %v6801_v45  ;;  %4411 = vmatprep.subr.bf16.mxu1 %v6802_v62  ;;  %v6808_v62 = vld [vmem:[#allocation67_spill] sm:$0xff] }
 0x66a   :  { %4349 = vmatpush1.bf16.msra.mxu0 %v6803_v56  ;;  %4413 = vmatpush1.bf16.msra.mxu1 %v6804_v61  ;;  %v6809_v61 = vld [vmem:[#allocation68_spill] sm:$0xff] }
 0x66b   :  { %4415 = vmatprep.subr.bf16.mxu0 %v6805_v30  ;;  %4447 = vmatprep.subr.bf16.mxu1 %v6806_v8 }
 0x6e0   :  { %v1998_v47 = vpop.f32.mrb[18].mxu0  ;;  %v2069_v4 = vpop.f32.mrb[18].mxu1 }
 0x6e1   :  { %v1999_v6 = vadd.f32 %v1998_v47, %v6807_v29  ;;  %v2000_v24 = vpop.f32.mrb[19].mxu0  ;;  %v2071_v59 = vpop.f32.mrb[19].mxu1  ;;  %v2070_v14 = vadd.f32 %v2069_v4, %v6809_v61 }
 0x6e2   :  { %v2001_v42 = vadd.f32 %v2000_v24, %v6691_v3  ;;  %v2072_v56 = vadd.f32 %v2071_v59, %v6808_v62 }
 0x6e3   :  { %v3240_v58 = vmul.f32 -1.442695, %v1999_v6 }
 0x6e4   :  { %v3241_v45 = vmul.f32 -1.442695, %v2001_v42  ;;  %v3242_v21 = vmul.f32 -1.442695, %v2072_v56 }
 0x6e5   :  { %4951 = vpow2.f32 %v3240_v58 }
 0x6e6   :  { %4953 = vpow2.f32 %v3241_v45 }
 0x6e7   :  { %4955 = vpow2.f32 %v3242_v21 }
 0x6e8   :  { %4957 = vtanh.f32 %v2070_v14 }
 0x6ef   :  { %v4952_v30 = vpop.eup %4951 }
 0x6f0   :  { %v4954_v0 = vpop.eup %4953  ;;  %v2077_v8 = vadd.f32 1.0, %v4952_v30 }
 0x6f1   :  { %v2083_v32 = vadd.f32 1.0, %v4954_v0  ;;  %v4956_v47 = vpop.eup %4955 }
 0x6f2   :  { %4959 = vrcp.f32 %v2077_v8  ;;  %v4958_v29 = vpop.eup %4957  ;;  %v2090_v58 = vadd.f32 1.0, %v4956_v47  ;;  %v2099_v8 = vld [vmem:[#allocation3 + $0x28] sm:$0xff] }
 0x6f3   :  { %4961 = vrcp.f32 %v2083_v32 }
 0x6f4   :  { %4963 = vrcp.f32 %v2090_v58 }
 0x6fc   :  { %v4960_v24 = vpop.eup %4959 }
 0x6fd   :  { %v4962_v6 = vpop.eup %4961  ;;  %v2094_v42 = vmul.f32 %v4960_v24, %v4958_v29 }
 0x6fe   :  { %v2093_v45 = vmul.f32 %v4962_v6, %v5978_v48  ;;  %v4964_v6 = vpop.eup %4963 }
 0x700   :  { %v2166_v59 = vpop.f32.mrb[20].mxu0  ;;  %v2237_v56 = vpop.f32.mrb[20].mxu1  ;;  %v6090_v62 = vadd.f32 %v2094_v42, %v2093_v45 }
 0x701   :  { %v2168_v4 = vpop.f32.mrb[21].mxu0  ;;  %v2239_v30 = vpop.f32.mrb[21].mxu1 }
 0x702   :  { %v2246_v21 = vcombine.low %v2166_v59, %v2168_v4  ;;  %v2247_v14 = vcombine.low %v2237_v56, %v2239_v30  ;;  %4965 = vtanh.f32 %v6090_v62 }
 0x704   :  { %v2254_v32 = vrot.slane %v2246_v21, %v5518_v28  ;;  %v2261_v0 = vrot.slane %v2247_v14, %v5518_v28 }
 0x706   :  { %v2262_v29 = vcombine.low %v2254_v32, %v2261_v0 }
 0x708   :  { %v2264_v47 = vadd.f32 %v2262_v29, %v2099_v8 }
 0x70a   :  { %v3243_v24 = vmul.f32 -1.442695, %v2264_v47  ;;  %v2272_v48 = vrot.slane %v2264_v47, 2  ;;  %v2283_v45 = vrot.slane %v2264_v47, 6  ;;  %v2280_v4 = vrot.slane %v2264_v47, 4 }
 0x70c   :  { %v4966_v61 = vpop.eup %4965  ;;  %4967 = vpow2.f32 %v3243_v24  ;;  %v3244_v42 = vmul.f32 -1.442695, %v2272_v48  ;;  %v3245_v59 = vmul.f32 -1.442695, %v2283_v45  ;;  %v6811_v45 = vld [vmem:[#allocation13_spill] sm:$0xff] }
 0x70d   :  { %v2097_v58 = vmul.f32 %v4966_v61, %v4964_v6 }
 0x70e   :  { %4969 = vpow2.f32 %v3244_v42 }
 0x70f   :  { %2360 = vmatprep.mubr.f32.mxu0 %v2097_v58  ;;  %2431 = vmatprep.mubr.f32.mxu1 %v2097_v58  ;;  %4971 = vpow2.f32 %v3245_v59  ;;  %v6812_v59 = vld [vmem:[#allocation14_spill] sm:$0xff] }
 0x716   :  { %v4968_v56 = vpop.eup %4967 }
 0x717   :  { %v2268_v30 = vadd.f32 1.0, %v4968_v56  ;;  %v6813_v56 = vld [vmem:[#allocation15_spill] sm:$0xff] }
 0x718   :  { %v4970_v21 = vpop.eup %4969 }
 0x719   :  { %4973 = vrcp.f32 %v2268_v30  ;;  %v2277_v14 = vadd.f32 1.0, %v4970_v21  ;;  %v4972_v32 = vpop.eup %4971  ;;  %v6815_v30 = vld [vmem:[#allocation17_spill] sm:$0xff]  ;;  %v6816_v21 = vld [vmem:[#allocation18_spill] sm:$0xff] }
 0x71a   :  { %4975 = vtanh.f32 %v2280_v4  ;;  %v2288_v24 = vadd.f32 1.0, %v4972_v32  ;;  %v6814_v4 = vld [vmem:[#allocation16_spill] sm:$0xff] }
 0x71b   :  { %4977 = vrcp.f32 %v2277_v14  ;;  %v6817_v14 = vld [vmem:[#allocation19_spill] sm:$0xff]  ;;  %v6818_v32 = vld [vmem:[#allocation20_spill] sm:$0xff] }
 0x71c   :  { %4979 = vrcp.f32 %v2288_v24  ;;  %v6822_v24 = vld [vmem:[#allocation24_spill] sm:$0xff] }
 0x723   :  { %v4974_v0 = vpop.eup %4973 }
 0x724   :  { %v4976_v8 = vpop.eup %4975 }
 0x725   :  { %v4978_v29 = vpop.eup %4977  ;;  %v2292_v48 = vmul.f32 %v4976_v8, %v4974_v0  ;;  %v6819_v0 = vld [vmem:[#allocation21_spill] sm:$0xff]  ;;  %v6820_v8 = vld [vmem:[#allocation22_spill] sm:$0xff] }
 0x726   :  { %v2291_v61 = vmul.f32 %v4978_v29, %v5984_v15  ;;  %v4980_v47 = vpop.eup %4979  ;;  %v6810_v15 = vld [vmem:[#allocation12_spill] sm:$0xff]  ;;  %v6821_v29 = vld [vmem:[#allocation23_spill] sm:$0xff] }
 0x728   :  { %v6096_v6 = vadd.f32 %v2292_v48, %v2291_v61  ;;  %v6823_v61 = vld [vmem:[#allocation25_spill] sm:$0xff]  ;;  %v6824_v48 = vld [vmem:[#allocation26_spill] sm:$0xff] }
 0x72a   :  { %4981 = vtanh.f32 %v6096_v6 }
 0x734   :  { %v4982_v42 = vpop.eup %4981 }
 0x735   :  { %v2295_v58 = vmul.f32 %v4982_v42, %v4980_v47  ;;  %v6825_v47 = vld [vmem:[#allocation27_spill] sm:$0xff]  ;;  %v6826_v42 = vld [vmem:[#allocation28_spill] sm:$0xff] }
 0x737   :  { %2361 = vmatmul.mubr.f32.vlgmr.msra.gmra.mrb[22].mxu0 %v2295_v58  ;;  %2432 = vmatmul.mubr.f32.vlgmr.msra.gmra.mrb[22].mxu1 %v2295_v58 }
 0x738   :  { %4417 = vmatpush1.bf16.msra.mxu0 %v5225_v9  ;;  %4449 = vmatpush1.bf16.msra.mxu1 %v5228_v13 }
 0x739   :  { %4419 = vmatprep.subr.bf16.mxu0 %v5232_v17  ;;  %4451 = vmatprep.subr.bf16.mxu1 %v5234_v18 }
 0x73a   :  { %2528 = vmatprep.mubr.f32.mxu0 %v6519_v5  ;;  %2599 = vmatprep.mubr.f32.mxu1 %v6519_v5 }
 0x73c   :  { %4421 = vmatpush1.bf16.msra.mxu0 %v5237_v22  ;;  %4453 = vmatpush1.bf16.msra.mxu1 %v5241_v26 }
 0x73d   :  { %4423 = vmatprep.subr.bf16.mxu0 %v5243_v27  ;;  %4455 = vmatprep.subr.bf16.mxu1 %v5245_v31 }
 0x740   :  { %4425 = vmatpush1.bf16.msra.mxu0 %v5248_v35  ;;  %4457 = vmatpush1.bf16.msra.mxu1 %v5252_v39 }
 0x741   :  { %4427 = vmatprep.subr.bf16.mxu0 %v5254_v40  ;;  %4459 = vmatprep.subr.bf16.mxu1 %v5257_v44 }
 0x744   :  { %4429 = vmatpush1.bf16.msra.mxu0 %v5260_v51  ;;  %4461 = vmatpush1.bf16.msra.mxu1 %v5264_v52 }
 0x745   :  { %4431 = vmatprep.subr.bf16.mxu0 %v5266_v53  ;;  %4463 = vmatprep.subr.bf16.mxu1 %v5269_v57 }
 0x748   :  { %4433 = vmatpush1.bf16.msra.mxu0 %v5272_v63  ;;  %4465 = vmatpush1.bf16.msra.mxu1 %v5276_v1 }
 0x749   :  { %4435 = vmatprep.subr.bf16.mxu0 %v5278_v2  ;;  %4467 = vmatprep.subr.bf16.mxu1 %v5281_v7 }
 0x74c   :  { %4437 = vmatpush1.bf16.msra.mxu0 %v5284_v16  ;;  %4469 = vmatpush1.bf16.msra.mxu1 %v5288_v19 }
 0x74d   :  { %4439 = vmatprep.subr.bf16.mxu0 %v5290_v20  ;;  %4471 = vmatprep.subr.bf16.mxu1 %v5293_v25 }
 0x750   :  { %4441 = vmatpush1.bf16.msra.mxu0 %v5296_v34  ;;  %4473 = vmatpush1.bf16.msra.mxu1 %v5300_v36 }
 0x751   :  { %4443 = vmatprep.subr.bf16.mxu0 %v5302_v37  ;;  %4475 = vmatprep.subr.bf16.mxu1 %v5305_v43 }
 0x754   :  { %4445 = vmatpush1.bf16.msra.mxu0 %v5308_v50  ;;  %4477 = vmatpush1.bf16.msra.mxu1 %v5312_v54 }
 0x755   :  { %4479 = vmatprep.subr.bf16.mxu0 %v5314_v55  ;;  %4543 = vmatprep.subr.bf16.mxu1 %v5317_v60 }
 0x757   :  { %2529 = vmatmul.mubr.f32.vlgmr.msra.gmra.mrb[24].mxu0 %v2295_v58  ;;  %2600 = vmatmul.mubr.f32.vlgmr.msra.gmra.mrb[24].mxu1 %v2295_v58  ;;  %v6827_v58 = vld [vmem:[#allocation29_spill] sm:$0xff] }
 0x758   :  { %4481 = vmatpush1.bf16.msra.mxu0 %v5320_v10  ;;  %4545 = vmatpush1.bf16.msra.mxu1 %v5324_v11 }
 0x759   :  { %4483 = vmatprep.subr.bf16.mxu0 %v5326_v12  ;;  %4547 = vmatprep.subr.bf16.mxu1 %v5329_v23 }
 0x75c   :  { %4485 = vmatpush1.bf16.msra.mxu0 %v5334_v33  ;;  %4549 = vmatpush1.bf16.msra.mxu1 %v5338_v38 }
 0x75d   :  { %4487 = vmatprep.subr.bf16.mxu0 %v5340_v41  ;;  %4551 = vmatprep.subr.bf16.mxu1 %v5343_v46 }
 0x760   :  { %4489 = vmatpush1.bf16.msra.mxu0 %v5348_v49  ;;  %4553 = vmatpush1.bf16.msra.mxu1 %v6810_v15 }
 0x761   :  { %4491 = vmatprep.subr.bf16.mxu0 %v6811_v45  ;;  %4555 = vmatprep.subr.bf16.mxu1 %v6812_v59 }
 0x764   :  { %4493 = vmatpush1.bf16.msra.mxu0 %v6813_v56  ;;  %4557 = vmatpush1.bf16.msra.mxu1 %v6814_v4 }
 0x765   :  { %4495 = vmatprep.subr.bf16.mxu0 %v6815_v30  ;;  %4559 = vmatprep.subr.bf16.mxu1 %v6816_v21  ;;  %v6865_v21 = vld [vmem:[#allocation65_spill] sm:$0xff] }
 0x768   :  { %4497 = vmatpush1.bf16.msra.mxu0 %v6817_v14  ;;  %4561 = vmatpush1.bf16.msra.mxu1 %v6818_v32  ;;  %v6828_v14 = vld [vmem:[#allocation30_spill] sm:$0xff]  ;;  %v6829_v32 = vld [vmem:[#allocation31_spill] sm:$0xff] }
 0x769   :  { %4499 = vmatprep.subr.bf16.mxu0 %v6819_v0  ;;  %4563 = vmatprep.subr.bf16.mxu1 %v6820_v8  ;;  %v6830_v0 = vld [vmem:[#allocation32_spill] sm:$0xff]  ;;  %v6831_v8 = vld [vmem:[#allocation33_spill] sm:$0xff] }
 0x76c   :  { %4501 = vmatpush1.bf16.msra.mxu0 %v6821_v29  ;;  %4565 = vmatpush1.bf16.msra.mxu1 %v6822_v24  ;;  %v6832_v29 = vld [vmem:[#allocation34_spill] sm:$0xff]  ;;  %v6833_v24 = vld [vmem:[#allocation35_spill] sm:$0xff] }
 0x76d   :  { %4503 = vmatprep.subr.bf16.mxu0 %v6823_v61  ;;  %4567 = vmatprep.subr.bf16.mxu1 %v6824_v48  ;;  %v6834_v61 = vld [vmem:[#allocation36_spill] sm:$0xff]  ;;  %v6835_v48 = vld [vmem:[#allocation37_spill] sm:$0xff] }
 0x770   :  { %4505 = vmatpush1.bf16.msra.mxu0 %v6825_v47  ;;  %4569 = vmatpush1.bf16.msra.mxu1 %v6826_v42  ;;  %v6836_v47 = vld [vmem:[#allocation38_spill] sm:$0xff]  ;;  %v6837_v42 = vld [vmem:[#allocation39_spill] sm:$0xff] }
 0x771   :  { %4507 = vmatprep.subr.bf16.mxu0 %v6827_v58  ;;  %4571 = vmatprep.subr.bf16.mxu1 %v6828_v14  ;;  %v6838_v58 = vld [vmem:[#allocation40_spill] sm:$0xff]  ;;  %v6839_v14 = vld [vmem:[#allocation41_spill] sm:$0xff] }
 0x774   :  { %4509 = vmatpush1.bf16.msra.mxu0 %v6829_v32  ;;  %4573 = vmatpush1.bf16.msra.mxu1 %v6830_v0  ;;  %v6840_v32 = vld [vmem:[#allocation42_spill] sm:$0xff]  ;;  %v6841_v0 = vld [vmem:[#allocation43_spill] sm:$0xff] }
 0x775   :  { %4511 = vmatprep.subr.bf16.mxu0 %v6831_v8  ;;  %4575 = vmatprep.subr.bf16.mxu1 %v6832_v29  ;;  %v6842_v8 = vld [vmem:[#allocation44_spill] sm:$0xff]  ;;  %v6843_v29 = vld [vmem:[#allocation45_spill] sm:$0xff] }
 0x778   :  { %4513 = vmatpush1.bf16.msra.mxu0 %v6833_v24  ;;  %4577 = vmatpush1.bf16.msra.mxu1 %v6834_v61  ;;  %v6844_v24 = vld [vmem:[#allocation46_spill] sm:$0xff]  ;;  %v6845_v61 = vld [vmem:[#allocation47_spill] sm:$0xff] }
 0x779   :  { %4515 = vmatprep.subr.bf16.mxu0 %v6835_v48  ;;  %4579 = vmatprep.subr.bf16.mxu1 %v6836_v47  ;;  %v6846_v48 = vld [vmem:[#allocation48_spill] sm:$0xff]  ;;  %v6847_v47 = vld [vmem:[#allocation49_spill] sm:$0xff] }
 0x77c   :  { %4517 = vmatpush1.bf16.msra.mxu0 %v6837_v42  ;;  %4581 = vmatpush1.bf16.msra.mxu1 %v6838_v58  ;;  %v6848_v42 = vld [vmem:[#allocation50_spill] sm:$0xff]  ;;  %v6849_v58 = vld [vmem:[#allocation51_spill] sm:$0xff] }
 0x77d   :  { %4519 = vmatprep.subr.bf16.mxu0 %v6839_v14  ;;  %4583 = vmatprep.subr.bf16.mxu1 %v6840_v32  ;;  %v6850_v14 = vld [vmem:[#allocation52_spill] sm:$0xff]  ;;  %v6851_v32 = vld [vmem:[#allocation53_spill] sm:$0xff] }
 0x780   :  { %4521 = vmatpush1.bf16.msra.mxu0 %v6841_v0  ;;  %4585 = vmatpush1.bf16.msra.mxu1 %v6842_v8  ;;  %v6852_v0 = vld [vmem:[#allocation54_spill] sm:$0xff]  ;;  %v6853_v8 = vld [vmem:[#allocation55_spill] sm:$0xff] }
 0x781   :  { %4523 = vmatprep.subr.bf16.mxu0 %v6843_v29  ;;  %4587 = vmatprep.subr.bf16.mxu1 %v6844_v24  ;;  %v6854_v29 = vld [vmem:[#allocation56_spill] sm:$0xff]  ;;  %v6855_v24 = vld [vmem:[#allocation57_spill] sm:$0xff] }
 0x784   :  { %4525 = vmatpush1.bf16.msra.mxu0 %v6845_v61  ;;  %4589 = vmatpush1.bf16.msra.mxu1 %v6846_v48  ;;  %v6856_v61 = vld [vmem:[#allocation58_spill] sm:$0xff]  ;;  %v6857_v48 = vld [vmem:[#allocation59_spill] sm:$0xff] }
 0x785   :  { %4527 = vmatprep.subr.bf16.mxu0 %v6847_v47  ;;  %4591 = vmatprep.subr.bf16.mxu1 %v6848_v42  ;;  %v6858_v47 = vld [vmem:[#allocation60_spill] sm:$0xff]  ;;  %v6859_v42 = vld [vmem:[#allocation61_spill] sm:$0xff] }
 0x788   :  { %4529 = vmatpush1.bf16.msra.mxu0 %v6849_v58  ;;  %4593 = vmatpush1.bf16.msra.mxu1 %v6850_v14  ;;  %v6860_v58 = vld [vmem:[#allocation62_spill] sm:$0xff]  ;;  %v6861_v14 = vld [vmem:[#allocation63_spill] sm:$0xff] }
 0x789   :  { %4531 = vmatprep.subr.bf16.mxu0 %v6851_v32  ;;  %4595 = vmatprep.subr.bf16.mxu1 %v6852_v0  ;;  %v6862_v32 = vld [vmem:[#allocation64_spill] sm:$0xff]  ;;  %v6863_v0 = vld [vmem:[#allocation10_spill] sm:$0xff] }
 0x78c   :  { %4533 = vmatpush1.bf16.msra.mxu0 %v6853_v8  ;;  %4597 = vmatpush1.bf16.msra.mxu1 %v6854_v29  ;;  %v6864_v8 = vld [vmem:[#allocation11_spill] sm:$0xff] }
 0x78d   :  { %4535 = vmatprep.subr.bf16.mxu0 %v6855_v24  ;;  %4599 = vmatprep.subr.bf16.mxu1 %v6856_v61 }
 0x790   :  { %4537 = vmatpush1.bf16.msra.mxu0 %v6857_v48  ;;  %4601 = vmatpush1.bf16.msra.mxu1 %v6858_v47 }
 0x791   :  { %4539 = vmatprep.subr.bf16.mxu0 %v6859_v42  ;;  %4603 = vmatprep.subr.bf16.mxu1 %v6860_v58  ;;  %v6866_v58 = vld [vmem:[#allocation67_spill] sm:$0xff] }
 0x794   :  { %4541 = vmatpush1.bf16.msra.mxu0 %v6861_v14  ;;  %4605 = vmatpush1.bf16.msra.mxu1 %v6862_v32  ;;  %v6867_v32 = vld [vmem:[#allocation68_spill] sm:$0xff] }
 0x795   :  { %4607 = vmatprep.subr.bf16.mxu0 %v6863_v0  ;;  %4639 = vmatprep.subr.bf16.mxu1 %v6864_v8 }
 0x80a   :  { %v2362_v29 = vpop.f32.mrb[22].mxu0  ;;  %v2433_v24 = vpop.f32.mrb[22].mxu1 }
 0x80b   :  { %v2363_v61 = vadd.f32 %v2362_v29, %v6865_v21  ;;  %v2364_v30 = vpop.f32.mrb[23].mxu0  ;;  %v2435_v48 = vpop.f32.mrb[23].mxu1  ;;  %v2434_v59 = vadd.f32 %v2433_v24, %v6867_v32 }
 0x80c   :  { %v2365_v47 = vadd.f32 %v2364_v30, %v6691_v3  ;;  %v2436_v14 = vadd.f32 %v2435_v48, %v6866_v58 }
 0x80d   :  { %v3246_v4 = vmul.f32 -1.442695, %v2363_v61 }
 0x80e   :  { %v3247_v42 = vmul.f32 -1.442695, %v2365_v47  ;;  %v3248_v56 = vmul.f32 -1.442695, %v2436_v14 }
 0x80f   :  { %4983 = vpow2.f32 %v3246_v4 }
 0x810   :  { %4985 = vpow2.f32 %v3247_v42 }
 0x811   :  { %4987 = vpow2.f32 %v3248_v56 }
 0x812   :  { %4989 = vtanh.f32 %v2434_v59 }
 0x819   :  { %v4984_v0 = vpop.eup %4983 }
 0x81a   :  { %v4986_v45 = vpop.eup %4985  ;;  %v2441_v8 = vadd.f32 1.0, %v4984_v0 }
 0x81b   :  { %v2447_v15 = vadd.f32 1.0, %v4986_v45  ;;  %v4988_v29 = vpop.eup %4987 }
 0x81c   :  { %4991 = vrcp.f32 %v2441_v8  ;;  %v4990_v21 = vpop.eup %4989  ;;  %v2454_v4 = vadd.f32 1.0, %v4988_v29  ;;  %v2463_v8 = vld [vmem:[#allocation3 + $0x30] sm:$0xff] }
 0x81d   :  { %4993 = vrcp.f32 %v2447_v15 }
 0x81e   :  { %4995 = vrcp.f32 %v2454_v4 }
 0x826   :  { %v4992_v30 = vpop.eup %4991 }
 0x827   :  { %v4994_v61 = vpop.eup %4993  ;;  %v2458_v47 = vmul.f32 %v4992_v30, %v4990_v21 }
 0x828   :  { %v2457_v42 = vmul.f32 %v4994_v61, %v6090_v62  ;;  %v4996_v61 = vpop.eup %4995 }
 0x82a   :  { %v2530_v48 = vpop.f32.mrb[24].mxu0  ;;  %v2601_v14 = vpop.f32.mrb[24].mxu1  ;;  %v6202_v58 = vadd.f32 %v2458_v47, %v2457_v42 }
 0x82b   :  { %v2532_v24 = vpop.f32.mrb[25].mxu0  ;;  %v2603_v0 = vpop.f32.mrb[25].mxu1 }
 0x82c   :  { %v2610_v56 = vcombine.low %v2530_v48, %v2532_v24  ;;  %v2611_v59 = vcombine.low %v2601_v14, %v2603_v0  ;;  %4997 = vtanh.f32 %v6202_v58 }
 0x82e   :  { %v2618_v15 = vrot.slane %v2610_v56, %v5518_v28  ;;  %v2625_v45 = vrot.slane %v2611_v59, %v5518_v28 }
 0x830   :  { %v2626_v21 = vcombine.low %v2618_v15, %v2625_v45 }
 0x832   :  { %v2628_v29 = vadd.f32 %v2626_v21, %v2463_v8 }
 0x834   :  { %v3249_v30 = vmul.f32 -1.442695, %v2628_v29  ;;  %v2636_v62 = vrot.slane %v2628_v29, 2  ;;  %v2647_v42 = vrot.slane %v2628_v29, 6  ;;  %v2644_v24 = vrot.slane %v2628_v29, 4 }
 0x836   :  { %v4998_v32 = vpop.eup %4997  ;;  %4999 = vpow2.f32 %v3249_v30  ;;  %v3250_v47 = vmul.f32 -1.442695, %v2636_v62  ;;  %v3251_v48 = vmul.f32 -1.442695, %v2647_v42  ;;  %v6911_v42 = vld [vmem:[#allocation55_spill] sm:$0xff] }
 0x837   :  { %v2461_v4 = vmul.f32 %v4998_v32, %v4996_v61 }
 0x838   :  { %5001 = vpow2.f32 %v3250_v47 }
 0x839   :  { %2724 = vmatprep.mubr.f32.mxu0 %v2461_v4  ;;  %2795 = vmatprep.mubr.f32.mxu1 %v2461_v4  ;;  %5003 = vpow2.f32 %v3251_v48  ;;  %v6912_v48 = vld [vmem:[#allocation56_spill] sm:$0xff] }
 0x840   :  { %v5000_v14 = vpop.eup %4999 }
 0x841   :  { %v2632_v0 = vadd.f32 1.0, %v5000_v14  ;;  %v6913_v14 = vld [vmem:[#allocation57_spill] sm:$0xff] }
 0x842   :  { %v5002_v56 = vpop.eup %5001 }
 0x843   :  { %5005 = vrcp.f32 %v2632_v0  ;;  %v2641_v59 = vadd.f32 1.0, %v5002_v56  ;;  %v5004_v15 = vpop.eup %5003  ;;  %v6915_v0 = vld [vmem:[#allocation59_spill] sm:$0xff]  ;;  %v6916_v56 = vld [vmem:[#allocation60_spill] sm:$0xff] }
 0x844   :  { %5007 = vtanh.f32 %v2644_v24  ;;  %v2652_v30 = vadd.f32 1.0, %v5004_v15  ;;  %v6914_v24 = vld [vmem:[#allocation58_spill] sm:$0xff] }
 0x845   :  { %5009 = vrcp.f32 %v2641_v59  ;;  %v6917_v59 = vld [vmem:[#allocation61_spill] sm:$0xff]  ;;  %v6918_v15 = vld [vmem:[#allocation62_spill] sm:$0xff] }
 0x846   :  { %5011 = vrcp.f32 %v2652_v30 }
 0x84d   :  { %v5006_v45 = vpop.eup %5005 }
 0x84e   :  { %v5008_v8 = vpop.eup %5007 }
 0x84f   :  { %v5010_v21 = vpop.eup %5009  ;;  %v2656_v62 = vmul.f32 %v5008_v8, %v5006_v45  ;;  %v6919_v45 = vld [vmem:[#allocation63_spill] sm:$0xff]  ;;  %v6920_v8 = vld [vmem:[#allocation64_spill] sm:$0xff] }
 0x850   :  { %v2655_v32 = vmul.f32 %v5010_v21, %v6096_v6  ;;  %v5012_v29 = vpop.eup %5011  ;;  %v6910_v6 = vld [vmem:[#allocation54_spill] sm:$0xff] }
 0x852   :  { %v6208_v61 = vadd.f32 %v2656_v62, %v2655_v32  ;;  %v6921_v32 = vld [vmem:[#allocation65_spill] sm:$0xff] }
 0x854   :  { %5013 = vtanh.f32 %v6208_v61 }
 0x85e   :  { %v5014_v47 = vpop.eup %5013 }
 0x85f   :  { %v2659_v4 = vmul.f32 %v5014_v47, %v5012_v29 }
 0x861   :  { %2725 = vmatmul.mubr.f32.vlgmr.msra.gmra.mrb[26].mxu0 %v2659_v4  ;;  %2796 = vmatmul.mubr.f32.vlgmr.msra.gmra.mrb[26].mxu1 %v2659_v4 }
 0x862   :  { %4609 = vmatpush1.bf16.msra.mxu0 %v5225_v9  ;;  %4641 = vmatpush1.bf16.msra.mxu1 %v5228_v13  ;;  %v6868_v9 = vld [vmem:[#allocation12_spill] sm:$0xff]  ;;  %v6869_v13 = vld [vmem:[#allocation13_spill] sm:$0xff] }
 0x863   :  { %4611 = vmatprep.subr.bf16.mxu0 %v5232_v17  ;;  %4643 = vmatprep.subr.bf16.mxu1 %v5234_v18  ;;  %v6870_v17 = vld [vmem:[#allocation14_spill] sm:$0xff]  ;;  %v6871_v18 = vld [vmem:[#allocation15_spill] sm:$0xff] }
 0x864   :  { %2892 = vmatprep.mubr.f32.mxu0 %v6519_v5  ;;  %2963 = vmatprep.mubr.f32.mxu1 %v6519_v5  ;;  %v6909_v5 = vld [vmem:[#allocation53_spill] sm:$0xff] }
 0x866   :  { %4613 = vmatpush1.bf16.msra.mxu0 %v5237_v22  ;;  %4645 = vmatpush1.bf16.msra.mxu1 %v5241_v26  ;;  %v6872_v22 = vld [vmem:[#allocation16_spill] sm:$0xff]  ;;  %v6873_v26 = vld [vmem:[#allocation17_spill] sm:$0xff] }
 0x867   :  { %4615 = vmatprep.subr.bf16.mxu0 %v5243_v27  ;;  %4647 = vmatprep.subr.bf16.mxu1 %v5245_v31  ;;  %v6874_v27 = vld [vmem:[#allocation18_spill] sm:$0xff]  ;;  %v6875_v31 = vld [vmem:[#allocation19_spill] sm:$0xff] }
 0x86a   :  { %4617 = vmatpush1.bf16.msra.mxu0 %v5248_v35  ;;  %4649 = vmatpush1.bf16.msra.mxu1 %v5252_v39  ;;  %v6876_v35 = vld [vmem:[#allocation20_spill] sm:$0xff]  ;;  %v6877_v39 = vld [vmem:[#allocation21_spill] sm:$0xff] }
 0x86b   :  { %4619 = vmatprep.subr.bf16.mxu0 %v5254_v40  ;;  %4651 = vmatprep.subr.bf16.mxu1 %v5257_v44  ;;  %v6878_v40 = vld [vmem:[#allocation22_spill] sm:$0xff]  ;;  %v6879_v44 = vld [vmem:[#allocation23_spill] sm:$0xff] }
 0x86e   :  { %4621 = vmatpush1.bf16.msra.mxu0 %v5260_v51  ;;  %4653 = vmatpush1.bf16.msra.mxu1 %v5264_v52  ;;  %v6880_v51 = vld [vmem:[#allocation24_spill] sm:$0xff]  ;;  %v6881_v52 = vld [vmem:[#allocation25_spill] sm:$0xff] }
 0x86f   :  { %4623 = vmatprep.subr.bf16.mxu0 %v5266_v53  ;;  %4655 = vmatprep.subr.bf16.mxu1 %v5269_v57  ;;  %v6882_v53 = vld [vmem:[#allocation26_spill] sm:$0xff]  ;;  %v6883_v57 = vld [vmem:[#allocation27_spill] sm:$0xff] }
 0x872   :  { %4625 = vmatpush1.bf16.msra.mxu0 %v5272_v63  ;;  %4657 = vmatpush1.bf16.msra.mxu1 %v5276_v1  ;;  %v6884_v63 = vld [vmem:[#allocation28_spill] sm:$0xff]  ;;  %v6885_v1 = vld [vmem:[#allocation29_spill] sm:$0xff] }
 0x873   :  { %4627 = vmatprep.subr.bf16.mxu0 %v5278_v2  ;;  %4659 = vmatprep.subr.bf16.mxu1 %v5281_v7  ;;  %v6886_v2 = vld [vmem:[#allocation30_spill] sm:$0xff]  ;;  %v6887_v7 = vld [vmem:[#allocation31_spill] sm:$0xff] }
 0x876   :  { %4629 = vmatpush1.bf16.msra.mxu0 %v5284_v16  ;;  %4661 = vmatpush1.bf16.msra.mxu1 %v5288_v19  ;;  %v6888_v16 = vld [vmem:[#allocation32_spill] sm:$0xff]  ;;  %v6889_v19 = vld [vmem:[#allocation33_spill] sm:$0xff] }
 0x877   :  { %4631 = vmatprep.subr.bf16.mxu0 %v5290_v20  ;;  %4663 = vmatprep.subr.bf16.mxu1 %v5293_v25  ;;  %v6890_v20 = vld [vmem:[#allocation34_spill] sm:$0xff]  ;;  %v6891_v25 = vld [vmem:[#allocation35_spill] sm:$0xff] }
 0x87a   :  { %4633 = vmatpush1.bf16.msra.mxu0 %v5296_v34  ;;  %4665 = vmatpush1.bf16.msra.mxu1 %v5300_v36  ;;  %v6892_v34 = vld [vmem:[#allocation36_spill] sm:$0xff]  ;;  %v6893_v36 = vld [vmem:[#allocation37_spill] sm:$0xff] }
 0x87b   :  { %4635 = vmatprep.subr.bf16.mxu0 %v5302_v37  ;;  %4667 = vmatprep.subr.bf16.mxu1 %v5305_v43  ;;  %v6894_v37 = vld [vmem:[#allocation38_spill] sm:$0xff]  ;;  %v6895_v43 = vld [vmem:[#allocation39_spill] sm:$0xff] }
 0x87e   :  { %4637 = vmatpush1.bf16.msra.mxu0 %v5308_v50  ;;  %4669 = vmatpush1.bf16.msra.mxu1 %v5312_v54  ;;  %v6896_v50 = vld [vmem:[#allocation40_spill] sm:$0xff]  ;;  %v6897_v54 = vld [vmem:[#allocation41_spill] sm:$0xff] }
 0x87f   :  { %4671 = vmatprep.subr.bf16.mxu0 %v5314_v55  ;;  %4735 = vmatprep.subr.bf16.mxu1 %v5317_v60  ;;  %v6898_v55 = vld [vmem:[#allocation42_spill] sm:$0xff]  ;;  %v6899_v60 = vld [vmem:[#allocation43_spill] sm:$0xff] }
 0x881   :  { %2893 = vmatmul.mubr.f32.vlgmr.msra.gmra.mrb[28].mxu0 %v2659_v4  ;;  %2964 = vmatmul.mubr.f32.vlgmr.msra.gmra.mrb[28].mxu1 %v2659_v4 }
 0x882   :  { %4673 = vmatpush1.bf16.msra.mxu0 %v5320_v10  ;;  %4737 = vmatpush1.bf16.msra.mxu1 %v5324_v11  ;;  %v6900_v10 = vld [vmem:[#allocation44_spill] sm:$0xff]  ;;  %v6901_v11 = vld [vmem:[#allocation45_spill] sm:$0xff] }
 0x883   :  { %4675 = vmatprep.subr.bf16.mxu0 %v5326_v12  ;;  %4739 = vmatprep.subr.bf16.mxu1 %v5329_v23  ;;  %v6902_v12 = vld [vmem:[#allocation46_spill] sm:$0xff]  ;;  %v6903_v23 = vld [vmem:[#allocation47_spill] sm:$0xff] }
 0x886   :  { %4677 = vmatpush1.bf16.msra.mxu0 %v5334_v33  ;;  %4741 = vmatpush1.bf16.msra.mxu1 %v5338_v38  ;;  %v6904_v33 = vld [vmem:[#allocation48_spill] sm:$0xff]  ;;  %v6905_v38 = vld [vmem:[#allocation49_spill] sm:$0xff] }
 0x887   :  { %4679 = vmatprep.subr.bf16.mxu0 %v5340_v41  ;;  %4743 = vmatprep.subr.bf16.mxu1 %v5343_v46  ;;  %v6906_v41 = vld [vmem:[#allocation50_spill] sm:$0xff]  ;;  %v6907_v46 = vld [vmem:[#allocation51_spill] sm:$0xff] }
 0x88a   :  { %4681 = vmatpush1.bf16.msra.mxu0 %v5348_v49  ;;  %4745 = vmatpush1.bf16.msra.mxu1 %v6868_v9  ;;  %v6908_v49 = vld [vmem:[#allocation52_spill] sm:$0xff] }
 0x88b   :  { %4683 = vmatprep.subr.bf16.mxu0 %v6869_v13  ;;  %4747 = vmatprep.subr.bf16.mxu1 %v6870_v17  ;;  %v6922_v17 = vld [vmem:[#allocation67_spill] sm:$0xff] }
 0x88e   :  { %4685 = vmatpush1.bf16.msra.mxu0 %v6871_v18  ;;  %4749 = vmatpush1.bf16.msra.mxu1 %v6872_v22 }
 0x88f   :  { %4687 = vmatprep.subr.bf16.mxu0 %v6873_v26  ;;  %4751 = vmatprep.subr.bf16.mxu1 %v6874_v27  ;;  %v6923_v26 = vld [vmem:[#allocation68_spill] sm:$0xff] }
 0x892   :  { %4689 = vmatpush1.bf16.msra.mxu0 %v6875_v31  ;;  %4753 = vmatpush1.bf16.msra.mxu1 %v6876_v35 }
 0x893   :  { %4691 = vmatprep.subr.bf16.mxu0 %v6877_v39  ;;  %4755 = vmatprep.subr.bf16.mxu1 %v6878_v40 }
 0x896   :  { %4693 = vmatpush1.bf16.msra.mxu0 %v6879_v44  ;;  %4757 = vmatpush1.bf16.msra.mxu1 %v6880_v51 }
 0x897   :  { %4695 = vmatprep.subr.bf16.mxu0 %v6881_v52  ;;  %4759 = vmatprep.subr.bf16.mxu1 %v6882_v53 }
 0x89a   :  { %4697 = vmatpush1.bf16.msra.mxu0 %v6883_v57  ;;  %4761 = vmatpush1.bf16.msra.mxu1 %v6884_v63 }
 0x89b   :  { %4699 = vmatprep.subr.bf16.mxu0 %v6885_v1  ;;  %4763 = vmatprep.subr.bf16.mxu1 %v6886_v2 }
 0x89e   :  { %4701 = vmatpush1.bf16.msra.mxu0 %v6887_v7  ;;  %4765 = vmatpush1.bf16.msra.mxu1 %v6888_v16 }
 0x89f   :  { %4703 = vmatprep.subr.bf16.mxu0 %v6889_v19  ;;  %4767 = vmatprep.subr.bf16.mxu1 %v6890_v20 }
 0x8a2   :  { %4705 = vmatpush1.bf16.msra.mxu0 %v6891_v25  ;;  %4769 = vmatpush1.bf16.msra.mxu1 %v6892_v34 }
 0x8a3   :  { %4707 = vmatprep.subr.bf16.mxu0 %v6893_v36  ;;  %4771 = vmatprep.subr.bf16.mxu1 %v6894_v37 }
 0x8a6   :  { %4709 = vmatpush1.bf16.msra.mxu0 %v6895_v43  ;;  %4773 = vmatpush1.bf16.msra.mxu1 %v6896_v50  ;;  %v2827_v43 = vld [vmem:[#allocation3 + $0x38] sm:$0xff] }
 0x8a7   :  { %4711 = vmatprep.subr.bf16.mxu0 %v6897_v54  ;;  %4775 = vmatprep.subr.bf16.mxu1 %v6898_v55 }
 0x8aa   :  { %4713 = vmatpush1.bf16.msra.mxu0 %v6899_v60  ;;  %4777 = vmatpush1.bf16.msra.mxu1 %v6900_v10 }
 0x8ab   :  { %4715 = vmatprep.subr.bf16.mxu0 %v6901_v11  ;;  %4779 = vmatprep.subr.bf16.mxu1 %v6902_v12 }
 0x8ae   :  { %4717 = vmatpush1.bf16.msra.mxu0 %v6903_v23  ;;  %4781 = vmatpush1.bf16.msra.mxu1 %v6904_v33 }
 0x8af   :  { %4719 = vmatprep.subr.bf16.mxu0 %v6905_v38  ;;  %4783 = vmatprep.subr.bf16.mxu1 %v6906_v41 }
 0x8b2   :  { %4721 = vmatpush1.bf16.msra.mxu0 %v6907_v46  ;;  %4785 = vmatpush1.bf16.msra.mxu1 %v6908_v49 }
 0x8b3   :  { %4723 = vmatprep.subr.bf16.mxu0 %v6909_v5  ;;  %4787 = vmatprep.subr.bf16.mxu1 %v6910_v6 }
 0x8b6   :  { %4725 = vmatpush1.bf16.msra.mxu0 %v6911_v42  ;;  %4789 = vmatpush1.bf16.msra.mxu1 %v6912_v48 }
 0x8b7   :  { %4727 = vmatprep.subr.bf16.mxu0 %v6913_v14  ;;  %4791 = vmatprep.subr.bf16.mxu1 %v6914_v24 }
 0x8ba   :  { %4729 = vmatpush1.bf16.msra.mxu0 %v6915_v0  ;;  %4793 = vmatpush1.bf16.msra.mxu1 %v6916_v56 }
 0x8bb   :  { %4731 = vmatprep.subr.bf16.mxu0 %v6917_v59  ;;  %4795 = vmatprep.subr.bf16.mxu1 %v6918_v15 }
 0x8be   :  { %4733 = vmatpush1.bf16.msra.mxu0 %v6919_v45  ;;  %4797 = vmatpush1.bf16.msra.mxu1 %v6920_v8 }
 0x934   :  { %v2726_v21 = vpop.f32.mrb[26].mxu0  ;;  %v2797_v30 = vpop.f32.mrb[26].mxu1 }
 0x935   :  { %v2727_v62 = vadd.f32 %v2726_v21, %v6921_v32  ;;  %v2728_v29 = vpop.f32.mrb[27].mxu0  ;;  %v2799_v47 = vpop.f32.mrb[27].mxu1  ;;  %v2798_v27 = vadd.f32 %v2797_v30, %v6923_v26 }
 0x936   :  { %v2729_v4 = vadd.f32 %v2728_v29, %v6691_v3  ;;  %v2800_v18 = vadd.f32 %v2799_v47, %v6922_v17 }
 0x937   :  { %v3252_v9 = vmul.f32 -1.442695, %v2727_v62 }
 0x938   :  { %v3253_v13 = vmul.f32 -1.442695, %v2729_v4  ;;  %v3254_v22 = vmul.f32 -1.442695, %v2800_v18 }
 0x939   :  { %5015 = vpow2.f32 %v3252_v9 }
 0x93a   :  { %5017 = vpow2.f32 %v3253_v13 }
 0x93b   :  { %5019 = vpow2.f32 %v3254_v22 }
 0x93c   :  { %5021 = vtanh.f32 %v2798_v27 }
 0x943   :  { %v5016_v31 = vpop.eup %5015 }
 0x944   :  { %v5018_v35 = vpop.eup %5017  ;;  %v2805_v39 = vadd.f32 1.0, %v5016_v31 }
 0x945   :  { %v2811_v40 = vadd.f32 1.0, %v5018_v35  ;;  %v5020_v44 = vpop.eup %5019 }
 0x946   :  { %5023 = vrcp.f32 %v2805_v39  ;;  %v5022_v51 = vpop.eup %5021  ;;  %v2818_v63 = vadd.f32 1.0, %v5020_v44 }
 0x947   :  { %5025 = vrcp.f32 %v2811_v40 }
 0x948   :  { %5027 = vrcp.f32 %v2818_v63 }
 0x950   :  { %v5024_v52 = vpop.eup %5023 }
 0x951   :  { %v5026_v53 = vpop.eup %5025  ;;  %v2822_v57 = vmul.f32 %v5024_v52, %v5022_v51 }
 0x952   :  { %v2821_v1 = vmul.f32 %v5026_v53, %v6202_v58  ;;  %v5028_v60 = vpop.eup %5027 }
 0x954   :  { %v2894_v2 = vpop.f32.mrb[28].mxu0  ;;  %v2965_v7 = vpop.f32.mrb[28].mxu1  ;;  %v6312_v16 = vadd.f32 %v2822_v57, %v2821_v1  ;;  %v3261_v57 = vld [vmem:[%s6336_s4] ss:$0 sm:$0xff] }
 0x955   :  { %v2896_v19 = vpop.f32.mrb[29].mxu0  ;;  %v2967_v20 = vpop.f32.mrb[29].mxu1 }
 0x956   :  { %v2974_v25 = vcombine.low %v2894_v2, %v2896_v19  ;;  %v2975_v34 = vcombine.low %v2965_v7, %v2967_v20  ;;  %5029 = vtanh.f32 %v6312_v16  ;;  %v3203_v7 = vstv %s6337_s5 }
 0x958   :  { %v2982_v36 = vrot.slane %v2974_v25, %v5518_v28  ;;  %v2989_v37 = vrot.slane %v2975_v34, %v5518_v28 }
 0x95a   :  { %v2990_v50 = vcombine.low %v2982_v36, %v2989_v37 }
 0x95c   :  { %v2992_v54 = vadd.f32 %v2990_v50, %v2827_v43 }
 0x95e   :  { %v3255_v55 = vmul.f32 -1.442695, %v2992_v54  ;;  %v3000_v58 = vrot.slane %v2992_v54, 2  ;;  %v3011_v23 = vrot.slane %v2992_v54, 6  ;;  %v3008_v41 = vrot.slane %v2992_v54, 4 }
 0x960   :  { %v5030_v10 = vpop.eup %5029  ;;  %5031 = vpow2.f32 %v3255_v55  ;;  %v3256_v11 = vmul.f32 -1.442695, %v3000_v58  ;;  %v3257_v33 = vmul.f32 -1.442695, %v3011_v23 }
 0x961   :  { %v2825_v12 = vmul.f32 %v5030_v10, %v5028_v60 }
 0x962   :  { %5033 = vpow2.f32 %v3256_v11 }
 0x963   :  { %3088 = vmatprep.mubr.f32.mxu0 %v2825_v12  ;;  %3159 = vmatprep.mubr.f32.mxu1 %v2825_v12  ;;  %5035 = vpow2.f32 %v3257_v33 }
 0x96a   :  { %v5032_v38 = vpop.eup %5031 }
 0x96b   :  { %v2996_v46 = vadd.f32 1.0, %v5032_v38 }
 0x96c   :  { %v5034_v49 = vpop.eup %5033 }
 0x96d   :  { %5037 = vrcp.f32 %v2996_v46  ;;  %v3005_v28 = vadd.f32 1.0, %v5034_v49  ;;  %v5036_v5 = vpop.eup %5035 }
 0x96e   :  { %5039 = vtanh.f32 %v3008_v41  ;;  %v3016_v14 = vadd.f32 1.0, %v5036_v5 }
 0x96f   :  { %5041 = vrcp.f32 %v3005_v28 }
 0x970   :  { %5043 = vrcp.f32 %v3016_v14 }
 0x977   :  { %v5038_v6 = vpop.eup %5037 }
 0x978   :  { %v5040_v42 = vpop.eup %5039 }
 0x979   :  { %v5042_v48 = vpop.eup %5041  ;;  %v3020_v0 = vmul.f32 %v5040_v42, %v5038_v6 }
 0x97a   :  { %v3019_v24 = vmul.f32 %v5042_v48, %v6208_v61  ;;  %v5044_v59 = vpop.eup %5043 }
 0x97c   :  { %v3021_v56 = vadd.f32 %v3020_v0, %v3019_v24 }
 0x97e   :  { %5045 = vtanh.f32 %v3021_v56 }
 0x988   :  { %v5046_v15 = vpop.eup %5045 }
 0x989   :  { %v3023_v45 = vmul.f32 %v5046_v15, %v5044_v59 }
 0x98b   :  { %3089 = vmatmul.mubr.f32.vlgmr.msra.gmra.mrb[30].mxu0 %v3023_v45  ;;  %3160 = vmatmul.mubr.f32.vlgmr.msra.gmra.mrb[30].mxu1 %v3023_v45 }
 0xa5e   :  { %v3090_v8 = vpop.f32.mrb[30].mxu0  ;;  %v3161_v21 = vpop.f32.mrb[30].mxu1 }
 0xa5f   :  { %v3091_v30 = vadd.f32 %v3090_v8, %v6921_v32  ;;  %v3092_v62 = vpop.f32.mrb[31].mxu0  ;;  %v3163_v29 = vpop.f32.mrb[31].mxu1  ;;  %v3162_v18 = vadd.f32 %v3161_v21, %v6923_v26 }
 0xa60   :  { %v3093_v47 = vadd.f32 %v3092_v62, %v6691_v3  ;;  %v3164_v61 = vadd.f32 %v3163_v29, %v6922_v17 }
 0xa61   :  { %v3258_v4 = vmul.f32 -1.442695, %v3091_v30 }
 0xa62   :  { %v3259_v9 = vmul.f32 -1.442695, %v3093_v47  ;;  %v3260_v13 = vmul.f32 -1.442695, %v3164_v61 }
 0xa63   :  { %5047 = vpow2.f32 %v3258_v4 }
 0xa64   :  { %5049 = vpow2.f32 %v3259_v9 }
 0xa65   :  { %5051 = vpow2.f32 %v3260_v13 }
 0xa66   :  { %5053 = vtanh.f32 %v3162_v18 }
 0xa6d   :  { %v5048_v22 = vpop.eup %5047 }
 0xa6e   :  { %v5050_v27 = vpop.eup %5049  ;;  %v3169_v31 = vadd.f32 1.0, %v5048_v22 }
 0xa6f   :  { %v3175_v35 = vadd.f32 1.0, %v5050_v27  ;;  %v5052_v32 = vpop.eup %5051 }
 0xa70   :  { %5055 = vrcp.f32 %v3169_v31  ;;  %v5054_v39 = vpop.eup %5053  ;;  %v3182_v51 = vadd.f32 1.0, %v5052_v32 }
 0xa71   :  { %5057 = vrcp.f32 %v3175_v35 }
 0xa72   :  { %5059 = vrcp.f32 %v3182_v51 }
 0xa7a   :  { %v5056_v3 = vpop.eup %5055 }
 0xa7b   :  { %v5058_v40 = vpop.eup %5057  ;;  %v3186_v44 = vmul.f32 %v5056_v3, %v5054_v39 }
 0xa7c   :  { %v3185_v52 = vmul.f32 %v5058_v40, %v6312_v16  ;;  %v5060_v26 = vpop.eup %5059 }
 0xa7e   :  { %v3187_v17 = vadd.f32 %v3186_v44, %v3185_v52 }
 0xa80   :  { %5061 = vtanh.f32 %v3187_v17 }
 0xa8a   :  { %v5062_v53 = vpop.eup %5061 }
 0xa8b   :  { %v3189_v63 = vmul.f32 %v5062_v53, %v5060_v26 }
 0xa8d   :  { %v3197_v1 = vmul.f32 %v3261_v57, %v3189_v63 }
 0xa8f   :  { %v3199_v2 = vsel %vm3198_vm0, %v3197_v1, 0.0 }
 0xa90   :  { %3200 = vadd.xlane.f32.xlu0 %v3199_v2 }
 0xb1d   :  { %v3201_v19 = vpop.xlane.xlu0 %3200 }
 0xb1e   :  { %v3204_v16 = vadd.f32 %v3203_v7, %v3201_v19 }
 0xb20   :  { %3206 = vst.msk [vmem:[%s6338_s6] sm:$0x3] %vm3205_vm1, %v3204_v16 }
 0xb21   :  { %3211 = vsyncpa [#allocation4], 1 }
 0xb22   :  { %3212 = vsyncpa [#allocation6], 1 }

</bundles_post_ra>
